<compile_context>
chip_gen: v7x
topology: tpu7x:2x2x1
jax: 0.10.0
libtpu: 0.0.40
codegen_flags: <defaults>
</compile_context>

<pallas_src>
import functools

import jax
import jax.numpy as jnp
from jax.experimental import pallas as pl
from jax.experimental.pallas import tpu as pltpu


STEM_CH = 128          # lane-dense: feature channels fill the 128-wide lane axis
NUM_BASE_CLASSES = 1000
NUM_CLASSES = 10


# ----------------------------------------------------------------------------
# Fused Pallas kernel: conv stem -> residual block -> GAP -> folded classifier
# ----------------------------------------------------------------------------
def fused_resnet_kernel(xp_ref, w1_ref, b1_ref, w2_ref, b2_ref, w3_ref, b3_ref,
                        hw_ref, hb_ref, o_ref, pad1_ref, pad2_ref,
                        *, H, W, C_in, C_mid, n_classes):
    """One grid step == one image.

    xp_ref   : (1, H+2, W+2, C_in)  zero-padded NHWC input (f32)
    wK_ref   : (9, C_in_K, C_mid)   3x3 conv weights, tap-major (dh, dw), bf16
    bK_ref   : (1, C_mid)           conv biases (f32)
    hw_ref   : (C_mid, n_classes)   folded classifier weight  cls_w @ fc_w
    hb_ref   : (1, n_classes)       folded classifier bias    cls_b @ fc_w + fc_b
    o_ref    : (1, 1, n_classes)    output logits
    padK_ref : (H+2, W+2, C_mid)    VMEM scratch for zero-padded intermediates
    """
    Hp, Wp = H + 2, W + 2

    def conv3x3(xp_val, w_ref, b_ref, c_in, residual=None, relu=True):
        # 3x3 conv as 9 shifted-window matmuls, bf16 MXU inputs, f32 accumulation.
        acc = jnp.zeros((H * W, C_mid), jnp.float32)
        for t in range(9):
            dh, dw = divmod(t, 3)
            tap = xp_val[dh:dh + H, dw:dw + W, :]
            tap = tap.reshape(H * W, c_in).astype(jnp.bfloat16)
            acc = acc + jnp.dot(tap, w_ref[t], preferred_element_type=jnp.float32)
        acc = acc + b_ref[...]
        if residual is not None:
            acc = acc + residual          # fused residual-add epilogue
        if relu:
            acc = jnp.maximum(acc, 0.0)   # fused ReLU epilogue
        return acc                        # (H*W, C_mid) f32

    # --- stem conv (C_in -> C_mid) + ReLU ---
    x0 = xp_ref[0].astype(jnp.float32)                  # (Hp, Wp, C_in)
    h1 = conv3x3(x0, w1_ref, b1_ref, C_in)              # (H*W, C_mid)

    # Zero-pad h1 into VMEM scratch for the next conv (border stays zero).
    pad1_ref[...] = jnp.zeros((Hp, Wp, C_mid), jnp.float32)
    pad1_ref[1:H + 1, 1:W + 1, :] = h1.reshape(H, W, C_mid)

    # --- residual block: conv+ReLU, then conv with skip-add+ReLU fused in epilogue ---
    r = conv3x3(pad1_ref[...], w2_ref, b2_ref, C_mid)

    pad2_ref[...] = jnp.zeros((Hp, Wp, C_mid), jnp.float32)
    pad2_ref[1:H + 1, 1:W + 1, :] = r.reshape(H, W, C_mid)

    h3 = conv3x3(pad2_ref[...], w3_ref, b3_ref, C_mid, residual=h1)

    # --- global average pool + algebraically folded (cls @ fc) classifier head ---
    pooled = jnp.mean(h3, axis=0, keepdims=True)        # (1, C_mid) f32
    logits = jnp.dot(pooled, hw_ref[...], preferred_element_type=jnp.float32)
    logits = logits + hb_ref[...]
    o_ref[...] = logits.reshape(1, 1, n_classes)


# ----------------------------------------------------------------------------
# Wrapper
# ----------------------------------------------------------------------------
def custom_resnet_forward(params, pixel_values_nchw):
    # NCHW (PyTorch) -> NHWC (channels on the 128-lane axis).
    x = jnp.transpose(pixel_values_nchw, (0, 2, 3, 1)).astype(jnp.float32)
    N, H, W, C_in = x.shape
    # Spatial zero-pad once (tiny XLA glue); taps are sliced in-kernel, so the 9x
    # im2col patch matrix is never materialized in HBM.
    xp = jnp.pad(x, ((0, 0), (1, 1), (1, 1), (0, 0)))

    # bf16 weights for the MXU (accumulation stays f32 inside the kernel).
    w1 = params["conv1_w"].astype(jnp.bfloat16)
    w2 = params["conv2_w"].astype(jnp.bfloat16)
    w3 = params["conv3_w"].astype(jnp.bfloat16)
    b1 = params["conv1_b"].reshape(1, STEM_CH)
    b2 = params["conv2_b"].reshape(1, STEM_CH)
    b3 = params["conv3_b"].reshape(1, STEM_CH)

    # Exact fold of base classifier (C_mid -> 1000) and CustomResNet.fc (1000 -> 10):
    # no nonlinearity between the two Linears, so
    #   (p @ cls_w + cls_b) @ fc_w + fc_b == p @ (cls_w @ fc_w) + (cls_b @ fc_w + fc_b)
    head_w = jnp.dot(params["cls_w"], params["fc_w"])                        # (C_mid, 10)
    head_b = (jnp.dot(params["cls_b"][None, :], params["fc_w"])
              + params["fc_b"][None, :])                                     # (1, 10)

    kernel = functools.partial(fused_resnet_kernel, H=H, W=W, C_in=C_in,
                               C_mid=STEM_CH, n_classes=NUM_CLASSES)

    out = pl.pallas_call(
        kernel,
        out_shape=jax.ShapeDtypeStruct((N, 1, NUM_CLASSES), jnp.float32),
        grid_spec=pltpu.PrefetchScalarGridSpec(
            num_scalar_prefetch=0,
            grid=(N,),                                   # one image per grid step
            in_specs=[
                pl.BlockSpec((1, H + 2, W + 2, C_in), lambda n: (n, 0, 0, 0)),
                pl.BlockSpec((9, C_in, STEM_CH), lambda n: (0, 0, 0)),
                pl.BlockSpec((1, STEM_CH), lambda n: (0, 0)),
                pl.BlockSpec((9, STEM_CH, STEM_CH), lambda n: (0, 0, 0)),
                pl.BlockSpec((1, STEM_CH), lambda n: (0, 0)),
                pl.BlockSpec((9, STEM_CH, STEM_CH), lambda n: (0, 0, 0)),
                pl.BlockSpec((1, STEM_CH), lambda n: (0, 0)),
                pl.BlockSpec((STEM_CH, NUM_CLASSES), lambda n: (0, 0)),
                pl.BlockSpec((1, NUM_CLASSES), lambda n: (0, 0)),
            ],
            out_specs=pl.BlockSpec((1, 1, NUM_CLASSES), lambda n: (n, 0, 0)),
            scratch_shapes=[
                pltpu.VMEM((H + 2, W + 2, STEM_CH), jnp.float32),
                pltpu.VMEM((H + 2, W + 2, STEM_CH), jnp.float32),
            ],
        ),
        compiler_params=pltpu.CompilerParams(
            dimension_semantics=("parallel",)),          # batch axis feeds v7x's 2 TCs
    )(xp, w1, b1, w2, b2, w3, b3, head_w, head_b)

    return out.reshape(N, NUM_CLASSES)


# ----------------------------------------------------------------------------
# Parameters (synthetic deterministic base_model + the real fc(1000, 10))
# ----------------------------------------------------------------------------
def init_params(key, in_channels):
    ks = jax.random.split(key, 5)

    def w(k, shape, fan_in):
        return jax.random.normal(k, shape, jnp.float32) / jnp.sqrt(float(fan_in))

    return {
        # conv weights are tap-major: (9, C_in, C_out) with tap t == (dh, dw) = divmod(t, 3)
        "conv1_w": w(ks[0], (9, in_channels, STEM_CH), 9 * in_channels),
        "conv1_b": jnp.zeros((STEM_CH,), jnp.float32),
        "conv2_w": w(ks[1], (9, STEM_CH, STEM_CH), 9 * STEM_CH),
        "conv2_b": jnp.zeros((STEM_CH,), jnp.float32),
        "conv3_w": w(ks[2], (9, STEM_CH, STEM_CH), 9 * STEM_CH),
        "conv3_b": jnp.zeros((STEM_CH,), jnp.float32),
        "cls_w": w(ks[3], (STEM_CH, NUM_BASE_CLASSES), STEM_CH),
        "cls_b": jnp.zeros((NUM_BASE_CLASSES,), jnp.float32),
        # CustomResNet.fc == nn.Linear(1000, 10), stored as [in, out].
        "fc_w": w(ks[4], (NUM_BASE_CLASSES, NUM_CLASSES), NUM_BASE_CLASSES),
        "fc_b": jnp.zeros((NUM_CLASSES,), jnp.float32),
    }


# ----------------------------------------------------------------------------
# Pure-JAX reference (f32 everywhere) for a numeric sanity check
# ----------------------------------------------------------------------------
def reference_forward(params, pixel_values_nchw):
    x = jnp.transpose(pixel_values_nchw, (0, 2, 3, 1)).astype(jnp.float32)
    N, H, W, _ = x.shape

    def conv(x_nhwc, w, b):
        xp = jnp.pad(x_nhwc, ((0, 0), (1, 1), (1, 1), (0, 0)))
        acc = jnp.zeros((N, H, W, w.shape[-1]), jnp.float32)
        for t in range(9):
            dh, dw = divmod(t, 3)
            acc = acc + jnp.einsum("nhwc,cd->nhwd",
                                   xp[:, dh:dh + H, dw:dw + W, :], w[t])
        return acc + b

    h = jax.nn.relu(conv(x, params["conv1_w"], params["conv1_b"]))
    r = jax.nn.relu(conv(h, params["conv2_w"], params["conv2_b"]))
    r = conv(r, params["conv3_w"], params["conv3_b"])
    h = jax.nn.relu(r + h)
    pooled = jnp.mean(h, axis=(1, 2))
    base_logits = pooled @ params["cls_w"] + params["cls_b"]
    return base_logits @ params["fc_w"] + params["fc_b"]


if __name__ == "__main__":
    key = jax.random.PRNGKey(0)
    k_param, k_x = jax.random.split(key)

    batch, channels, spatial = 2, 4, 16
    x = jax.random.normal(k_x, (batch, channels, spatial, spatial), jnp.float32)
    params = init_params(k_param, channels)

    logits = jax.jit(custom_resnet_forward)(params, x)
    logits = jax.block_until_ready(logits)

    assert logits.shape == (batch, NUM_CLASSES), logits.shape
    assert bool(jnp.all(jnp.isfinite(logits)))

    ref = reference_forward(params, x)
    assert bool(jnp.allclose(logits, ref, rtol=5e-2, atol=5e-2)), (logits, ref)

    print("KERNEL_OK")
</pallas_src>

<mosaic_0001>
module attributes {stable_mosaic.version = 11 : i64} {
  func.func @fused_resnet_kernel(%arg0: i32, %arg1: memref<1x18x18x4xf32, #tpu.memory_space<vmem>>, %arg2: memref<9x4x128xbf16, #tpu.memory_space<vmem>>, %arg3: memref<1x128xf32, #tpu.memory_space<vmem>>, %arg4: memref<9x128x128xbf16, #tpu.memory_space<vmem>>, %arg5: memref<1x128xf32, #tpu.memory_space<vmem>>, %arg6: memref<9x128x128xbf16, #tpu.memory_space<vmem>>, %arg7: memref<1x128xf32, #tpu.memory_space<vmem>>, %arg8: memref<128x10xf32, #tpu.memory_space<vmem>>, %arg9: memref<1x10xf32, #tpu.memory_space<vmem>>, %arg10: memref<1x1x10xf32, #tpu.memory_space<vmem>>, %arg11: memref<18x18x128xf32, #tpu.memory_space<vmem>>, %arg12: memref<18x18x128xf32, #tpu.memory_space<vmem>>) attributes {dimension_semantics = [#tpu.dimension_semantics<parallel>], iteration_bounds = array<i64: 2>, scalar_prefetch = 0 : i64, scratch_operands = 2 : i64, tpu.core_type = #tpu.core_type<tc>, window_params = [{transform_indices = @transform_0, window_bounds = array<i64: 1, 18, 18, 4>}, {pipeline_mode = #tpu.pipeline_mode<synchronous>, transform_indices = @transform_1, window_bounds = array<i64: 9, 4, 128>}, {pipeline_mode = #tpu.pipeline_mode<synchronous>, transform_indices = @transform_2, window_bounds = array<i64: 1, 128>}, {pipeline_mode = #tpu.pipeline_mode<synchronous>, transform_indices = @transform_3, window_bounds = array<i64: 9, 128, 128>}, {pipeline_mode = #tpu.pipeline_mode<synchronous>, transform_indices = @transform_4, window_bounds = array<i64: 1, 128>}, {pipeline_mode = #tpu.pipeline_mode<synchronous>, transform_indices = @transform_5, window_bounds = array<i64: 9, 128, 128>}, {pipeline_mode = #tpu.pipeline_mode<synchronous>, transform_indices = @transform_6, window_bounds = array<i64: 1, 128>}, {pipeline_mode = #tpu.pipeline_mode<synchronous>, transform_indices = @transform_7, window_bounds = array<i64: 128, 10>}, {pipeline_mode = #tpu.pipeline_mode<synchronous>, transform_indices = @transform_8, window_bounds = array<i64: 1, 10>}, {transform_indices = @transform_9, window_bounds = array<i64: 1, 1, 10>}]} {
    %c0 = arith.constant 0 : index
    %c0_0 = arith.constant 0 : index
    %c0_1 = arith.constant 0 : index
    %c0_2 = arith.constant 0 : index
    %0 = vector.load %arg1[%c0, %c0_0, %c0_1, %c0_2] : memref<1x18x18x4xf32, #tpu.memory_space<vmem>>, vector<1x18x18x4xf32>
    %1 = vector.shape_cast %0 : vector<1x18x18x4xf32> to vector<18x18x4xf32>
    %cst = arith.constant 0.000000e+00 : f32
    %2 = vector.broadcast %cst : f32 to vector<256x128xf32>
    %3 = vector.extract_strided_slice %1 {offsets = [0, 0, 0], sizes = [16, 16, 4], strides = [1, 1, 1]} : vector<18x18x4xf32> to vector<16x16x4xf32>
    %4 = vector.shape_cast %3 : vector<16x16x4xf32> to vector<256x4xf32>
    %5 = arith.truncf %4 : vector<256x4xf32> to vector<256x4xbf16>
    %c0_3 = arith.constant 0 : index
    %c0_4 = arith.constant 0 : index
    %c0_5 = arith.constant 0 : index
    %6 = vector.load %arg2[%c0_3, %c0_4, %c0_5] : memref<9x4x128xbf16, #tpu.memory_space<vmem>>, vector<1x4x128xbf16>
    %7 = vector.shape_cast %6 : vector<1x4x128xbf16> to vector<4x128xbf16>
    %cst_6 = arith.constant dense<0.000000e+00> : vector<256x128xf32>
    %8 = tpu.matmul %5, %7, %cst_6 {dimension_numbers = #tpu.dot_dimension_numbers<[1], [0], [0], [1], [0, 0, 1, 1], [], []>} : vector<256x4xbf16>, vector<4x128xbf16>, vector<256x128xf32> -> vector<256x128xf32>
    %9 = arith.addf %2, %8 : vector<256x128xf32>
    %10 = vector.extract_strided_slice %1 {offsets = [0, 1, 0], sizes = [16, 16, 4], strides = [1, 1, 1]} : vector<18x18x4xf32> to vector<16x16x4xf32>
    %11 = vector.shape_cast %10 : vector<16x16x4xf32> to vector<256x4xf32>
    %12 = arith.truncf %11 : vector<256x4xf32> to vector<256x4xbf16>
    %c1 = arith.constant 1 : index
    %c0_7 = arith.constant 0 : index
    %c0_8 = arith.constant 0 : index
    %13 = vector.load %arg2[%c1, %c0_7, %c0_8] : memref<9x4x128xbf16, #tpu.memory_space<vmem>>, vector<1x4x128xbf16>
    %14 = vector.shape_cast %13 : vector<1x4x128xbf16> to vector<4x128xbf16>
    %cst_9 = arith.constant dense<0.000000e+00> : vector<256x128xf32>
    %15 = tpu.matmul %12, %14, %cst_9 {dimension_numbers = #tpu.dot_dimension_numbers<[1], [0], [0], [1], [0, 0, 1, 1], [], []>} : vector<256x4xbf16>, vector<4x128xbf16>, vector<256x128xf32> -> vector<256x128xf32>
    %16 = arith.addf %9, %15 : vector<256x128xf32>
    %17 = vector.extract_strided_slice %1 {offsets = [0, 2, 0], sizes = [16, 16, 4], strides = [1, 1, 1]} : vector<18x18x4xf32> to vector<16x16x4xf32>
    %18 = vector.shape_cast %17 : vector<16x16x4xf32> to vector<256x4xf32>
    %19 = arith.truncf %18 : vector<256x4xf32> to vector<256x4xbf16>
    %c2 = arith.constant 2 : index
    %c0_10 = arith.constant 0 : index
    %c0_11 = arith.constant 0 : index
    %20 = vector.load %arg2[%c2, %c0_10, %c0_11] : memref<9x4x128xbf16, #tpu.memory_space<vmem>>, vector<1x4x128xbf16>
    %21 = vector.shape_cast %20 : vector<1x4x128xbf16> to vector<4x128xbf16>
    %cst_12 = arith.constant dense<0.000000e+00> : vector<256x128xf32>
    %22 = tpu.matmul %19, %21, %cst_12 {dimension_numbers = #tpu.dot_dimension_numbers<[1], [0], [0], [1], [0, 0, 1, 1], [], []>} : vector<256x4xbf16>, vector<4x128xbf16>, vector<256x128xf32> -> vector<256x128xf32>
    %23 = arith.addf %16, %22 : vector<256x128xf32>
    %24 = vector.extract_strided_slice %1 {offsets = [1, 0, 0], sizes = [16, 16, 4], strides = [1, 1, 1]} : vector<18x18x4xf32> to vector<16x16x4xf32>
    %25 = vector.shape_cast %24 : vector<16x16x4xf32> to vector<256x4xf32>
    %26 = arith.truncf %25 : vector<256x4xf32> to vector<256x4xbf16>
    %c3 = arith.constant 3 : index
    %c0_13 = arith.constant 0 : index
    %c0_14 = arith.constant 0 : index
    %27 = vector.load %arg2[%c3, %c0_13, %c0_14] : memref<9x4x128xbf16, #tpu.memory_space<vmem>>, vector<1x4x128xbf16>
    %28 = vector.shape_cast %27 : vector<1x4x128xbf16> to vector<4x128xbf16>
    %cst_15 = arith.constant dense<0.000000e+00> : vector<256x128xf32>
    %29 = tpu.matmul %26, %28, %cst_15 {dimension_numbers = #tpu.dot_dimension_numbers<[1], [0], [0], [1], [0, 0, 1, 1], [], []>} : vector<256x4xbf16>, vector<4x128xbf16>, vector<256x128xf32> -> vector<256x128xf32>
    %30 = arith.addf %23, %29 : vector<256x128xf32>
    %31 = vector.extract_strided_slice %1 {offsets = [1, 1, 0], sizes = [16, 16, 4], strides = [1, 1, 1]} : vector<18x18x4xf32> to vector<16x16x4xf32>
    %32 = vector.shape_cast %31 : vector<16x16x4xf32> to vector<256x4xf32>
    %33 = arith.truncf %32 : vector<256x4xf32> to vector<256x4xbf16>
    %c4 = arith.constant 4 : index
    %c0_16 = arith.constant 0 : index
    %c0_17 = arith.constant 0 : index
    %34 = vector.load %arg2[%c4, %c0_16, %c0_17] : memref<9x4x128xbf16, #tpu.memory_space<vmem>>, vector<1x4x128xbf16>
    %35 = vector.shape_cast %34 : vector<1x4x128xbf16> to vector<4x128xbf16>
    %cst_18 = arith.constant dense<0.000000e+00> : vector<256x128xf32>
    %36 = tpu.matmul %33, %35, %cst_18 {dimension_numbers = #tpu.dot_dimension_numbers<[1], [0], [0], [1], [0, 0, 1, 1], [], []>} : vector<256x4xbf16>, vector<4x128xbf16>, vector<256x128xf32> -> vector<256x128xf32>
    %37 = arith.addf %30, %36 : vector<256x128xf32>
    %38 = vector.extract_strided_slice %1 {offsets = [1, 2, 0], sizes = [16, 16, 4], strides = [1, 1, 1]} : vector<18x18x4xf32> to vector<16x16x4xf32>
    %39 = vector.shape_cast %38 : vector<16x16x4xf32> to vector<256x4xf32>
    %40 = arith.truncf %39 : vector<256x4xf32> to vector<256x4xbf16>
    %c5 = arith.constant 5 : index
    %c0_19 = arith.constant 0 : index
    %c0_20 = arith.constant 0 : index
    %41 = vector.load %arg2[%c5, %c0_19, %c0_20] : memref<9x4x128xbf16, #tpu.memory_space<vmem>>, vector<1x4x128xbf16>
    %42 = vector.shape_cast %41 : vector<1x4x128xbf16> to vector<4x128xbf16>
    %cst_21 = arith.constant dense<0.000000e+00> : vector<256x128xf32>
    %43 = tpu.matmul %40, %42, %cst_21 {dimension_numbers = #tpu.dot_dimension_numbers<[1], [0], [0], [1], [0, 0, 1, 1], [], []>} : vector<256x4xbf16>, vector<4x128xbf16>, vector<256x128xf32> -> vector<256x128xf32>
    %44 = arith.addf %37, %43 : vector<256x128xf32>
    %45 = vector.extract_strided_slice %1 {offsets = [2, 0, 0], sizes = [16, 16, 4], strides = [1, 1, 1]} : vector<18x18x4xf32> to vector<16x16x4xf32>
    %46 = vector.shape_cast %45 : vector<16x16x4xf32> to vector<256x4xf32>
    %47 = arith.truncf %46 : vector<256x4xf32> to vector<256x4xbf16>
    %c6 = arith.constant 6 : index
    %c0_22 = arith.constant 0 : index
    %c0_23 = arith.constant 0 : index
    %48 = vector.load %arg2[%c6, %c0_22, %c0_23] : memref<9x4x128xbf16, #tpu.memory_space<vmem>>, vector<1x4x128xbf16>
    %49 = vector.shape_cast %48 : vector<1x4x128xbf16> to vector<4x128xbf16>
    %cst_24 = arith.constant dense<0.000000e+00> : vector<256x128xf32>
    %50 = tpu.matmul %47, %49, %cst_24 {dimension_numbers = #tpu.dot_dimension_numbers<[1], [0], [0], [1], [0, 0, 1, 1], [], []>} : vector<256x4xbf16>, vector<4x128xbf16>, vector<256x128xf32> -> vector<256x128xf32>
    %51 = arith.addf %44, %50 : vector<256x128xf32>
    %52 = vector.extract_strided_slice %1 {offsets = [2, 1, 0], sizes = [16, 16, 4], strides = [1, 1, 1]} : vector<18x18x4xf32> to vector<16x16x4xf32>
    %53 = vector.shape_cast %52 : vector<16x16x4xf32> to vector<256x4xf32>
    %54 = arith.truncf %53 : vector<256x4xf32> to vector<256x4xbf16>
    %c7 = arith.constant 7 : index
    %c0_25 = arith.constant 0 : index
    %c0_26 = arith.constant 0 : index
    %55 = vector.load %arg2[%c7, %c0_25, %c0_26] : memref<9x4x128xbf16, #tpu.memory_space<vmem>>, vector<1x4x128xbf16>
    %56 = vector.shape_cast %55 : vector<1x4x128xbf16> to vector<4x128xbf16>
    %cst_27 = arith.constant dense<0.000000e+00> : vector<256x128xf32>
    %57 = tpu.matmul %54, %56, %cst_27 {dimension_numbers = #tpu.dot_dimension_numbers<[1], [0], [0], [1], [0, 0, 1, 1], [], []>} : vector<256x4xbf16>, vector<4x128xbf16>, vector<256x128xf32> -> vector<256x128xf32>
    %58 = arith.addf %51, %57 : vector<256x128xf32>
    %59 = vector.extract_strided_slice %1 {offsets = [2, 2, 0], sizes = [16, 16, 4], strides = [1, 1, 1]} : vector<18x18x4xf32> to vector<16x16x4xf32>
    %60 = vector.shape_cast %59 : vector<16x16x4xf32> to vector<256x4xf32>
    %61 = arith.truncf %60 : vector<256x4xf32> to vector<256x4xbf16>
    %c8 = arith.constant 8 : index
    %c0_28 = arith.constant 0 : index
    %c0_29 = arith.constant 0 : index
    %62 = vector.load %arg2[%c8, %c0_28, %c0_29] : memref<9x4x128xbf16, #tpu.memory_space<vmem>>, vector<1x4x128xbf16>
    %63 = vector.shape_cast %62 : vector<1x4x128xbf16> to vector<4x128xbf16>
    %cst_30 = arith.constant dense<0.000000e+00> : vector<256x128xf32>
    %64 = tpu.matmul %61, %63, %cst_30 {dimension_numbers = #tpu.dot_dimension_numbers<[1], [0], [0], [1], [0, 0, 1, 1], [], []>} : vector<256x4xbf16>, vector<4x128xbf16>, vector<256x128xf32> -> vector<256x128xf32>
    %65 = arith.addf %58, %64 : vector<256x128xf32>
    %c0_31 = arith.constant 0 : index
    %c0_32 = arith.constant 0 : index
    %66 = vector.load %arg3[%c0_31, %c0_32] : memref<1x128xf32, #tpu.memory_space<vmem>>, vector<1x128xf32>
    %67 = vector.broadcast %66 : vector<1x128xf32> to vector<256x128xf32>
    %68 = arith.addf %65, %67 : vector<256x128xf32>
    %cst_33 = arith.constant 0.000000e+00 : f32
    %69 = vector.broadcast %cst_33 : f32 to vector<256x128xf32>
    %70 = arith.maximumf %68, %69 : vector<256x128xf32>
    %cst_34 = arith.constant 0.000000e+00 : f32
    %71 = vector.broadcast %cst_34 : f32 to vector<18x18x128xf32>
    %c0_35 = arith.constant 0 : index
    %c0_36 = arith.constant 0 : index
    %c0_37 = arith.constant 0 : index
    %72 = vector.load %arg11[%c0_35, %c0_36, %c0_37] : memref<18x18x128xf32, #tpu.memory_space<vmem>>, vector<18x18x128xf32>
    tpu.vector_store %arg11[%c0_35, %c0_36, %c0_37], %71 {strides = array<i32>} : memref<18x18x128xf32, #tpu.memory_space<vmem>>, vector<18x18x128xf32>,
    %73 = vector.shape_cast %70 : vector<256x128xf32> to vector<16x16x128xf32>
    %c1_38 = arith.constant 1 : index
    %c1_39 = arith.constant 1 : index
    %c0_40 = arith.constant 0 : index
    %74 = vector.load %arg11[%c1_38, %c1_39, %c0_40] : memref<18x18x128xf32, #tpu.memory_space<vmem>>, vector<16x16x128xf32>
    tpu.vector_store %arg11[%c1_38, %c1_39, %c0_40], %73 {strides = array<i32>} : memref<18x18x128xf32, #tpu.memory_space<vmem>>, vector<16x16x128xf32>,
    %c0_41 = arith.constant 0 : index
    %c0_42 = arith.constant 0 : index
    %c0_43 = arith.constant 0 : index
    %75 = vector.load %arg11[%c0_41, %c0_42, %c0_43] : memref<18x18x128xf32, #tpu.memory_space<vmem>>, vector<18x18x128xf32>
    %cst_44 = arith.constant 0.000000e+00 : f32
    %76 = vector.broadcast %cst_44 : f32 to vector<256x128xf32>
    %77 = vector.extract_strided_slice %75 {offsets = [0, 0, 0], sizes = [16, 16, 128], strides = [1, 1, 1]} : vector<18x18x128xf32> to vector<16x16x128xf32>
    %78 = vector.shape_cast %77 : vector<16x16x128xf32> to vector<256x128xf32>
    %79 = arith.truncf %78 : vector<256x128xf32> to vector<256x128xbf16>
    %c0_45 = arith.constant 0 : index
    %c0_46 = arith.constant 0 : index
    %c0_47 = arith.constant 0 : index
    %80 = vector.load %arg4[%c0_45, %c0_46, %c0_47] : memref<9x128x128xbf16, #tpu.memory_space<vmem>>, vector<1x128x128xbf16>
    %81 = vector.shape_cast %80 : vector<1x128x128xbf16> to vector<128x128xbf16>
    %cst_48 = arith.constant dense<0.000000e+00> : vector<256x128xf32>
    %82 = tpu.matmul %79, %81, %cst_48 {dimension_numbers = #tpu.dot_dimension_numbers<[1], [0], [0], [1], [0, 0, 1, 1], [], []>} : vector<256x128xbf16>, vector<128x128xbf16>, vector<256x128xf32> -> vector<256x128xf32>
    %83 = arith.addf %76, %82 : vector<256x128xf32>
    %84 = vector.extract_strided_slice %75 {offsets = [0, 1, 0], sizes = [16, 16, 128], strides = [1, 1, 1]} : vector<18x18x128xf32> to vector<16x16x128xf32>
    %85 = vector.shape_cast %84 : vector<16x16x128xf32> to vector<256x128xf32>
    %86 = arith.truncf %85 : vector<256x128xf32> to vector<256x128xbf16>
    %c1_49 = arith.constant 1 : index
    %c0_50 = arith.constant 0 : index
    %c0_51 = arith.constant 0 : index
    %87 = vector.load %arg4[%c1_49, %c0_50, %c0_51] : memref<9x128x128xbf16, #tpu.memory_space<vmem>>, vector<1x128x128xbf16>
    %88 = vector.shape_cast %87 : vector<1x128x128xbf16> to vector<128x128xbf16>
    %cst_52 = arith.constant dense<0.000000e+00> : vector<256x128xf32>
    %89 = tpu.matmul %86, %88, %cst_52 {dimension_numbers = #tpu.dot_dimension_numbers<[1], [0], [0], [1], [0, 0, 1, 1], [], []>} : vector<256x128xbf16>, vector<128x128xbf16>, vector<256x128xf32> -> vector<256x128xf32>
    %90 = arith.addf %83, %89 : vector<256x128xf32>
    %91 = vector.extract_strided_slice %75 {offsets = [0, 2, 0], sizes = [16, 16, 128], strides = [1, 1, 1]} : vector<18x18x128xf32> to vector<16x16x128xf32>
    %92 = vector.shape_cast %91 : vector<16x16x128xf32> to vector<256x128xf32>
    %93 = arith.truncf %92 : vector<256x128xf32> to vector<256x128xbf16>
    %c2_53 = arith.constant 2 : index
    %c0_54 = arith.constant 0 : index
    %c0_55 = arith.constant 0 : index
    %94 = vector.load %arg4[%c2_53, %c0_54, %c0_55] : memref<9x128x128xbf16, #tpu.memory_space<vmem>>, vector<1x128x128xbf16>
    %95 = vector.shape_cast %94 : vector<1x128x128xbf16> to vector<128x128xbf16>
    %cst_56 = arith.constant dense<0.000000e+00> : vector<256x128xf32>
    %96 = tpu.matmul %93, %95, %cst_56 {dimension_numbers = #tpu.dot_dimension_numbers<[1], [0], [0], [1], [0, 0, 1, 1], [], []>} : vector<256x128xbf16>, vector<128x128xbf16>, vector<256x128xf32> -> vector<256x128xf32>
    %97 = arith.addf %90, %96 : vector<256x128xf32>
    %98 = vector.extract_strided_slice %75 {offsets = [1, 0, 0], sizes = [16, 16, 128], strides = [1, 1, 1]} : vector<18x18x128xf32> to vector<16x16x128xf32>
    %99 = vector.shape_cast %98 : vector<16x16x128xf32> to vector<256x128xf32>
    %100 = arith.truncf %99 : vector<256x128xf32> to vector<256x128xbf16>
    %c3_57 = arith.constant 3 : index
    %c0_58 = arith.constant 0 : index
    %c0_59 = arith.constant 0 : index
    %101 = vector.load %arg4[%c3_57, %c0_58, %c0_59] : memref<9x128x128xbf16, #tpu.memory_space<vmem>>, vector<1x128x128xbf16>
    %102 = vector.shape_cast %101 : vector<1x128x128xbf16> to vector<128x128xbf16>
    %cst_60 = arith.constant dense<0.000000e+00> : vector<256x128xf32>
    %103 = tpu.matmul %100, %102, %cst_60 {dimension_numbers = #tpu.dot_dimension_numbers<[1], [0], [0], [1], [0, 0, 1, 1], [], []>} : vector<256x128xbf16>, vector<128x128xbf16>, vector<256x128xf32> -> vector<256x128xf32>
    %104 = arith.addf %97, %103 : vector<256x128xf32>
    %105 = vector.extract_strided_slice %75 {offsets = [1, 1, 0], sizes = [16, 16, 128], strides = [1, 1, 1]} : vector<18x18x128xf32> to vector<16x16x128xf32>
    %106 = vector.shape_cast %105 : vector<16x16x128xf32> to vector<256x128xf32>
    %107 = arith.truncf %106 : vector<256x128xf32> to vector<256x128xbf16>
    %c4_61 = arith.constant 4 : index
    %c0_62 = arith.constant 0 : index
    %c0_63 = arith.constant 0 : index
    %108 = vector.load %arg4[%c4_61, %c0_62, %c0_63] : memref<9x128x128xbf16, #tpu.memory_space<vmem>>, vector<1x128x128xbf16>
    %109 = vector.shape_cast %108 : vector<1x128x128xbf16> to vector<128x128xbf16>
    %cst_64 = arith.constant dense<0.000000e+00> : vector<256x128xf32>
    %110 = tpu.matmul %107, %109, %cst_64 {dimension_numbers = #tpu.dot_dimension_numbers<[1], [0], [0], [1], [0, 0, 1, 1], [], []>} : vector<256x128xbf16>, vector<128x128xbf16>, vector<256x128xf32> -> vector<256x128xf32>
    %111 = arith.addf %104, %110 : vector<256x128xf32>
    %112 = vector.extract_strided_slice %75 {offsets = [1, 2, 0], sizes = [16, 16, 128], strides = [1, 1, 1]} : vector<18x18x128xf32> to vector<16x16x128xf32>
    %113 = vector.shape_cast %112 : vector<16x16x128xf32> to vector<256x128xf32>
    %114 = arith.truncf %113 : vector<256x128xf32> to vector<256x128xbf16>
    %c5_65 = arith.constant 5 : index
    %c0_66 = arith.constant 0 : index
    %c0_67 = arith.constant 0 : index
    %115 = vector.load %arg4[%c5_65, %c0_66, %c0_67] : memref<9x128x128xbf16, #tpu.memory_space<vmem>>, vector<1x128x128xbf16>
    %116 = vector.shape_cast %115 : vector<1x128x128xbf16> to vector<128x128xbf16>
    %cst_68 = arith.constant dense<0.000000e+00> : vector<256x128xf32>
    %117 = tpu.matmul %114, %116, %cst_68 {dimension_numbers = #tpu.dot_dimension_numbers<[1], [0], [0], [1], [0, 0, 1, 1], [], []>} : vector<256x128xbf16>, vector<128x128xbf16>, vector<256x128xf32> -> vector<256x128xf32>
    %118 = arith.addf %111, %117 : vector<256x128xf32>
    %119 = vector.extract_strided_slice %75 {offsets = [2, 0, 0], sizes = [16, 16, 128], strides = [1, 1, 1]} : vector<18x18x128xf32> to vector<16x16x128xf32>
    %120 = vector.shape_cast %119 : vector<16x16x128xf32> to vector<256x128xf32>
    %121 = arith.truncf %120 : vector<256x128xf32> to vector<256x128xbf16>
    %c6_69 = arith.constant 6 : index
    %c0_70 = arith.constant 0 : index
    %c0_71 = arith.constant 0 : index
    %122 = vector.load %arg4[%c6_69, %c0_70, %c0_71] : memref<9x128x128xbf16, #tpu.memory_space<vmem>>, vector<1x128x128xbf16>
    %123 = vector.shape_cast %122 : vector<1x128x128xbf16> to vector<128x128xbf16>
    %cst_72 = arith.constant dense<0.000000e+00> : vector<256x128xf32>
    %124 = tpu.matmul %121, %123, %cst_72 {dimension_numbers = #tpu.dot_dimension_numbers<[1], [0], [0], [1], [0, 0, 1, 1], [], []>} : vector<256x128xbf16>, vector<128x128xbf16>, vector<256x128xf32> -> vector<256x128xf32>
    %125 = arith.addf %118, %124 : vector<256x128xf32>
    %126 = vector.extract_strided_slice %75 {offsets = [2, 1, 0], sizes = [16, 16, 128], strides = [1, 1, 1]} : vector<18x18x128xf32> to vector<16x16x128xf32>
    %127 = vector.shape_cast %126 : vector<16x16x128xf32> to vector<256x128xf32>
    %128 = arith.truncf %127 : vector<256x128xf32> to vector<256x128xbf16>
    %c7_73 = arith.constant 7 : index
    %c0_74 = arith.constant 0 : index
    %c0_75 = arith.constant 0 : index
    %129 = vector.load %arg4[%c7_73, %c0_74, %c0_75] : memref<9x128x128xbf16, #tpu.memory_space<vmem>>, vector<1x128x128xbf16>
    %130 = vector.shape_cast %129 : vector<1x128x128xbf16> to vector<128x128xbf16>
    %cst_76 = arith.constant dense<0.000000e+00> : vector<256x128xf32>
    %131 = tpu.matmul %128, %130, %cst_76 {dimension_numbers = #tpu.dot_dimension_numbers<[1], [0], [0], [1], [0, 0, 1, 1], [], []>} : vector<256x128xbf16>, vector<128x128xbf16>, vector<256x128xf32> -> vector<256x128xf32>
    %132 = arith.addf %125, %131 : vector<256x128xf32>
    %133 = vector.extract_strided_slice %75 {offsets = [2, 2, 0], sizes = [16, 16, 128], strides = [1, 1, 1]} : vector<18x18x128xf32> to vector<16x16x128xf32>
    %134 = vector.shape_cast %133 : vector<16x16x128xf32> to vector<256x128xf32>
    %135 = arith.truncf %134 : vector<256x128xf32> to vector<256x128xbf16>
    %c8_77 = arith.constant 8 : index
    %c0_78 = arith.constant 0 : index
    %c0_79 = arith.constant 0 : index
    %136 = vector.load %arg4[%c8_77, %c0_78, %c0_79] : memref<9x128x128xbf16, #tpu.memory_space<vmem>>, vector<1x128x128xbf16>
    %137 = vector.shape_cast %136 : vector<1x128x128xbf16> to vector<128x128xbf16>
    %cst_80 = arith.constant dense<0.000000e+00> : vector<256x128xf32>
    %138 = tpu.matmul %135, %137, %cst_80 {dimension_numbers = #tpu.dot_dimension_numbers<[1], [0], [0], [1], [0, 0, 1, 1], [], []>} : vector<256x128xbf16>, vector<128x128xbf16>, vector<256x128xf32> -> vector<256x128xf32>
    %139 = arith.addf %132, %138 : vector<256x128xf32>
    %c0_81 = arith.constant 0 : index
    %c0_82 = arith.constant 0 : index
    %140 = vector.load %arg5[%c0_81, %c0_82] : memref<1x128xf32, #tpu.memory_space<vmem>>, vector<1x128xf32>
    %141 = vector.broadcast %140 : vector<1x128xf32> to vector<256x128xf32>
    %142 = arith.addf %139, %141 : vector<256x128xf32>
    %cst_83 = arith.constant 0.000000e+00 : f32
    %143 = vector.broadcast %cst_83 : f32 to vector<256x128xf32>
    %144 = arith.maximumf %142, %143 : vector<256x128xf32>
    %cst_84 = arith.constant 0.000000e+00 : f32
    %145 = vector.broadcast %cst_84 : f32 to vector<18x18x128xf32>
    %c0_85 = arith.constant 0 : index
    %c0_86 = arith.constant 0 : index
    %c0_87 = arith.constant 0 : index
    %146 = vector.load %arg12[%c0_85, %c0_86, %c0_87] : memref<18x18x128xf32, #tpu.memory_space<vmem>>, vector<18x18x128xf32>
    tpu.vector_store %arg12[%c0_85, %c0_86, %c0_87], %145 {strides = array<i32>} : memref<18x18x128xf32, #tpu.memory_space<vmem>>, vector<18x18x128xf32>,
    %147 = vector.shape_cast %144 : vector<256x128xf32> to vector<16x16x128xf32>
    %c1_88 = arith.constant 1 : index
    %c1_89 = arith.constant 1 : index
    %c0_90 = arith.constant 0 : index
    %148 = vector.load %arg12[%c1_88, %c1_89, %c0_90] : memref<18x18x128xf32, #tpu.memory_space<vmem>>, vector<16x16x128xf32>
    tpu.vector_store %arg12[%c1_88, %c1_89, %c0_90], %147 {strides = array<i32>} : memref<18x18x128xf32, #tpu.memory_space<vmem>>, vector<16x16x128xf32>,
    %c0_91 = arith.constant 0 : index
    %c0_92 = arith.constant 0 : index
    %c0_93 = arith.constant 0 : index
    %149 = vector.load %arg12[%c0_91, %c0_92, %c0_93] : memref<18x18x128xf32, #tpu.memory_space<vmem>>, vector<18x18x128xf32>
    %cst_94 = arith.constant 0.000000e+00 : f32
    %150 = vector.broadcast %cst_94 : f32 to vector<256x128xf32>
    %151 = vector.extract_strided_slice %149 {offsets = [0, 0, 0], sizes = [16, 16, 128], strides = [1, 1, 1]} : vector<18x18x128xf32> to vector<16x16x128xf32>
    %152 = vector.shape_cast %151 : vector<16x16x128xf32> to vector<256x128xf32>
    %153 = arith.truncf %152 : vector<256x128xf32> to vector<256x128xbf16>
    %c0_95 = arith.constant 0 : index
    %c0_96 = arith.constant 0 : index
    %c0_97 = arith.constant 0 : index
    %154 = vector.load %arg6[%c0_95, %c0_96, %c0_97] : memref<9x128x128xbf16, #tpu.memory_space<vmem>>, vector<1x128x128xbf16>
    %155 = vector.shape_cast %154 : vector<1x128x128xbf16> to vector<128x128xbf16>
    %cst_98 = arith.constant dense<0.000000e+00> : vector<256x128xf32>
    %156 = tpu.matmul %153, %155, %cst_98 {dimension_numbers = #tpu.dot_dimension_numbers<[1], [0], [0], [1], [0, 0, 1, 1], [], []>} : vector<256x128xbf16>, vector<128x128xbf16>, vector<256x128xf32> -> vector<256x128xf32>
    %157 = arith.addf %150, %156 : vector<256x128xf32>
    %158 = vector.extract_strided_slice %149 {offsets = [0, 1, 0], sizes = [16, 16, 128], strides = [1, 1, 1]} : vector<18x18x128xf32> to vector<16x16x128xf32>
    %159 = vector.shape_cast %158 : vector<16x16x128xf32> to vector<256x128xf32>
    %160 = arith.truncf %159 : vector<256x128xf32> to vector<256x128xbf16>
    %c1_99 = arith.constant 1 : index
    %c0_100 = arith.constant 0 : index
    %c0_101 = arith.constant 0 : index
    %161 = vector.load %arg6[%c1_99, %c0_100, %c0_101] : memref<9x128x128xbf16, #tpu.memory_space<vmem>>, vector<1x128x128xbf16>
    %162 = vector.shape_cast %161 : vector<1x128x128xbf16> to vector<128x128xbf16>
    %cst_102 = arith.constant dense<0.000000e+00> : vector<256x128xf32>
    %163 = tpu.matmul %160, %162, %cst_102 {dimension_numbers = #tpu.dot_dimension_numbers<[1], [0], [0], [1], [0, 0, 1, 1], [], []>} : vector<256x128xbf16>, vector<128x128xbf16>, vector<256x128xf32> -> vector<256x128xf32>
    %164 = arith.addf %157, %163 : vector<256x128xf32>
    %165 = vector.extract_strided_slice %149 {offsets = [0, 2, 0], sizes = [16, 16, 128], strides = [1, 1, 1]} : vector<18x18x128xf32> to vector<16x16x128xf32>
    %166 = vector.shape_cast %165 : vector<16x16x128xf32> to vector<256x128xf32>
    %167 = arith.truncf %166 : vector<256x128xf32> to vector<256x128xbf16>
    %c2_103 = arith.constant 2 : index
    %c0_104 = arith.constant 0 : index
    %c0_105 = arith.constant 0 : index
    %168 = vector.load %arg6[%c2_103, %c0_104, %c0_105] : memref<9x128x128xbf16, #tpu.memory_space<vmem>>, vector<1x128x128xbf16>
    %169 = vector.shape_cast %168 : vector<1x128x128xbf16> to vector<128x128xbf16>
    %cst_106 = arith.constant dense<0.000000e+00> : vector<256x128xf32>
    %170 = tpu.matmul %167, %169, %cst_106 {dimension_numbers = #tpu.dot_dimension_numbers<[1], [0], [0], [1], [0, 0, 1, 1], [], []>} : vector<256x128xbf16>, vector<128x128xbf16>, vector<256x128xf32> -> vector<256x128xf32>
    %171 = arith.addf %164, %170 : vector<256x128xf32>
    %172 = vector.extract_strided_slice %149 {offsets = [1, 0, 0], sizes = [16, 16, 128], strides = [1, 1, 1]} : vector<18x18x128xf32> to vector<16x16x128xf32>
    %173 = vector.shape_cast %172 : vector<16x16x128xf32> to vector<256x128xf32>
    %174 = arith.truncf %173 : vector<256x128xf32> to vector<256x128xbf16>
    %c3_107 = arith.constant 3 : index
    %c0_108 = arith.constant 0 : index
    %c0_109 = arith.constant 0 : index
    %175 = vector.load %arg6[%c3_107, %c0_108, %c0_109] : memref<9x128x128xbf16, #tpu.memory_space<vmem>>, vector<1x128x128xbf16>
    %176 = vector.shape_cast %175 : vector<1x128x128xbf16> to vector<128x128xbf16>
    %cst_110 = arith.constant dense<0.000000e+00> : vector<256x128xf32>
    %177 = tpu.matmul %174, %176, %cst_110 {dimension_numbers = #tpu.dot_dimension_numbers<[1], [0], [0], [1], [0, 0, 1, 1], [], []>} : vector<256x128xbf16>, vector<128x128xbf16>, vector<256x128xf32> -> vector<256x128xf32>
    %178 = arith.addf %171, %177 : vector<256x128xf32>
    %179 = vector.extract_strided_slice %149 {offsets = [1, 1, 0], sizes = [16, 16, 128], strides = [1, 1, 1]} : vector<18x18x128xf32> to vector<16x16x128xf32>
    %180 = vector.shape_cast %179 : vector<16x16x128xf32> to vector<256x128xf32>
    %181 = arith.truncf %180 : vector<256x128xf32> to vector<256x128xbf16>
    %c4_111 = arith.constant 4 : index
    %c0_112 = arith.constant 0 : index
    %c0_113 = arith.constant 0 : index
    %182 = vector.load %arg6[%c4_111, %c0_112, %c0_113] : memref<9x128x128xbf16, #tpu.memory_space<vmem>>, vector<1x128x128xbf16>
    %183 = vector.shape_cast %182 : vector<1x128x128xbf16> to vector<128x128xbf16>
    %cst_114 = arith.constant dense<0.000000e+00> : vector<256x128xf32>
    %184 = tpu.matmul %181, %183, %cst_114 {dimension_numbers = #tpu.dot_dimension_numbers<[1], [0], [0], [1], [0, 0, 1, 1], [], []>} : vector<256x128xbf16>, vector<128x128xbf16>, vector<256x128xf32> -> vector<256x128xf32>
    %185 = arith.addf %178, %184 : vector<256x128xf32>
    %186 = vector.extract_strided_slice %149 {offsets = [1, 2, 0], sizes = [16, 16, 128], strides = [1, 1, 1]} : vector<18x18x128xf32> to vector<16x16x128xf32>
    %187 = vector.shape_cast %186 : vector<16x16x128xf32> to vector<256x128xf32>
    %188 = arith.truncf %187 : vector<256x128xf32> to vector<256x128xbf16>
    %c5_115 = arith.constant 5 : index
    %c0_116 = arith.constant 0 : index
    %c0_117 = arith.constant 0 : index
    %189 = vector.load %arg6[%c5_115, %c0_116, %c0_117] : memref<9x128x128xbf16, #tpu.memory_space<vmem>>, vector<1x128x128xbf16>
    %190 = vector.shape_cast %189 : vector<1x128x128xbf16> to vector<128x128xbf16>
    %cst_118 = arith.constant dense<0.000000e+00> : vector<256x128xf32>
    %191 = tpu.matmul %188, %190, %cst_118 {dimension_numbers = #tpu.dot_dimension_numbers<[1], [0], [0], [1], [0, 0, 1, 1], [], []>} : vector<256x128xbf16>, vector<128x128xbf16>, vector<256x128xf32> -> vector<256x128xf32>
    %192 = arith.addf %185, %191 : vector<256x128xf32>
    %193 = vector.extract_strided_slice %149 {offsets = [2, 0, 0], sizes = [16, 16, 128], strides = [1, 1, 1]} : vector<18x18x128xf32> to vector<16x16x128xf32>
    %194 = vector.shape_cast %193 : vector<16x16x128xf32> to vector<256x128xf32>
    %195 = arith.truncf %194 : vector<256x128xf32> to vector<256x128xbf16>
    %c6_119 = arith.constant 6 : index
    %c0_120 = arith.constant 0 : index
    %c0_121 = arith.constant 0 : index
    %196 = vector.load %arg6[%c6_119, %c0_120, %c0_121] : memref<9x128x128xbf16, #tpu.memory_space<vmem>>, vector<1x128x128xbf16>
    %197 = vector.shape_cast %196 : vector<1x128x128xbf16> to vector<128x128xbf16>
    %cst_122 = arith.constant dense<0.000000e+00> : vector<256x128xf32>
    %198 = tpu.matmul %195, %197, %cst_122 {dimension_numbers = #tpu.dot_dimension_numbers<[1], [0], [0], [1], [0, 0, 1, 1], [], []>} : vector<256x128xbf16>, vector<128x128xbf16>, vector<256x128xf32> -> vector<256x128xf32>
    %199 = arith.addf %192, %198 : vector<256x128xf32>
    %200 = vector.extract_strided_slice %149 {offsets = [2, 1, 0], sizes = [16, 16, 128], strides = [1, 1, 1]} : vector<18x18x128xf32> to vector<16x16x128xf32>
    %201 = vector.shape_cast %200 : vector<16x16x128xf32> to vector<256x128xf32>
    %202 = arith.truncf %201 : vector<256x128xf32> to vector<256x128xbf16>
    %c7_123 = arith.constant 7 : index
    %c0_124 = arith.constant 0 : index
    %c0_125 = arith.constant 0 : index
    %203 = vector.load %arg6[%c7_123, %c0_124, %c0_125] : memref<9x128x128xbf16, #tpu.memory_space<vmem>>, vector<1x128x128xbf16>
    %204 = vector.shape_cast %203 : vector<1x128x128xbf16> to vector<128x128xbf16>
    %cst_126 = arith.constant dense<0.000000e+00> : vector<256x128xf32>
    %205 = tpu.matmul %202, %204, %cst_126 {dimension_numbers = #tpu.dot_dimension_numbers<[1], [0], [0], [1], [0, 0, 1, 1], [], []>} : vector<256x128xbf16>, vector<128x128xbf16>, vector<256x128xf32> -> vector<256x128xf32>
    %206 = arith.addf %199, %205 : vector<256x128xf32>
    %207 = vector.extract_strided_slice %149 {offsets = [2, 2, 0], sizes = [16, 16, 128], strides = [1, 1, 1]} : vector<18x18x128xf32> to vector<16x16x128xf32>
    %208 = vector.shape_cast %207 : vector<16x16x128xf32> to vector<256x128xf32>
    %209 = arith.truncf %208 : vector<256x128xf32> to vector<256x128xbf16>
    %c8_127 = arith.constant 8 : index
    %c0_128 = arith.constant 0 : index
    %c0_129 = arith.constant 0 : index
    %210 = vector.load %arg6[%c8_127, %c0_128, %c0_129] : memref<9x128x128xbf16, #tpu.memory_space<vmem>>, vector<1x128x128xbf16>
    %211 = vector.shape_cast %210 : vector<1x128x128xbf16> to vector<128x128xbf16>
    %cst_130 = arith.constant dense<0.000000e+00> : vector<256x128xf32>
    %212 = tpu.matmul %209, %211, %cst_130 {dimension_numbers = #tpu.dot_dimension_numbers<[1], [0], [0], [1], [0, 0, 1, 1], [], []>} : vector<256x128xbf16>, vector<128x128xbf16>, vector<256x128xf32> -> vector<256x128xf32>
    %213 = arith.addf %206, %212 : vector<256x128xf32>
    %c0_131 = arith.constant 0 : index
    %c0_132 = arith.constant 0 : index
    %214 = vector.load %arg7[%c0_131, %c0_132] : memref<1x128xf32, #tpu.memory_space<vmem>>, vector<1x128xf32>
    %215 = vector.broadcast %214 : vector<1x128xf32> to vector<256x128xf32>
    %216 = arith.addf %213, %215 : vector<256x128xf32>
    %217 = arith.addf %216, %70 : vector<256x128xf32>
    %cst_133 = arith.constant 0.000000e+00 : f32
    %218 = vector.broadcast %cst_133 : f32 to vector<256x128xf32>
    %219 = arith.maximumf %217, %218 : vector<256x128xf32>
    %cst_134 = arith.constant dense<0.000000e+00> : vector<128xf32>
    %220 = vector.multi_reduction <add>, %219, %cst_134 [0] : vector<256x128xf32> to vector<128xf32>
    %221 = vector.shape_cast %220 : vector<128xf32> to vector<1x128xf32>
    %cst_135 = arith.constant 2.560000e+02 : f32
    %222 = vector.broadcast %cst_135 : f32 to vector<1x128xf32>
    %223 = arith.divf %221, %222 : vector<1x128xf32>
    %c0_136 = arith.constant 0 : index
    %c0_137 = arith.constant 0 : index
    %224 = vector.load %arg8[%c0_136, %c0_137] : memref<128x10xf32, #tpu.memory_space<vmem>>, vector<128x10xf32>
    %cst_138 = arith.constant dense<0.000000e+00> : vector<1x10xf32>
    %225 = tpu.matmul %223, %224, %cst_138 {dimension_numbers = #tpu.dot_dimension_numbers<[1], [0], [0], [1], [0, 0, 1, 1], [], []>} : vector<1x128xf32>, vector<128x10xf32>, vector<1x10xf32> -> vector<1x10xf32>
    %c0_139 = arith.constant 0 : index
    %c0_140 = arith.constant 0 : index
    %226 = vector.load %arg9[%c0_139, %c0_140] : memref<1x10xf32, #tpu.memory_space<vmem>>, vector<1x10xf32>
    %227 = arith.addf %225, %226 : vector<1x10xf32>
    %228 = vector.shape_cast %227 : vector<1x10xf32> to vector<1x1x10xf32>
    %c0_141 = arith.constant 0 : index
    %c0_142 = arith.constant 0 : index
    %c0_143 = arith.constant 0 : index
    %229 = vector.load %arg10[%c0_141, %c0_142, %c0_143] : memref<1x1x10xf32, #tpu.memory_space<vmem>>, vector<1x1x10xf32>
    tpu.vector_store %arg10[%c0_141, %c0_142, %c0_143], %228 {strides = array<i32>} : memref<1x1x10xf32, #tpu.memory_space<vmem>>, vector<1x1x10xf32>,
    return
  }
  func.func @transform_0(%arg0: i32) -> (i32, i32, i32, i32) {
    %c0_i32 = arith.constant 0 : i32
    %c0_i32_0 = arith.constant 0 : i32
    %c0_i32_1 = arith.constant 0 : i32
    %c0_i32_2 = arith.constant 0 : i32
    return %arg0, %c0_i32, %c0_i32_0, %c0_i32_1 : i32, i32, i32, i32
  }
  func.func @transform_1(%arg0: i32) -> (i32, i32, i32) {
    %c0_i32 = arith.constant 0 : i32
    %c0_i32_0 = arith.constant 0 : i32
    %c0_i32_1 = arith.constant 0 : i32
    %c0_i32_2 = arith.constant 0 : i32
    return %c0_i32, %c0_i32_0, %c0_i32_1 : i32, i32, i32
  }
  func.func @transform_2(%arg0: i32) -> (i32, i32) {
    %c0_i32 = arith.constant 0 : i32
    %c0_i32_0 = arith.constant 0 : i32
    %c0_i32_1 = arith.constant 0 : i32
    return %c0_i32, %c0_i32_0 : i32, i32
  }
  func.func @transform_3(%arg0: i32) -> (i32, i32, i32) {
    %c0_i32 = arith.constant 0 : i32
    %c0_i32_0 = arith.constant 0 : i32
    %c0_i32_1 = arith.constant 0 : i32
    %c0_i32_2 = arith.constant 0 : i32
    return %c0_i32, %c0_i32_0, %c0_i32_1 : i32, i32, i32
  }
  func.func @transform_4(%arg0: i32) -> (i32, i32) {
    %c0_i32 = arith.constant 0 : i32
    %c0_i32_0 = arith.constant 0 : i32
    %c0_i32_1 = arith.constant 0 : i32
    return %c0_i32, %c0_i32_0 : i32, i32
  }
  func.func @transform_5(%arg0: i32) -> (i32, i32, i32) {
    %c0_i32 = arith.constant 0 : i32
    %c0_i32_0 = arith.constant 0 : i32
    %c0_i32_1 = arith.constant 0 : i32
    %c0_i32_2 = arith.constant 0 : i32
    return %c0_i32, %c0_i32_0, %c0_i32_1 : i32, i32, i32
  }
  func.func @transform_6(%arg0: i32) -> (i32, i32) {
    %c0_i32 = arith.constant 0 : i32
    %c0_i32_0 = arith.constant 0 : i32
    %c0_i32_1 = arith.constant 0 : i32
    return %c0_i32, %c0_i32_0 : i32, i32
  }
  func.func @transform_7(%arg0: i32) -> (i32, i32) {
    %c0_i32 = arith.constant 0 : i32
    %c0_i32_0 = arith.constant 0 : i32
    %c0_i32_1 = arith.constant 0 : i32
    return %c0_i32, %c0_i32_0 : i32, i32
  }
  func.func @transform_8(%arg0: i32) -> (i32, i32) {
    %c0_i32 = arith.constant 0 : i32
    %c0_i32_0 = arith.constant 0 : i32
    %c0_i32_1 = arith.constant 0 : i32
    return %c0_i32, %c0_i32_0 : i32, i32
  }
  func.func @transform_9(%arg0: i32) -> (i32, i32, i32) {
    %c0_i32 = arith.constant 0 : i32
    %c0_i32_0 = arith.constant 0 : i32
    %c0_i32_1 = arith.constant 0 : i32
    return %arg0, %c0_i32, %c0_i32_0 : i32, i32, i32
  }
}

</mosaic_0001>

<bundles_post_ra>
// kernel: custom_resnet_forward.1
= control target key start
LH: loop header
LB: loop body
LE: loop exit
PB: predicated region body
PF: predicated region fallthrough
CT: control target
= control target key end

     0   :  { %14 = vsyncpa [#allocation5], 0  ;;  %s14916_s0 = inlined_call_operand.vmem [shape: f32[2,18,18,4], index: 0, kind: input, shape index: {}]   ;;  %s14917_s1 = inlined_call_operand.vmem [shape: bf16[9,4,128], index: 1, kind: input, shape index: {}]   ;;  %s14918_s2 = inlined_call_operand.vmem [shape: f32[1,128], index: 2, kind: input, shape index: {}]   ;;  %s14919_s3 = inlined_call_operand.vmem [shape: bf16[9,128,128], index: 3, kind: input, shape index: {}]   ;;  %s14920_s4 = inlined_call_operand.vmem [shape: f32[1,128], index: 4, kind: input, shape index: {}]   ;;  %s14921_s5 = inlined_call_operand.vmem [shape: bf16[9,128,128], index: 5, kind: input, shape index: {}]   ;;  %s14922_s6 = inlined_call_operand.vmem [shape: f32[1,128], index: 6, kind: input, shape index: {}]   ;;  %s14923_s7 = inlined_call_operand.vmem [shape: f32[128,10], index: 7, kind: input, shape index: {}]   ;;  %s14924_s8 = inlined_call_operand.vmem [shape: f32[1,10], index: 8, kind: input, shape index: {}]   ;;  %s14925_s9 = inlined_call_operand.hbm [shape: f32[2,1,10], index: 9, kind: output, shape index: {}]  }
   0x1   :  { %16 = vsyncpa [#allocation5 + $0x1], 0  ;;  %s12099_s30 = smov 0   ;;  %s12101_s10 = smov 0  }
   0x2   :  { %s12103_s11 = smov 0   ;;  %s12105_s12 = smov 0  }
   0x3 LB: > { %s12120_s13 = sadd.s32 4294967295, %s12043_s12   ;;  %s8585_s14 = sadd.s32 4294967294, %s12043_s12   ;;  %s12043_s12 = sphi %s12105_s12, %s15110_s12   ;;  %s12039_s11 = sphi %s12103_s11, %s15109_s11   ;;  %s12035_s10 = sphi %s12101_s10, %s15108_s10   ;;  %s12031_s30 = sphi %s12099_s30, %s15107_s30  }
   0x4   : > { %s12124_s15 = sadd.s32 1, %s12043_s12   ;;  %s223_s16 = sadd.s32 1, %s12039_s11 }
   0x5   : > { %s220_s17 = ssub.s32 %s12043_s12, %s12124_s15  ;;  %p233_p0 = scmp.ne.s32.totalorder %s12039_s11, %s12035_s10 }
   0x6   : > { %p221_p1 = scmp.eq.s32.totalorder %s220_s17, 0  ;;  %p234_p2 = scmp.eq.s32.totalorder %s12120_s13, 1 }
   0x7   : > { %p239_p3 = scmp.ne.s32.totalorder %s12035_s10, %s12031_s30  ;;  %p240_p4 = scmp.eq.s32.totalorder %s8585_s14, 1 }
   0x8   : > { %s12135_s18 = scalar_select %p221_p1, %s12039_s11, %s223_s16  }
   0x9   : > { %p12137_p5 = por %p234_p2, %p233_p0  ;;  %p12141_p6 = por %p240_p4, %p239_p3 }
   0xa   : > { %p8588_p7 = scmp.ge.s32.totalorder %s12043_s12, 1  ;;  %p290_p8 = scmp.lt.s32.totalorder %s12043_s12, 3 }
   0xc   : > { %p291_p9 = pnand %p8588_p7, %p290_p8 }
   0xe   : > { %294 = sbr.rel (%p291_p9) target bundleno = 2315 (0x90b), region = 56 }
  0x15   : > { %vm630_vm0 = vcmask 1041408   ;;  %v8657_v0 = vld [vmem:[%s14917_s1 + $0x8] sm:$0x3]  ;;  %v8590_v1 = vld [vmem:[%s14917_s1 + $0x2] sm:$0x3]  ;;  %p325_p10 = scmp.lt.s32.totalorder %s12120_s13, 1 }
  0x16   : > { %11753 = vmatprep.subr.msk.bf16.mxu0 %vm630_vm0, %v8657_v0  ;;  %11749 = vmatprep.subr.msk.bf16.mxu1 %vm630_vm0, %v8590_v1  ;;  %v1601_v2 = vsel %vm630_vm0, %v8657_v0, 0  ;;  %v632_v3 = vsel %vm630_vm0, %v8590_v1, 0  ;;  %v8674_v4 = vld [vmem:[%s14917_s1 + $0xa] sm:$0x3]  ;;  %v401_v5 = vld [vmem:[%s14917_s1] sm:$0x3] }
  0x17   : > { %9887 = vmatpush3.bf16.msra.mxu0 %v1601_v2  ;;  %9751 = vmatpush3.bf16.msra.mxu1 %v632_v3  ;;  %s326_s27 = scalar_select %p325_p10, %s12120_s13, 1  ;;  %vm450_vm1 = vcmask 1046528   ;;  %vm581_vm2 = vcmask 31744   ;;  %v1810_v25 = vsel %vm630_vm0, %v8674_v4, 0  ;;  %v12234_v35 = vld [vmem:[%s14917_s1 + $0x4] sm:$0x3] }
  0x18   : > { %11754 = vmatprep.subr.msk.bf16.mxu0 %vm630_vm0, %v8674_v4  ;;  %11750 = vmatprep.subr.msk.bf16.mxu1 %vm630_vm0, %v401_v5  ;;  %15003 = vst [vmem:[#allocation15_spill] sm:$0xff] %v12234_v35  ;;  %v844_v41 = vsel %vm630_vm0, %v401_v5, 0  ;;  %v12276_v58 = vld [vmem:[%s14917_s1 + $0xc] sm:$0x3]  ;;  %vm1007_vm3 = vcmask 1045504   ;;  %vm12047_vm4 = vmmov 0  }
  0x19   : > { %s11759_s14 = smul.u32 432, %s326_s27  ;;  %15005 = vst [vmem:[#allocation17_spill] sm:$0xff] %v12276_v58  ;;  %s323_s22 = sand.u32 1, %s12035_s10   ;;  %vm8515_vm5 = vcmask 73728  }
  0x1a   : > { %s9145_s25 = sshll.u32 %s12120_s13, 4  ;;  %s324_s26 = scalar_lea.vmem [#allocation4], %s323_s22 }
  0x1b   : > { %s12170_s21 = scalar_lea.vmem %s14916_s0, %s11759_s14  ;;  %s8530_s27 = sshll.u32 %s324_s26, 4  ;;  %s14876_s27 = int_to_ptr.vmem [resolvable:$true] %s8530_s27 }
  0x1c   : > { %v12173_v6 = vld [vmem:[%s12170_s21] sm:$0xff]  ;;  %v12176_v7 = vld [vmem:[%s12170_s21 + $0x8] sm:$0xff]  ;;  %v12179_v8 = vld [vmem:[%s12170_s21 + $0x10] sm:$0x3]  ;;  %s14874_s14 = scalar_lea.hbm %s14925_s9, %s9145_s25  ;;  %s8518_s16 = scalar_lea.sflag [#allocation5], %s323_s22 }
  0x1d   : > { %14995 = vst [vmem:[#allocation7_spill] sm:$0xff] %v12173_v6  ;;  %14996 = vst [vmem:[#allocation8_spill] sm:$0xff] %v12176_v7  ;;  %v451_v9 = vrot.slane %v12173_v6, 1  ;;  %v452_v10 = vrot.slane %v12176_v7, 1  ;;  %v454_v11 = vrot.slane %v12179_v8, 1  ;;  %v12185_v12 = vld [vmem:[%s12170_s21 + $0x18] sm:$0xff] }
  0x1e   : > { %14997 = vst [vmem:[#allocation9_spill] sm:$0xff] %v12179_v8  ;;  %14998 = vst [vmem:[#allocation10_spill] sm:$0xff] %v12185_v12  ;;  %v12188_v13 = vld [vmem:[%s12170_s21 + $0x20] sm:$0xff]  ;;  %v12191_v14 = vld [vmem:[%s12170_s21 + $0x28] sm:$0x3]  ;;  %v456_v16 = vrot.slane %v12185_v12, 1 }
  0x1f   : > { %14999 = vst [vmem:[#allocation11_spill] sm:$0xff] %v12188_v13  ;;  %15000 = vst [vmem:[#allocation12_spill] sm:$0xff] %v12191_v14  ;;  %v12195_v15 = vpack.c.bf16 %v12188_v13, %v12185_v12  ;;  %v12199_v17 = vld [vmem:[%s12170_s21 + $0x30] sm:$0xff]  ;;  %v453_v18 = vsel %vm450_vm1, %v451_v9, %v452_v10  ;;  %v455_v19 = vsel %vm450_vm1, %v452_v10, %v454_v11  ;;  %v457_v20 = vrot.slane %v12188_v13, 1  ;;  %v12206_v22 = vld [vmem:[%s12170_s21 + $0x38] sm:$0xff]  ;;  %s11981_s17 = scalar_lea.vmem %s14876_s27, 16 }
  0x20   : > { %v459_v21 = vrot.slane %v12191_v14, 1  ;;  %v12209_v23 = vld [vmem:[%s12170_s21 + $0x40] sm:$0x3]  ;;  %v563_v24 = vpack.c.bf16 %v455_v19, %v453_v18  ;;  %v12213_v26 = vld [vmem:[%s12170_s21 + $0x48] sm:$0xff]  ;;  %v12216_v27 = vld [vmem:[%s12170_s21 + $0x50] sm:$0xff]  ;;  %v461_v30 = vrot.slane %v12199_v17, 1  ;;  %p11982_p11 = scmp.ne.s32.totalorder %s14876_s27, %s11981_s17 }
  0x21   : > { %15001 = vst [vmem:[#allocation13_spill] sm:$0xff] %v12195_v15  ;;  %v458_v28 = vsel %vm450_vm1, %v456_v16, %v457_v20  ;;  %v462_v31 = vrot.slane %v12206_v22, 1  ;;  %v12223_v32 = vld [vmem:[%s12170_s21 + $0x58] sm:$0x3]  ;;  %v12226_v33 = vld [vmem:[%s12170_s21 + $0x60] sm:$0xff]  ;;  %v12229_v34 = vld [vmem:[%s12170_s21 + $0x68] sm:$0xff] }
  0x22   : > { %v460_v29 = vsel %vm450_vm1, %v457_v20, %v459_v21  ;;  %15002 = vst [vmem:[#allocation14_spill] sm:$0xff] %v12223_v32  ;;  %9752 = vmatprep.mubr.msk.bf16.mxu1 %vm581_vm2, %v563_v24  ;;  %v464_v38 = vrot.slane %v12209_v23, 1  ;;  %v12240_v39 = vld [vmem:[%s12170_s21 + $0x70] sm:$0x3]  ;;  %v12243_v40 = vld [vmem:[%s12170_s21 + $0x78] sm:$0xff]  ;;  %v466_v44 = vrot.slane %v12213_v26, 1  ;;  %p11983_p12 = pnand %p11982_p11, %p12137_p5 }
  0x23   : > { %v564_v37 = vpack.c.bf16 %v460_v29, %v458_v28  ;;  %v463_v43 = vsel %vm450_vm1, %v461_v30, %v462_v31  ;;  %v467_v45 = vrot.slane %v12216_v27, 1  ;;  %v12251_v46 = vld [vmem:[%s12170_s21 + $0x80] sm:$0xff]  ;;  %v12254_v47 = vld [vmem:[%s12170_s21 + $0x88] sm:$0x3]  ;;  %v469_v49 = vrot.slane %v12223_v32, 1  ;;  %v12268_v56 = vld [vmem:[%s12170_s21 + $0x90] sm:$0xff] }
  0x24   : > { %v465_v48 = vsel %vm450_vm1, %v462_v31, %v464_v38  ;;  %v471_v50 = vrot.slane %v12226_v33, 1  ;;  %v472_v51 = vrot.slane %v12229_v34, 1  ;;  %v474_v54 = vrot.slane %v12240_v39, 1  ;;  %v12271_v57 = vld [vmem:[%s12170_s21 + $0x98] sm:$0xff]  ;;  %v12283_v63 = vld [vmem:[%s12170_s21 + $0xa0] sm:$0x3]  ;;  %p11984_p13 = pneg %p11983_p12 }
  0x25   : > { %9888 = vmatprep.mubr.msk.bf16.mxu0 %vm581_vm2, %v564_v37  ;;  %9753 = vmatmul.mubr.msk.bf16.vlgmr.msra.gmra.mrb[0].mxu1 %vm581_vm2, %v564_v37  ;;  %v12262_v52 = vpack.c.bf16 %v465_v48, %v463_v43  ;;  %v468_v53 = vsel %vm450_vm1, %v466_v44, %v467_v45  ;;  %v476_v55 = vrot.slane %v12243_v40, 1  ;;  %v470_v60 = vsel %vm450_vm1, %v467_v45, %v469_v49  ;;  %v12296_v3 = vld [vmem:[%s12170_s21 + $0xa8] sm:$0xff]  ;;  %v12299_v4 = vld [vmem:[%s12170_s21 + $0xb0] sm:$0xff]  ;;  %v12302_v5 = vld [vmem:[%s12170_s21 + $0xb8] sm:$0x3]  ;;  %s12048_s13 = smov [#allocation4]  }
  0x26   : > { %9785 = vmatpush3.bf16.msra.mxu1 %v844_v41  ;;  %v477_v61 = vrot.slane %v12251_v46, 1  ;;  %v479_v62 = vrot.slane %v12254_v47, 1  ;;  %v12293_v2 = vpack.c.bf16 %v470_v60, %v468_v53  ;;  %v473_v9 = vsel %vm450_vm1, %v471_v50, %v472_v51  ;;  %v12309_v18 = vld [vmem:[%s12170_s21 + $0xc0] sm:$0xff]  ;;  %v12312_v19 = vld [vmem:[%s12170_s21 + $0xc8] sm:$0xff]  ;;  %v12321_v28 = vld [vmem:[%s12170_s21 + $0xd0] sm:$0x3] }
  0x27   : > { %15004 = vst [vmem:[#allocation16_spill] sm:$0xff] %v12262_v52  ;;  %11751 = vmatprep.subr.msk.bf16.mxu1 %vm630_vm0, %v12234_v35  ;;  %9889 = vmatmul.mubr.msk.bf16.vlgmr.msra.gmra.mrb[0].mxu0 %vm581_vm2, %v12262_v52  ;;  %v475_v10 = vsel %vm450_vm1, %v472_v51, %v474_v54  ;;  %v481_v11 = vrot.slane %v12268_v56, 1  ;;  %v482_v16 = vrot.slane %v12271_v57, 1  ;;  %v12324_v29 = vld [vmem:[%s12170_s21 + $0xd8] sm:$0xff]  ;;  %v12327_v30 = vld [vmem:[%s12170_s21 + $0xe0] sm:$0xff]  ;;  %v486_v31 = vrot.slane %v12296_v3, 1 }
  0x28   : > { %9756 = vmatprep.mubr.msk.bf16.mxu1 %vm581_vm2, %v12262_v52  ;;  %15006 = vst [vmem:[#allocation18_spill] sm:$0xff] %v12293_v2  ;;  %9921 = vmatpush3.bf16.msra.mxu0 %v1810_v25  ;;  %v478_v21 = vsel %vm450_vm1, %v476_v55, %v477_v61  ;;  %v480_v24 = vsel %vm450_vm1, %v477_v61, %v479_v62  ;;  %v484_v25 = vrot.slane %v12283_v63, 1  ;;  %v487_v37 = vrot.slane %v12299_v4, 1  ;;  %v12335_v41 = vld [vmem:[%s12170_s21 + $0xe8] sm:$0x3]  ;;  %v12338_v43 = vld [vmem:[%s12170_s21 + $0xf0] sm:$0xff] }
  0x29   : > { %9892 = vmatprep.mubr.msk.bf16.mxu0 %vm581_vm2, %v12293_v2  ;;  %11755 = vmatprep.subr.msk.bf16.mxu0 %vm630_vm0, %v12276_v58  ;;  %v489_v38 = vrot.slane %v12302_v5, 1  ;;  %v12342_v48 = vpack.c.bf16 %v475_v10, %v473_v9  ;;  %v12345_v49 = vld [vmem:[%s12170_s21 + $0xf8] sm:$0xff]  ;;  %v12348_v50 = vld [vmem:[%s12170_s21 + $0x100] sm:$0x3]  ;;  %v12351_v51 = vld [vmem:[%s12170_s21 + $0x108] sm:$0xff]  ;;  %v12356_v54 = vpack.c.bf16 %v480_v24, %v478_v21  ;;  %v483_v55 = vsel %vm450_vm1, %v481_v11, %v482_v16 }
  0x2a   : > { %v491_v60 = vrot.slane %v12309_v18, 1  ;;  %v12361_v61 = vld [vmem:[%s12170_s21 + $0x110] sm:$0xff]  ;;  %v12364_v62 = vld [vmem:[%s12170_s21 + $0x118] sm:$0x3]  ;;  %v12367_v9 = vld [vmem:[%s12170_s21 + $0x120] sm:$0xff]  ;;  %v485_v10 = vsel %vm450_vm1, %v482_v16, %v484_v25  ;;  %v492_v21 = vrot.slane %v12312_v19, 1  ;;  %v488_v1 = vsel %vm450_vm1, %v486_v31, %v487_v37 }
  0x2b   : > { %15007 = vst [vmem:[#allocation19_spill] sm:$0xff] %v12342_v48  ;;  %15008 = vst [vmem:[#allocation20_spill] sm:$0xff] %v12356_v54  ;;  %v494_v11 = vrot.slane %v12321_v28, 1  ;;  %v496_v24 = vrot.slane %v12324_v29, 1  ;;  %v12376_v20 = vld [vmem:[%s12170_s21 + $0x128] sm:$0xff]  ;;  %v490_v59 = vsel %vm450_vm1, %v487_v37, %v489_v38  ;;  %v497_v36 = vrot.slane %v12327_v30, 1 }
  0x2c   : > { %15009 = vst [vmem:[#allocation21_spill] sm:$0xff] %v12376_v20  ;;  %v12379_v0 = vld [vmem:[%s12170_s21 + $0x130] sm:$0x3]  ;;  %v499_v42 = vrot.slane %v12335_v41, 1  ;;  %v12386_v16 = vld [vmem:[%s12170_s21 + $0x138] sm:$0xff]  ;;  %v12389_v25 = vld [vmem:[%s12170_s21 + $0x140] sm:$0xff]  ;;  %v12417_v12 = vpack.c.bf16 %v485_v10, %v483_v55  ;;  %v12421_v6 = vpack.c.bf16 %v490_v59, %v488_v1  ;;  %v493_v7 = vsel %vm450_vm1, %v491_v60, %v492_v21 }
  0x2d   : > { %9757 = vmatmul.mubr.msk.bf16.gmra.mrb[4].mxu1 %vm581_vm2, %v12293_v2  ;;  %15010 = vst [vmem:[#allocation22_spill] sm:$0xff] %v12379_v0  ;;  %15011 = vst [vmem:[#allocation23_spill] sm:$0xff] %v12386_v16  ;;  %v12392_v53 = vld [vmem:[%s12170_s21 + $0x148] sm:$0x3]  ;;  %v501_v31 = vrot.slane %v12338_v43, 1  ;;  %v502_v37 = vrot.slane %v12345_v49, 1 }
  0x2e   : > { %9760 = vmatprep.mubr.msk.bf16.mxu1 %vm581_vm2, %v12342_v48  ;;  %15012 = vst [vmem:[#allocation24_spill] sm:$0xff] %v12392_v53  ;;  %v504_v38 = vrot.slane %v12348_v50, 1  ;;  %v506_v44 = vrot.slane %v12351_v51, 1  ;;  %v507_v45 = vrot.slane %v12361_v61, 1  ;;  %v509_v2 = vrot.slane %v12364_v62, 1  ;;  %v12407_v15 = vld [vmem:[%s12170_s21 + $0x150] sm:$0xff] }
  0x2f   : > { %9893 = vmatmul.mubr.msk.bf16.gmra.mrb[4].mxu0 %vm581_vm2, %v12342_v48  ;;  %v511_v52 = vrot.slane %v12367_v9, 1  ;;  %v512_v48 = vrot.slane %v12376_v20, 1  ;;  %v514_v35 = vrot.slane %v12379_v0, 1  ;;  %v516_v58 = vrot.slane %v12386_v16, 1  ;;  %v12412_v32 = vld [vmem:[%s12170_s21 + $0x158] sm:$0xff]  ;;  %15014 = vst [vmem:[#allocation26_spill] sm:$0xff] %v12417_v12 }
  0x30   : > { %9896 = vmatprep.mubr.msk.bf16.mxu0 %vm581_vm2, %v12356_v54  ;;  %v12415_v14 = vld [vmem:[%s12170_s21 + $0x160] sm:$0x3]  ;;  %v517_v13 = vrot.slane %v12389_v25, 1  ;;  %v519_v8 = vrot.slane %v12392_v53, 1  ;;  %v495_v0 = vsel %vm450_vm1, %v492_v21, %v494_v11  ;;  %v498_v16 = vsel %vm450_vm1, %v496_v24, %v497_v36  ;;  %v12427_v20 = vld [vmem:[%s12170_s21 + $0x168] sm:$0xff]  ;;  %v12436_v60 = vld [vmem:[%s12170_s21 + $0x170] sm:$0xff] }
  0x31   : > { %15013 = vst [vmem:[#allocation25_spill] sm:$0xff] %v12415_v14  ;;  %15015 = vst [vmem:[#allocation27_spill] sm:$0xff] %v12427_v20  ;;  %v500_v55 = vsel %vm450_vm1, %v497_v36, %v499_v42  ;;  %v503_v10 = vsel %vm450_vm1, %v501_v31, %v502_v37  ;;  %v505_v59 = vsel %vm450_vm1, %v502_v37, %v504_v38  ;;  %v521_v36 = vrot.slane %v12407_v15, 1  ;;  %v12445_v42 = vld [vmem:[%s12170_s21 + $0x178] sm:$0x3]  ;;  %v12455_v53 = vld [vmem:[%s12170_s21 + $0x188] sm:$0xff] }
  0x32   : > { %v508_v1 = vsel %vm450_vm1, %v506_v44, %v507_v45  ;;  %15016 = vst [vmem:[#allocation28_spill] sm:$0xff] %v12436_v60  ;;  %v510_v21 = vsel %vm450_vm1, %v507_v45, %v509_v2  ;;  %v513_v11 = vsel %vm450_vm1, %v511_v52, %v512_v48  ;;  %v515_v24 = vsel %vm450_vm1, %v512_v48, %v514_v35 }
  0x33   : > { %v518_v31 = vsel %vm450_vm1, %v516_v58, %v517_v13  ;;  %v520_v37 = vsel %vm450_vm1, %v517_v13, %v519_v8  ;;  %v522_v44 = vrot.slane %v12412_v32, 1  ;;  %v524_v38 = vrot.slane %v12415_v14, 1 }
  0x34   : > { %v526_v35 = vrot.slane %v12427_v20, 1  ;;  %v527_v52 = vrot.slane %v12436_v60, 1  ;;  %v12463_v58 = vpack.c.bf16 %v495_v0, %v493_v7  ;;  %v12465_v8 = vpack.c.bf16 %v500_v55, %v498_v16 }
  0x35   : > { %9761 = vmatmul.mubr.msk.bf16.gmra.mrb[8].mxu1 %vm581_vm2, %v12356_v54  ;;  %v12452_v54 = vld [vmem:[%s12170_s21 + $0x180] sm:$0xff]  ;;  %v12467_v13 = vpack.c.bf16 %v505_v59, %v503_v10  ;;  %v12469_v2 = vpack.c.bf16 %v510_v21, %v508_v1  ;;  %v12471_v45 = vpack.c.bf16 %v515_v24, %v513_v11  ;;  %v12473_v48 = vpack.c.bf16 %v520_v37, %v518_v31 }
  0x36   : > { %9764 = vmatprep.mubr.msk.bf16.mxu1 %vm581_vm2, %v12417_v12  ;;  %v15018_v20 = vrot.slane %v12199_v17, 2  ;;  %v12481_v14 = vsel %vm450_vm1, %v521_v36, %v522_v44  ;;  %v529_v7 = vrot.slane %v12445_v42, 1  ;;  %v15019_v0 = vrot.slane %v12209_v23, 2 }
  0x37   : > { %9897 = vmatmul.mubr.msk.bf16.gmra.mrb[8].mxu0 %vm581_vm2, %v12417_v12  ;;  %v15017_v12 = vrot.slane %v12206_v22, 2  ;;  %v12491_v10 = vpack.c.bf16 %v12206_v22, %v12199_v17  ;;  %v1587_v59 = vrot.slane %v12452_v54, 1  ;;  %v1588_v1 = vrot.slane %v12455_v53, 1 }
  0x38   : > { %9900 = vmatprep.mubr.msk.bf16.mxu0 %vm581_vm2, %v12421_v6  ;;  %v1028_v23 = vrot.slane %v12226_v33, 2  ;;  %v1029_v21 = vrot.slane %v12229_v34, 2  ;;  %v1031_v17 = vrot.slane %v12240_v39, 2  ;;  %v12508_v22 = vpack.c.bf16 %v12229_v34, %v12226_v33 }
  0x39   : > { %v1020_v60 = vsel %vm1007_vm3, %v15018_v20, %v15017_v12  ;;  %v15020_v16 = vmov %v15017_v12  ;;  %v12499_v20 = vpack.c.bf16 %v12216_v27, %v12213_v26  ;;  %v12516_v11 = vsel %vm450_vm1, %v526_v35, %v527_v52 }
  0x3a   : > { %v1022_v55 = vsel %vm1007_vm3, %v15020_v16, %v15019_v0  ;;  %v1033_v24 = vrot.slane %v12243_v40, 2  ;;  %v1034_v36 = vrot.slane %v12251_v46, 2  ;;  %v12521_v31 = vsel %vm450_vm1, %v527_v52, %v529_v7 }
  0x3b   : > { %v12495_v12 = vpack.c.bf16 %v1022_v55, %v1020_v60  ;;  %v12513_v60 = vsel %vm450_vm1, %v522_v44, %v524_v38  ;;  %v1030_v39 = vsel %vm1007_vm3, %v1028_v23, %v1029_v21  ;;  %v1032_v33 = vsel %vm1007_vm3, %v1029_v21, %v1031_v17 }
  0x3c   : > { %v1036_v34 = vrot.slane %v12254_v47, 2  ;;  %v12528_v37 = vpack.c.bf16 %v1032_v33, %v1030_v39  ;;  %v1035_v44 = vsel %vm1007_vm3, %v1033_v24, %v1034_v36  ;;  %v12533_v38 = vpack.c.bf16 %v12251_v46, %v12243_v40 }
  0x3d   : > { %9765 = vmatmul.mubr.msk.bf16.gmra.mrb[12].mxu1 %vm581_vm2, %v12421_v6  ;;  %v1038_v35 = vrot.slane %v12268_v56, 2  ;;  %v1039_v47 = vrot.slane %v12271_v57, 2  ;;  %v1041_v7 = vrot.slane %v12283_v63, 2  ;;  %v12543_v0 = vpack.c.bf16 %v12271_v57, %v12268_v56 }
  0x3e   : > { %9768 = vmatprep.mubr.msk.bf16.mxu1 %vm581_vm2, %v12463_v58  ;;  %v1037_v52 = vsel %vm1007_vm3, %v1034_v36, %v1036_v34  ;;  %v1043_v40 = vrot.slane %v12296_v3, 2  ;;  %v1044_v46 = vrot.slane %v12299_v4, 2  ;;  %v1046_v55 = vrot.slane %v12302_v5, 2 }
  0x3f   : > { %9901 = vmatmul.mubr.msk.bf16.gmra.mrb[12].mxu0 %vm581_vm2, %v12463_v58  ;;  %v12545_v16 = vpack.c.bf16 %v1037_v52, %v1035_v44  ;;  %v1040_v23 = vsel %vm1007_vm3, %v1038_v35, %v1039_v47  ;;  %v1042_v21 = vsel %vm1007_vm3, %v1039_v47, %v1041_v7  ;;  %v12554_v17 = vpack.c.bf16 %v12299_v4, %v12296_v3 }
  0x40   : > { %9904 = vmatprep.mubr.msk.bf16.mxu0 %vm581_vm2, %v12465_v8  ;;  %v1048_v63 = vrot.slane %v12309_v18, 2  ;;  %v12557_v56 = vpack.c.bf16 %v1042_v21, %v1040_v23  ;;  %v1045_v57 = vsel %vm1007_vm3, %v1043_v40, %v1044_v46  ;;  %v1047_v24 = vsel %vm1007_vm3, %v1044_v46, %v1046_v55 }
  0x41   : > { %v1049_v36 = vrot.slane %v12312_v19, 2  ;;  %v12564_v5 = vpack.c.bf16 %v1047_v24, %v1045_v57  ;;  %v1051_v39 = vrot.slane %v12321_v28, 2  ;;  %v12569_v3 = vpack.c.bf16 %v12312_v19, %v12309_v18  ;;  %v15022_v24 = vld [vmem:[#allocation22_spill] sm:$0xff] }
  0x42   : > { %v1053_v4 = vrot.slane %v12324_v29, 2  ;;  %v1054_v34 = vrot.slane %v12327_v30, 2  ;;  %v1056_v44 = vrot.slane %v12335_v41, 2  ;;  %v12579_v35 = vpack.c.bf16 %v12327_v30, %v12324_v29 }
  0x43   : > { %v1050_v33 = vsel %vm1007_vm3, %v1048_v63, %v1049_v36  ;;  %v1052_v28 = vsel %vm1007_vm3, %v1049_v36, %v1051_v39  ;;  %v1058_v18 = vrot.slane %v12338_v43, 2  ;;  %v1059_v19 = vrot.slane %v12345_v49, 2  ;;  %v15021_v63 = vld [vmem:[#allocation21_spill] sm:$0xff] }
  0x44   : > { %v1061_v52 = vrot.slane %v12348_v50, 2  ;;  %v12587_v47 = vpack.c.bf16 %v1052_v28, %v1050_v33  ;;  %v1055_v7 = vsel %vm1007_vm3, %v1053_v4, %v1054_v34  ;;  %v1057_v41 = vsel %vm1007_vm3, %v1054_v34, %v1056_v44 }
  0x45   : > { %9769 = vmatmul.mubr.msk.bf16.gmra.mrb[16].mxu1 %vm581_vm2, %v12465_v8  ;;  %v12593_v29 = vpack.c.bf16 %v12345_v49, %v12338_v43  ;;  %v12597_v30 = vpack.c.bf16 %v1057_v41, %v1055_v7  ;;  %v1060_v50 = vsel %vm1007_vm3, %v1058_v18, %v1059_v19  ;;  %v1063_v46 = vrot.slane %v12351_v51, 2  ;;  %v15024_v18 = vld [vmem:[#allocation24_spill] sm:$0xff] }
  0x46   : > { %9772 = vmatprep.mubr.msk.bf16.mxu1 %vm581_vm2, %v12467_v13  ;;  %v1062_v40 = vsel %vm1007_vm3, %v1059_v19, %v1061_v52  ;;  %v1064_v23 = vrot.slane %v12361_v61, 2  ;;  %v1066_v21 = vrot.slane %v12364_v62, 2  ;;  %v12608_v43 = vpack.c.bf16 %v12361_v61, %v12351_v51  ;;  %v15023_v62 = vld [vmem:[#allocation23_spill] sm:$0xff] }
  0x47   : > { %9905 = vmatmul.mubr.msk.bf16.gmra.mrb[16].mxu0 %vm581_vm2, %v12467_v13  ;;  %v12602_v55 = vpack.c.bf16 %v1062_v40, %v1060_v50  ;;  %v1068_v49 = vrot.slane %v12367_v9, 2  ;;  %v1069_v57 = vrot.slane %v15021_v63, 2  ;;  %v1071_v36 = vrot.slane %v15022_v24, 2  ;;  %v381_v50 = vld [vmem:[%s12170_s21 + $0x190] sm:$0x3] }
  0x48   : > { %9908 = vmatprep.mubr.msk.bf16.mxu0 %vm581_vm2, %v12469_v2  ;;  %v12615_v39 = vpack.c.bf16 %v15021_v63, %v12367_v9  ;;  %v1065_v4 = vsel %vm1007_vm3, %v1063_v46, %v1064_v23  ;;  %v1067_v33 = vsel %vm1007_vm3, %v1064_v23, %v1066_v21  ;;  %v1073_v34 = vrot.slane %v15023_v62, 2  ;;  %v15025_v23 = vld [vmem:[#allocation25_spill] sm:$0xff]  ;;  %v15027_v24 = vld [vmem:[#allocation28_spill] sm:$0xff] }
  0x49   : > { %v1074_v51 = vrot.slane %v12389_v25, 2  ;;  %v12623_v61 = vpack.c.bf16 %v1067_v33, %v1065_v4  ;;  %v1070_v44 = vsel %vm1007_vm3, %v1068_v49, %v1069_v57  ;;  %v1072_v28 = vsel %vm1007_vm3, %v1069_v57, %v1071_v36 }
  0x4a   : > { %v1076_v9 = vrot.slane %v15024_v18, 2  ;;  %v12630_v19 = vpack.c.bf16 %v1072_v28, %v1070_v44  ;;  %v12635_v7 = vpack.c.bf16 %v12389_v25, %v15023_v62  ;;  %v1078_v41 = vrot.slane %v12407_v15, 2  ;;  %v15026_v25 = vld [vmem:[#allocation27_spill] sm:$0xff] }
  0x4b   : > { %v1075_v52 = vsel %vm1007_vm3, %v1073_v34, %v1074_v51  ;;  %v1079_v46 = vrot.slane %v12412_v32, 2  ;;  %v1081_v21 = vrot.slane %v15025_v23, 2  ;;  %v12644_v49 = vpack.c.bf16 %v12412_v32, %v12407_v15  ;;  %v15032_v23 = vld [vmem:[#allocation9_spill] sm:$0xff] }
  0x4c   : > { %v1077_v40 = vsel %vm1007_vm3, %v1074_v51, %v1076_v9  ;;  %v1083_v57 = vrot.slane %v15026_v25, 2  ;;  %v1084_v36 = vrot.slane %v15027_v24, 2  ;;  %v1086_v4 = vrot.slane %v12445_v42, 2  ;;  %v15028_v9 = vld [vmem:[#allocation8_spill] sm:$0xff] }
  0x4d   : > { %9773 = vmatmul.mubr.msk.bf16.gmra.mrb[20].mxu1 %vm581_vm2, %v12469_v2  ;;  %v12648_v63 = vpack.c.bf16 %v1077_v40, %v1075_v52  ;;  %v1080_v33 = vsel %vm1007_vm3, %v1078_v41, %v1079_v46  ;;  %v1082_v62 = vsel %vm1007_vm3, %v1079_v46, %v1081_v21  ;;  %v12659_v15 = vpack.c.bf16 %v15027_v24, %v15026_v25  ;;  %v15030_v41 = vld [vmem:[#allocation7_spill] sm:$0xff] }
  0x4e   : > { %9776 = vmatprep.mubr.msk.bf16.mxu1 %vm581_vm2, %v12471_v45  ;;  %v1796_v32 = vrot.slane %v12452_v54, 2  ;;  %v12662_v34 = vpack.c.bf16 %v1082_v62, %v1080_v33  ;;  %v1085_v51 = vsel %vm1007_vm3, %v1083_v57, %v1084_v36  ;;  %v1087_v44 = vsel %vm1007_vm3, %v1084_v36, %v1086_v4 }
  0x4f   : > { %9909 = vmatmul.mubr.msk.bf16.gmra.mrb[20].mxu0 %vm581_vm2, %v12471_v45  ;;  %v1797_v42 = vrot.slane %v12455_v53, 2  ;;  %v12667_v28 = vpack.c.bf16 %v1087_v44, %v1085_v51  ;;  %v1799_v18 = vrot.slane %v381_v50, 2  ;;  %v15029_v52 = vrot.slane %v15028_v9, 2 }
  0x50   : > { %9912 = vmatprep.mubr.msk.bf16.mxu0 %vm581_vm2, %v12473_v48  ;;  %v15031_v40 = vrot.slane %v15030_v41, 2  ;;  %v15033_v21 = vrot.slane %v15032_v23, 2  ;;  %v12685_v24 = vpack.c.bf16 %v12513_v60, %v12481_v14  ;;  %v1590_v36 = vrot.slane %v381_v50, 1 }
  0x51   : > { %v15034_v25 = vmov %v15029_v52  ;;  %v1798_v4 = vsel %vm1007_vm3, %v1796_v32, %v1797_v42  ;;  %v12694_v62 = vpack.c.bf16 %v12521_v31, %v12516_v11  ;;  %v1800_v51 = vsel %vm1007_vm3, %v1797_v42, %v1799_v18  ;;  %v15035_v32 = vld [vmem:[#allocation11_spill] sm:$0xff]  ;;  %v15037_v42 = vld [vmem:[#allocation10_spill] sm:$0xff] }
  0x52   : > { %v12674_v46 = vsel %vm1007_vm3, %v15031_v40, %v15029_v52  ;;  %v12681_v57 = vsel %vm1007_vm3, %v15034_v25, %v15033_v21  ;;  %v12699_v14 = vpack.c.bf16 %v1800_v51, %v1798_v4  ;;  %v12705_v60 = vpack.c.bf16 %v12455_v53, %v12452_v54  ;;  %v15039_v40 = vld [vmem:[#allocation12_spill] sm:$0xff]  ;;  %v15044_v51 = vld [vmem:[#allocation15_spill] sm:$0xff] }
  0x53   : > { %v1120_v33 = vpack.c.bf16 %v12681_v57, %v12674_v46  ;;  %v1589_v11 = vsel %vm450_vm1, %v1587_v59, %v1588_v1  ;;  %v1591_v31 = vsel %vm450_vm1, %v1588_v1, %v1590_v36  ;;  %v385_v50 = vpack.c.bf16 %v15028_v9, %v15030_v41  ;;  %v15042_v41 = vld [vmem:[#allocation14_spill] sm:$0xff]  ;;  %v15043_v36 = vld [vmem:[#allocation17_spill] sm:$0xff] }
  0x54   : > { %v15036_v44 = vrot.slane %v15035_v32, 2  ;;  %v15038_v18 = vrot.slane %v15037_v42, 2  ;;  %v15040_v23 = vrot.slane %v15039_v40, 2  ;;  %v12729_v59 = vpack.c.bf16 %v1591_v31, %v1589_v11  ;;  %v12851_v46 = vld [vmem:[%s12170_s21 + $0x198] sm:$0xff]  ;;  %v12854_v57 = vld [vmem:[%s12170_s21 + $0x1a0] sm:$0xff] }
  0x55   : > { %9777 = vmatmul.mubr.msk.bf16.gmra.mrb[24].mxu1 %vm581_vm2, %v12473_v48  ;;  %v1023_v1 = vrot.slane %v12213_v26, 2  ;;  %v1024_v9 = vrot.slane %v12216_v27, 2  ;;  %v1026_v25 = vrot.slane %v15042_v41, 2  ;;  %v2012_v4 = vsel %vm630_vm0, %v15043_v36, 0  ;;  %v8640_v27 = vld [vmem:[%s14917_s1 + $0x6] sm:$0x3] }
  0x56   : > { %9780 = vmatprep.mubr.msk.bf16.mxu1 %vm581_vm2, %v12685_v24  ;;  %v1015_v52 = vsel %vm1007_vm3, %v15038_v18, %v15036_v44  ;;  %v15041_v21 = vmov %v15036_v44  ;;  %v1187_v11 = vsel %vm630_vm0, %v15044_v51, 0  ;;  %v8708_v44 = vld [vmem:[%s14917_s1 + $0xe] sm:$0x3]  ;;  %v1389_v42 = vsel %vm630_vm0, %v8640_v27, 0  ;;  %v8725_v18 = vld [vmem:[%s14917_s1 + $0x10] sm:$0x3] }
  0x57   : > { %9913 = vmatmul.mubr.msk.bf16.gmra.mrb[24].mxu0 %vm581_vm2, %v12685_v24  ;;  %v1017_v54 = vsel %vm1007_vm3, %v15041_v21, %v15040_v23  ;;  %v1025_v31 = vsel %vm1007_vm3, %v1023_v1, %v1024_v9  ;;  %v1027_v26 = vsel %vm1007_vm3, %v1024_v9, %v1026_v25  ;;  %v2420_v40 = vrot.slane %v12854_v57, 2  ;;  %v12861_v23 = vld [vmem:[%s12170_s21 + $0x1a8] sm:$0x3]  ;;  %v15046_v41 = vld [vmem:[#allocation16_spill] sm:$0xff]  ;;  %v15047_v36 = vld [vmem:[#allocation18_spill] sm:$0xff]  ;;  %s11985_s21 = sshll.u32 %s12048_s13, 4  ;;  %s11986_s21 = int_to_ptr.vmem [resolvable:$false] %s11985_s21 }
  0x58   : > { %9916 = vmatprep.mubr.msk.bf16.mxu0 %vm581_vm2, %v12694_v62  ;;  %v1121_v53 = vpack.c.bf16 %v1017_v54, %v1015_v52  ;;  %v12751_v32 = vpack.c.bf16 %v1027_v26, %v1025_v31  ;;  %v2224_v52 = vsel %vm630_vm0, %v8708_v44, 0  ;;  %v2422_v21 = vrot.slane %v12861_v23, 2  ;;  %v15049_v51 = vld [vmem:[#allocation20_spill] sm:$0xff]  ;;  %s11987_s23 = scalar_lea.vmem %s11986_s21, 32  ;;  %p11988_p0 = scmp.lt.s32.totalorder %s14876_s27, %s11986_s21 }
  0x59   : > { %v2005_v9 = vpack.c.bf16 %v12854_v57, %v12851_v46  ;;  %v2433_v25 = vsel %vm630_vm0, %v8725_v18, 0  ;;  %p11989_p1 = scmp.lt.s32.totalorder %s11987_s23, %s11981_s17 }
  0x5b   : > { %p11990_p2 = por %p11989_p1, %p11988_p0 }
  0x5d   : > { %9781 = vmatmul.mubr.msk.bf16.gmra.mrb[28].mxu1 %vm581_vm2, %v12694_v62  ;;  %p11991_p3 = pnand %p11990_p2, %p11984_p13 }
  0x5e   : > { %9786 = vmatprep.mubr.msk.bf16.mxu1 %vm581_vm2, %v385_v50  ;;  %v15045_v50 = vld [vmem:[#allocation13_spill] sm:$0xff] }
  0x5f   : > { %9917 = vmatmul.mubr.msk.bf16.gmra.mrb[28].mxu0 %vm581_vm2, %v12729_v59 }
  0x60   : > { %9922 = vmatprep.mubr.msk.bf16.mxu0 %vm581_vm2, %v1121_v53 }
  0x65   : > { %9787 = vmatmul.mubr.msk.bf16.vlgmr.msra.gmra.mrb[0].mxu1 %vm581_vm2, %v15045_v50 }
  0x66   : > { %9790 = vmatprep.mubr.msk.bf16.mxu1 %vm581_vm2, %v12491_v10  ;;  %9819 = vmatpush3.bf16.msra.mxu1 %v1187_v11 }
  0x67   : > { %11752 = vmatprep.subr.msk.bf16.mxu1 %vm630_vm0, %v8640_v27  ;;  %9923 = vmatmul.mubr.msk.bf16.vlgmr.msra.gmra.mrb[0].mxu0 %vm581_vm2, %v12495_v12 }
  0x68   : > { %9955 = vmatpush3.bf16.msra.mxu0 %v2012_v4  ;;  %9926 = vmatprep.mubr.msk.bf16.mxu0 %vm581_vm2, %v12751_v32  ;;  %v15048_v4 = vld [vmem:[#allocation19_spill] sm:$0xff] }
  0x69   : > { %11756 = vmatprep.subr.msk.bf16.mxu0 %vm630_vm0, %v8708_v44 }
  0x6d   : > { %9791 = vmatmul.mubr.msk.bf16.gmra.mrb[4].mxu1 %vm581_vm2, %v12499_v20 }
  0x6e   : > { %9794 = vmatprep.mubr.msk.bf16.mxu1 %vm581_vm2, %v12508_v22 }
  0x6f   : > { %9927 = vmatmul.mubr.msk.bf16.gmra.mrb[4].mxu0 %vm581_vm2, %v12528_v37 }
  0x70   : > { %9930 = vmatprep.mubr.msk.bf16.mxu0 %vm581_vm2, %v12545_v16 }
  0x75   : > { %9795 = vmatmul.mubr.msk.bf16.gmra.mrb[8].mxu1 %vm581_vm2, %v12533_v38 }
  0x76   : > { %9798 = vmatprep.mubr.msk.bf16.mxu1 %vm581_vm2, %v12543_v0 }
  0x77   : > { %9931 = vmatmul.mubr.msk.bf16.gmra.mrb[8].mxu0 %vm581_vm2, %v12557_v56 }
  0x78   : > { %9934 = vmatprep.mubr.msk.bf16.mxu0 %vm581_vm2, %v12564_v5 }
  0x7d   : > { %9799 = vmatmul.mubr.msk.bf16.gmra.mrb[12].mxu1 %vm581_vm2, %v12554_v17 }
  0x7e   : > { %9802 = vmatprep.mubr.msk.bf16.mxu1 %vm581_vm2, %v12569_v3 }
  0x7f   : > { %9935 = vmatmul.mubr.msk.bf16.gmra.mrb[12].mxu0 %vm581_vm2, %v12587_v47 }
  0x80   : > { %9938 = vmatprep.mubr.msk.bf16.mxu0 %vm581_vm2, %v12597_v30 }
  0x85   : > { %9803 = vmatmul.mubr.msk.bf16.gmra.mrb[16].mxu1 %vm581_vm2, %v12579_v35 }
  0x86   : > { %9806 = vmatprep.mubr.msk.bf16.mxu1 %vm581_vm2, %v12593_v29 }
  0x87   : > { %9939 = vmatmul.mubr.msk.bf16.gmra.mrb[16].mxu0 %vm581_vm2, %v12602_v55 }
  0x88   : > { %9942 = vmatprep.mubr.msk.bf16.mxu0 %vm581_vm2, %v12623_v61 }
  0x8d   : > { %9807 = vmatmul.mubr.msk.bf16.gmra.mrb[20].mxu1 %vm581_vm2, %v12608_v43 }
  0x8e   : > { %9810 = vmatprep.mubr.msk.bf16.mxu1 %vm581_vm2, %v12615_v39 }
  0x8f   : > { %9943 = vmatmul.mubr.msk.bf16.gmra.mrb[20].mxu0 %vm581_vm2, %v12630_v19 }
  0x90   : > { %9946 = vmatprep.mubr.msk.bf16.mxu0 %vm581_vm2, %v12648_v63 }
  0x95   : > { %9811 = vmatmul.mubr.msk.bf16.gmra.mrb[24].mxu1 %vm581_vm2, %v12635_v7 }
  0x96   : > { %9814 = vmatprep.mubr.msk.bf16.mxu1 %vm581_vm2, %v12644_v49 }
  0x97   : > { %9947 = vmatmul.mubr.msk.bf16.gmra.mrb[24].mxu0 %vm581_vm2, %v12662_v34 }
  0x98   : > { %9950 = vmatprep.mubr.msk.bf16.mxu0 %vm581_vm2, %v12667_v28 }
  0x9d   : > { %9815 = vmatmul.mubr.msk.bf16.gmra.mrb[28].mxu1 %vm581_vm2, %v12659_v15 }
  0x9e   : > { %9820 = vmatprep.mubr.msk.bf16.mxu1 %vm581_vm2, %v1120_v33  ;;  %v2419_v33 = vrot.slane %v12851_v46, 2 }
  0x9f   : > { %9951 = vmatmul.mubr.msk.bf16.gmra.mrb[28].mxu0 %vm581_vm2, %v12699_v14 }
  0xa0   : > { %9956 = vmatprep.mubr.msk.bf16.mxu0 %vm581_vm2, %v12491_v10  ;;  %v12867_v54 = vsel %vm1007_vm3, %v2419_v33, %v2420_v40 }
  0xa5   : > { %9821 = vmatmul.mubr.msk.bf16.vlgmr.msra.gmra.mrb[0].mxu1 %vm581_vm2, %v1121_v53  ;;  %v12870_v53 = vsel %vm1007_vm3, %v2420_v40, %v2422_v21 }
  0xa6   : > { %9824 = vmatprep.mubr.msk.bf16.mxu1 %vm581_vm2, %v12495_v12  ;;  %9853 = vmatpush3.bf16.msra.mxu1 %v1389_v42  ;;  %v2426_v1 = vpack.c.bf16 %v12870_v53, %v12867_v54 }
  0xa7   : > { %11758 = vmatprep.subr.msk.bf16.mxu1 %vm630_vm0, %v8725_v18  ;;  %9957 = vmatmul.mubr.msk.bf16.vlgmr.msra.gmra.mrb[0].mxu0 %vm581_vm2, %v12499_v20 }
  0xa8   : > { %9989 = vmatpush3.bf16.msra.mxu0 %v2224_v52  ;;  %9960 = vmatprep.mubr.msk.bf16.mxu0 %vm581_vm2, %v12508_v22 }
  0xa9   : > { %11757 = vmatprep.subr.msk.bf16.mxu0 %vm630_vm0, %v8725_v18 }
  0xad   : > { %9825 = vmatmul.mubr.msk.bf16.gmra.mrb[4].mxu1 %vm581_vm2, %v12751_v32 }
  0xae   : > { %9828 = vmatprep.mubr.msk.bf16.mxu1 %vm581_vm2, %v12528_v37 }
  0xaf   : > { %9961 = vmatmul.mubr.msk.bf16.gmra.mrb[4].mxu0 %vm581_vm2, %v12533_v38 }
  0xb0   : > { %9964 = vmatprep.mubr.msk.bf16.mxu0 %vm581_vm2, %v12543_v0 }
  0xb5   : > { %9829 = vmatmul.mubr.msk.bf16.gmra.mrb[8].mxu1 %vm581_vm2, %v12545_v16 }
  0xb6   : > { %9832 = vmatprep.mubr.msk.bf16.mxu1 %vm581_vm2, %v12557_v56 }
  0xb7   : > { %9965 = vmatmul.mubr.msk.bf16.gmra.mrb[8].mxu0 %vm581_vm2, %v12554_v17 }
  0xb8   : > { %9968 = vmatprep.mubr.msk.bf16.mxu0 %vm581_vm2, %v12569_v3 }
  0xbd   : > { %9833 = vmatmul.mubr.msk.bf16.gmra.mrb[12].mxu1 %vm581_vm2, %v12564_v5 }
  0xbe   : > { %9836 = vmatprep.mubr.msk.bf16.mxu1 %vm581_vm2, %v12587_v47 }
  0xbf   : > { %9969 = vmatmul.mubr.msk.bf16.gmra.mrb[12].mxu0 %vm581_vm2, %v12579_v35 }
  0xc0   : > { %9972 = vmatprep.mubr.msk.bf16.mxu0 %vm581_vm2, %v12593_v29 }
  0xc5   : > { %9837 = vmatmul.mubr.msk.bf16.gmra.mrb[16].mxu1 %vm581_vm2, %v12597_v30 }
  0xc6   : > { %9840 = vmatprep.mubr.msk.bf16.mxu1 %vm581_vm2, %v12602_v55 }
  0xc7   : > { %9973 = vmatmul.mubr.msk.bf16.gmra.mrb[16].mxu0 %vm581_vm2, %v12608_v43 }
  0xc8   : > { %9976 = vmatprep.mubr.msk.bf16.mxu0 %vm581_vm2, %v12615_v39 }
  0xcd   : > { %9841 = vmatmul.mubr.msk.bf16.gmra.mrb[20].mxu1 %vm581_vm2, %v12623_v61 }
  0xce   : > { %9844 = vmatprep.mubr.msk.bf16.mxu1 %vm581_vm2, %v12630_v19 }
  0xcf   : > { %9977 = vmatmul.mubr.msk.bf16.gmra.mrb[20].mxu0 %vm581_vm2, %v12635_v7 }
  0xd0   : > { %9980 = vmatprep.mubr.msk.bf16.mxu0 %vm581_vm2, %v12644_v49 }
  0xd5   : > { %9845 = vmatmul.mubr.msk.bf16.gmra.mrb[24].mxu1 %vm581_vm2, %v12648_v63 }
  0xd6   : > { %9848 = vmatprep.mubr.msk.bf16.mxu1 %vm581_vm2, %v12662_v34 }
  0xd7   : > { %9981 = vmatmul.mubr.msk.bf16.gmra.mrb[24].mxu0 %vm581_vm2, %v12659_v15 }
  0xd8   : > { %9984 = vmatprep.mubr.msk.bf16.mxu0 %vm581_vm2, %v12705_v60 }
  0xdd   : > { %9849 = vmatmul.mubr.msk.bf16.gmra.mrb[28].mxu1 %vm581_vm2, %v12667_v28 }
  0xde   : > { %9854 = vmatprep.mubr.msk.bf16.mxu1 %vm581_vm2, %v15045_v50 }
  0xdf   : > { %9985 = vmatmul.mubr.msk.bf16.gmra.mrb[28].mxu0 %vm581_vm2, %v2005_v9 }
  0xe0   : > { %9990 = vmatprep.mubr.msk.bf16.mxu0 %vm581_vm2, %v15046_v41 }
  0xe5   : > { %9855 = vmatmul.mubr.msk.bf16.vlgmr.msra.gmra.mrb[0].mxu1 %vm581_vm2, %v12491_v10  ;;  %v15050_v10 = vld [vmem:[#allocation26_spill] sm:$0xff] }
  0xe6   : > { %9858 = vmatprep.mubr.msk.bf16.mxu1 %vm581_vm2, %v12499_v20  ;;  %10980 = vmatpush3.bf16.msra.mxu1 %v2433_v25  ;;  %v11804_v20 = vld [vmem:[%s14919_s3 + $0x50] sm:$0xff]  }
  0xe7   : > { %9991 = vmatmul.mubr.msk.bf16.vlgmr.msra.gmra.mrb[0].mxu0 %vm581_vm2, %v15047_v36 }
  0xe8   : > { %10023 = vmatpush3.bf16.msra.mxu0 %v2433_v25  ;;  %9994 = vmatprep.mubr.msk.bf16.mxu0 %vm581_vm2, %v15048_v4 }
  0xed   : > { %9859 = vmatmul.mubr.msk.bf16.gmra.mrb[4].mxu1 %vm581_vm2, %v12508_v22  ;;  %v11805_v22 = vld [vmem:[%s14919_s3 + $0x58] sm:$0xff]  }
  0xee   : > { %9862 = vmatprep.mubr.msk.bf16.mxu1 %vm581_vm2, %v12533_v38  ;;  %v12045_v38 = vmov 0.0  }
  0xef   : > { %9995 = vmatmul.mubr.msk.bf16.gmra.mrb[4].mxu0 %vm581_vm2, %v15049_v51  ;;  %2705 = vst [vmem:[#allocation2 + $0x30] sm:$0xff] %v12045_v38  ;;  %2706 = vst [vmem:[#allocation2 + $0x38] sm:$0xff] %v12045_v38 }
  0xf0   : > { %9998 = vmatprep.mubr.msk.bf16.mxu0 %vm581_vm2, %v15050_v10  ;;  %2699 = vst [vmem:[#allocation2] sm:$0xff] %v12045_v38  ;;  %2701 = vst [vmem:[#allocation2 + $0x10] sm:$0x3] %v12045_v38 }
  0xf1   : > { %2702 = vst [vmem:[#allocation2 + $0x18] sm:$0xff] %v12045_v38  ;;  %2703 = vst [vmem:[#allocation2 + $0x20] sm:$0xff] %v12045_v38 }
  0xf2   : > { %2704 = vst [vmem:[#allocation2 + $0x28] sm:$0x3] %v12045_v38  ;;  %2707 = vst [vmem:[#allocation2 + $0x40] sm:$0x3] %v12045_v38 }
  0xf3   : > { %2708 = vst [vmem:[#allocation2 + $0x48] sm:$0xff] %v12045_v38  ;;  %2709 = vst [vmem:[#allocation2 + $0x50] sm:$0xff] %v12045_v38 }
  0xf4   : > { %2710 = vst [vmem:[#allocation2 + $0x58] sm:$0x3] %v12045_v38  ;;  %2711 = vst [vmem:[#allocation2 + $0x60] sm:$0xff] %v12045_v38 }
  0xf5   : > { %9863 = vmatmul.mubr.msk.bf16.gmra.mrb[8].mxu1 %vm581_vm2, %v12543_v0  ;;  %2712 = vst [vmem:[#allocation2 + $0x68] sm:$0xff] %v12045_v38  ;;  %2713 = vst [vmem:[#allocation2 + $0x70] sm:$0x3] %v12045_v38  ;;  %v11807_v0 = vld [vmem:[%s14919_s3 + $0x68] sm:$0xff]  }
  0xf6   : > { %9866 = vmatprep.mubr.msk.bf16.mxu1 %vm581_vm2, %v12554_v17  ;;  %2714 = vst [vmem:[#allocation2 + $0x78] sm:$0xff] %v12045_v38  ;;  %2715 = vst [vmem:[#allocation2 + $0x80] sm:$0xff] %v12045_v38 }
  0xf7   : > { %9999 = vmatmul.mubr.msk.bf16.gmra.mrb[8].mxu0 %vm581_vm2, %v12421_v6  ;;  %v2210_v6 = vrot.slane %v12851_v46, 1  ;;  %2716 = vst [vmem:[#allocation2 + $0x88] sm:$0x3] %v12045_v38  ;;  %2717 = vst [vmem:[#allocation2 + $0x90] sm:$0xff] %v12045_v38  ;;  %v2788_v17 = vld [vmem:[#allocation2 + $0x10] sm:$0x3] }
  0xf8   : > { %10002 = vmatprep.mubr.msk.bf16.mxu0 %vm581_vm2, %v12463_v58  ;;  %v2211_v58 = vrot.slane %v12854_v57, 1  ;;  %2718 = vst [vmem:[#allocation2 + $0x98] sm:$0xff] %v12045_v38  ;;  %2719 = vst [vmem:[#allocation2 + $0xa0] sm:$0x3] %v12045_v38 }
  0xf9   : > { %2720 = vst [vmem:[#allocation2 + $0xa8] sm:$0xff] %v12045_v38  ;;  %2721 = vst [vmem:[#allocation2 + $0xb0] sm:$0xff] %v12045_v38 }
  0xfa   : > { %2722 = vst [vmem:[#allocation2 + $0xb8] sm:$0x3] %v12045_v38  ;;  %2723 = vst [vmem:[#allocation2 + $0xc0] sm:$0xff] %v12045_v38 }
  0xfb   : > { %2724 = vst [vmem:[#allocation2 + $0xc8] sm:$0xff] %v12045_v38  ;;  %2725 = vst [vmem:[#allocation2 + $0xd0] sm:$0x3] %v12045_v38 }
  0xfc   : > { %2726 = vst [vmem:[#allocation2 + $0xd8] sm:$0xff] %v12045_v38  ;;  %2727 = vst [vmem:[#allocation2 + $0xe0] sm:$0xff] %v12045_v38 }
  0xfd   : > { %9867 = vmatmul.mubr.msk.bf16.gmra.mrb[12].mxu1 %vm581_vm2, %v12569_v3  ;;  %2728 = vst [vmem:[#allocation2 + $0xe8] sm:$0x3] %v12045_v38  ;;  %2729 = vst [vmem:[#allocation2 + $0xf0] sm:$0xff] %v12045_v38  ;;  %v2923_v3 = vrot.slane %v2788_v17, 1 }
  0xfe   : > { %9870 = vmatprep.mubr.msk.bf16.mxu1 %vm581_vm2, %v12579_v35  ;;  %2730 = vst [vmem:[#allocation2 + $0xf8] sm:$0xff] %v12045_v38  ;;  %2731 = vst [vmem:[#allocation2 + $0x100] sm:$0x3] %v12045_v38 }
  0xff   : > { %10003 = vmatmul.mubr.msk.bf16.gmra.mrb[12].mxu0 %vm581_vm2, %v12465_v8  ;;  %v2213_v8 = vrot.slane %v12861_v23, 1  ;;  %2732 = vst [vmem:[#allocation2 + $0x108] sm:$0xff] %v12045_v38  ;;  %2733 = vst [vmem:[#allocation2 + $0x110] sm:$0xff] %v12045_v38 }
 0x100   : > { %10006 = vmatprep.mubr.msk.bf16.mxu0 %vm581_vm2, %v12467_v13  ;;  %v2212_v13 = vsel %vm450_vm1, %v2210_v6, %v2211_v58  ;;  %2734 = vst [vmem:[#allocation2 + $0x118] sm:$0x3] %v12045_v38  ;;  %2735 = vst [vmem:[#allocation2 + $0x120] sm:$0xff] %v12045_v38 }
 0x101   : > { %2736 = vst [vmem:[#allocation2 + $0x128] sm:$0xff] %v12045_v38  ;;  %2737 = vst [vmem:[#allocation2 + $0x130] sm:$0x3] %v12045_v38 }
 0x102   : > { %2738 = vst [vmem:[#allocation2 + $0x138] sm:$0xff] %v12045_v38  ;;  %2739 = vst [vmem:[#allocation2 + $0x140] sm:$0xff] %v12045_v38 }
 0x103   : > { %2740 = vst [vmem:[#allocation2 + $0x148] sm:$0x3] %v12045_v38  ;;  %2741 = vst [vmem:[#allocation2 + $0x150] sm:$0xff] %v12045_v38 }
 0x104   : > { %2742 = vst [vmem:[#allocation2 + $0x158] sm:$0xff] %v12045_v38  ;;  %2743 = vst [vmem:[#allocation2 + $0x160] sm:$0x3] %v12045_v38 }
 0x105   : > { %9871 = vmatmul.mubr.msk.bf16.gmra.mrb[16].mxu1 %vm581_vm2, %v12593_v29  ;;  %2744 = vst [vmem:[#allocation2 + $0x168] sm:$0xff] %v12045_v38  ;;  %2745 = vst [vmem:[#allocation2 + $0x170] sm:$0xff] %v12045_v38  ;;  %v13146_v29 = vld [vmem:[%s14919_s3] sm:$0xff]  }
 0x106   : > { %9874 = vmatprep.mubr.msk.bf16.mxu1 %vm581_vm2, %v12608_v43  ;;  %2746 = vst [vmem:[#allocation2 + $0x178] sm:$0x3] %v12045_v38  ;;  %2747 = vst [vmem:[#allocation2 + $0x180] sm:$0xff] %v12045_v38 }
 0x107   : > { %10007 = vmatmul.mubr.msk.bf16.gmra.mrb[16].mxu0 %vm581_vm2, %v12469_v2  ;;  %v2214_v2 = vsel %vm450_vm1, %v2211_v58, %v2213_v8  ;;  %2748 = vst [vmem:[#allocation2 + $0x188] sm:$0xff] %v12045_v38  ;;  %2749 = vst [vmem:[#allocation2 + $0x190] sm:$0x3] %v12045_v38 }
 0x108   : > { %10010 = vmatprep.mubr.msk.bf16.mxu0 %vm581_vm2, %v12471_v45  ;;  %v2217_v45 = vpack.c.bf16 %v2214_v2, %v2212_v13  ;;  %2752 = vst [vmem:[#allocation2 + $0x1a8] sm:$0x3] %v12045_v38  ;;  %5530 = vst [vmem:[#allocation3 + $0x10] sm:$0x3] %v12045_v38 }
 0x109   : > { %5531 = vst [vmem:[#allocation3 + $0x18] sm:$0xff] %v12045_v38  ;;  %5532 = vst [vmem:[#allocation3 + $0x20] sm:$0xff] %v12045_v38 }
 0x10a   : > { %5533 = vst [vmem:[#allocation3 + $0x28] sm:$0x3] %v12045_v38  ;;  %5534 = vst [vmem:[#allocation3 + $0x30] sm:$0xff] %v12045_v38 }
 0x10b   : > { %5535 = vst [vmem:[#allocation3 + $0x38] sm:$0xff] %v12045_v38  ;;  %5536 = vst [vmem:[#allocation3 + $0x40] sm:$0x3] %v12045_v38 }
 0x10c   : > { %5537 = vst [vmem:[#allocation3 + $0x48] sm:$0xff] %v12045_v38  ;;  %5538 = vst [vmem:[#allocation3 + $0x50] sm:$0xff] %v12045_v38 }
 0x10d   : > { %9875 = vmatmul.mubr.msk.bf16.gmra.mrb[20].mxu1 %vm581_vm2, %v12615_v39  ;;  %5539 = vst [vmem:[#allocation3 + $0x58] sm:$0x3] %v12045_v38  ;;  %5540 = vst [vmem:[#allocation3 + $0x60] sm:$0xff] %v12045_v38 }
 0x10e   : > { %9878 = vmatprep.mubr.msk.bf16.mxu1 %vm581_vm2, %v12635_v7  ;;  %5541 = vst [vmem:[#allocation3 + $0x68] sm:$0xff] %v12045_v38  ;;  %5542 = vst [vmem:[#allocation3 + $0x70] sm:$0x3] %v12045_v38 }
 0x10f   : > { %10011 = vmatmul.mubr.msk.bf16.gmra.mrb[20].mxu0 %vm581_vm2, %v12473_v48  ;;  %v11802_v48 = vld [vmem:[%s14919_s3 + $0x40] sm:$0xff]   ;;  %5543 = vst [vmem:[#allocation3 + $0x78] sm:$0xff] %v12045_v38  ;;  %5544 = vst [vmem:[#allocation3 + $0x80] sm:$0xff] %v12045_v38 }
 0x110   : > { %10014 = vmatprep.mubr.msk.bf16.mxu0 %vm581_vm2, %v12685_v24  ;;  %10056 = vmatprep.subr.bf16.mxu1 %v11802_v48  ;;  %5545 = vst [vmem:[#allocation3 + $0x88] sm:$0x3] %v12045_v38  ;;  %5546 = vst [vmem:[#allocation3 + $0x90] sm:$0xff] %v12045_v38 }
 0x111   : > { %5547 = vst [vmem:[#allocation3 + $0x98] sm:$0xff] %v12045_v38  ;;  %5548 = vst [vmem:[#allocation3 + $0xa0] sm:$0x3] %v12045_v38 }
 0x112   : > { %5549 = vst [vmem:[#allocation3 + $0xa8] sm:$0xff] %v12045_v38  ;;  %5550 = vst [vmem:[#allocation3 + $0xb0] sm:$0xff] %v12045_v38 }
 0x113   : > { %5551 = vst [vmem:[#allocation3 + $0xb8] sm:$0x3] %v12045_v38  ;;  %5552 = vst [vmem:[#allocation3 + $0xc0] sm:$0xff] %v12045_v38 }
 0x114   : > { %5553 = vst [vmem:[#allocation3 + $0xc8] sm:$0xff] %v12045_v38  ;;  %5554 = vst [vmem:[#allocation3 + $0xd0] sm:$0x3] %v12045_v38 }
 0x115   : > { %9879 = vmatmul.mubr.msk.bf16.gmra.mrb[24].mxu1 %vm581_vm2, %v12644_v49  ;;  %5555 = vst [vmem:[#allocation3 + $0xd8] sm:$0xff] %v12045_v38  ;;  %5556 = vst [vmem:[#allocation3 + $0xe0] sm:$0xff] %v12045_v38 }
 0x116   : > { %9882 = vmatprep.mubr.msk.bf16.mxu1 %vm581_vm2, %v12659_v15  ;;  %5557 = vst [vmem:[#allocation3 + $0xe8] sm:$0x3] %v12045_v38  ;;  %5558 = vst [vmem:[#allocation3 + $0xf0] sm:$0xff] %v12045_v38 }
 0x117   : > { %10015 = vmatmul.mubr.msk.bf16.gmra.mrb[24].mxu0 %vm581_vm2, %v12694_v62  ;;  %5559 = vst [vmem:[#allocation3 + $0xf8] sm:$0xff] %v12045_v38  ;;  %5560 = vst [vmem:[#allocation3 + $0x100] sm:$0x3] %v12045_v38 }
 0x118   : > { %10018 = vmatprep.mubr.msk.bf16.mxu0 %vm581_vm2, %v12729_v59  ;;  %5561 = vst [vmem:[#allocation3 + $0x108] sm:$0xff] %v12045_v38  ;;  %5562 = vst [vmem:[#allocation3 + $0x110] sm:$0xff] %v12045_v38 }
 0x119   : > { %5563 = vst [vmem:[#allocation3 + $0x118] sm:$0x3] %v12045_v38  ;;  %5564 = vst [vmem:[#allocation3 + $0x120] sm:$0xff] %v12045_v38 }
 0x11a   : > { %5565 = vst [vmem:[#allocation3 + $0x128] sm:$0xff] %v12045_v38  ;;  %5566 = vst [vmem:[#allocation3 + $0x130] sm:$0x3] %v12045_v38 }
 0x11b   : > { %5567 = vst [vmem:[#allocation3 + $0x138] sm:$0xff] %v12045_v38  ;;  %5568 = vst [vmem:[#allocation3 + $0x140] sm:$0xff] %v12045_v38 }
 0x11c   : > { %5569 = vst [vmem:[#allocation3 + $0x148] sm:$0x3] %v12045_v38  ;;  %5570 = vst [vmem:[#allocation3 + $0x150] sm:$0xff] %v12045_v38 }
 0x11d   : > { %9883 = vmatmul.mubr.msk.bf16.gmra.mrb[28].mxu1 %vm581_vm2, %v12705_v60  ;;  %5571 = vst [vmem:[#allocation3 + $0x158] sm:$0xff] %v12045_v38  ;;  %5572 = vst [vmem:[#allocation3 + $0x160] sm:$0x3] %v12045_v38 }
 0x11e   : > { %10040 = vmatprep.mubr.msk.bf16.mxu1 %vm581_vm2, %v12602_v55  ;;  %5573 = vst [vmem:[#allocation3 + $0x168] sm:$0xff] %v12045_v38  ;;  %5574 = vst [vmem:[#allocation3 + $0x170] sm:$0xff] %v12045_v38 }
 0x11f   : > { %10019 = vmatmul.mubr.msk.bf16.gmra.mrb[28].mxu0 %vm581_vm2, %v2217_v45  ;;  %5575 = vst [vmem:[#allocation3 + $0x178] sm:$0x3] %v12045_v38  ;;  %5576 = vst [vmem:[#allocation3 + $0x180] sm:$0xff] %v12045_v38 }
 0x120   : > { %10024 = vmatprep.mubr.msk.bf16.mxu0 %vm581_vm2, %v12495_v12  ;;  %v11803_v12 = vld [vmem:[%s14919_s3 + $0x48] sm:$0xff]   ;;  %5577 = vst [vmem:[#allocation3 + $0x188] sm:$0xff] %v12045_v38  ;;  %5578 = vst [vmem:[#allocation3 + $0x190] sm:$0x3] %v12045_v38 }
 0x121   : > { %5581 = vst [vmem:[#allocation3 + $0x1a8] sm:$0x3] %v12045_v38 }
 0x125   : > { %10041 = vmatmul.mubr.msk.bf16.vlgmr.msra.gmra.mrb[32].mxu1 %vm581_vm2, %v12623_v61 }
 0x126   : > { %10044 = vmatprep.mubr.msk.bf16.mxu1 %vm581_vm2, %v12630_v19  ;;  %10057 = vmatpush3.bf16.msra.mxu1 %v11802_v48 }
 0x127   : > { %10025 = vmatmul.mubr.msk.bf16.vlgmr.msra.gmra.mrb[0].mxu0 %vm581_vm2, %v12751_v32  ;;  %10058 = vmatprep.subr.bf16.mxu1 %v11803_v12 }
 0x128   : > { %10028 = vmatprep.mubr.msk.bf16.mxu0 %vm581_vm2, %v12528_v37  ;;  %v13027_v37 = vld [vmem:[%s14919_s3 + $0x60] sm:$0xff]  }
 0x12a   : > { %10059 = vmatpush3.bf16.msra.mxu1 %v11803_v12 }
 0x12b   : > { %10060 = vmatprep.subr.bf16.mxu1 %v11804_v20 }
 0x12d   : > { %10045 = vmatmul.mubr.msk.bf16.gmra.mrb[36].mxu1 %vm581_vm2, %v12648_v63 }
 0x12e   : > { %10048 = vmatprep.mubr.msk.bf16.mxu1 %vm581_vm2, %v12662_v34  ;;  %10061 = vmatpush3.bf16.msra.mxu1 %v11804_v20 }
 0x12f   : > { %10029 = vmatmul.mubr.msk.bf16.gmra.mrb[4].mxu0 %vm581_vm2, %v12545_v16  ;;  %10062 = vmatprep.subr.bf16.mxu1 %v11805_v22  ;;  %v11808_v16 = vld [vmem:[%s14919_s3 + $0x70] sm:$0xff]  }
 0x130   : > { %10032 = vmatprep.mubr.msk.bf16.mxu0 %vm581_vm2, %v12557_v56  ;;  %v11809_v56 = vld [vmem:[%s14919_s3 + $0x78] sm:$0xff]  }
 0x132   : > { %10063 = vmatpush3.bf16.msra.mxu1 %v11805_v22 }
 0x133   : > { %10064 = vmatprep.subr.bf16.mxu1 %v13027_v37 }
 0x135   : > { %10049 = vmatmul.mubr.msk.bf16.gmra.mrb[40].mxu1 %vm581_vm2, %v12667_v28 }
 0x136   : > { %10052 = vmatprep.mubr.msk.bf16.mxu1 %vm581_vm2, %v12699_v14  ;;  %10065 = vmatpush3.bf16.msra.mxu1 %v13027_v37 }
 0x137   : > { %10033 = vmatmul.mubr.msk.bf16.gmra.mrb[8].mxu0 %vm581_vm2, %v12564_v5  ;;  %10066 = vmatprep.subr.bf16.mxu1 %v11807_v0  ;;  %v2920_v5 = vrot.slane %v12045_v38, 1 }
 0x138   : > { %10036 = vmatprep.mubr.msk.bf16.mxu0 %vm581_vm2, %v12587_v47 }
 0x139   : > { %v2924_v35 = vsel %vm450_vm1, %v2920_v5, %v2923_v3 }
 0x13a   : > { %10067 = vmatpush3.bf16.msra.mxu1 %v11807_v0  ;;  %v3032_v47 = vpack.c.bf16 %v2924_v35, %v2920_v5 }
 0x13b   : > { %10068 = vmatprep.subr.bf16.mxu1 %v11808_v16 }
 0x13d   : > { %10053 = vmatmul.mubr.msk.bf16.gmra.mrb[44].mxu1 %vm581_vm2, %v2426_v1 }
 0x13e   : > { %10069 = vmatpush3.bf16.msra.mxu1 %v11808_v16  ;;  %10072 = vmatprep.mubr.bf16.mxu1 %v3032_v47 }
 0x13f   : > { %10037 = vmatmul.mubr.msk.bf16.gmra.mrb[12].mxu0 %vm581_vm2, %v12597_v30  ;;  %10070 = vmatprep.subr.bf16.mxu1 %v11809_v56 }
 0x142   : > { %10071 = vmatpush3.bf16.msra.mxu1 %v11809_v56 }
 0x143   : > { %10104 = vmatprep.subr.bf16.mxu1 %v13146_v29 }
 0x1b8   : > { %v13149_v30 = vpop.f32.mrb[0].mxu1 }
 0x1b9   : > { %v13151_v55 = vpop.f32.mrb[1].mxu1 }
 0x1ba   : > { %v13153_v43 = vpop.f32.mrb[2].mxu1 }
 0x1bb   : > { %v13155_v39 = vpop.f32.mrb[3].mxu1 }
 0x1c0   : > { %v13157_v61 = vpop.f32.mrb[4].mxu1 }
 0x1c1   : > { %v13159_v19 = vpop.f32.mrb[5].mxu1 }
 0x1c2   : > { %v13161_v7 = vpop.f32.mrb[6].mxu1 }
 0x1c3   : > { %v13163_v49 = vpop.f32.mrb[7].mxu1 }
 0x1c8   : > { %v13165_v63 = vpop.f32.mrb[8].mxu1 }
 0x1c9   : > { %v13167_v15 = vpop.f32.mrb[9].mxu1 }
 0x1ca   : > { %v13169_v34 = vpop.f32.mrb[10].mxu1 }
 0x1cb   : > { %v13171_v28 = vpop.f32.mrb[11].mxu1 }
 0x1d0   : > { %v13173_v24 = vpop.f32.mrb[12].mxu1 }
 0x1d1   : > { %v13175_v62 = vpop.f32.mrb[13].mxu1 }
 0x1d2   : > { %v13177_v14 = vpop.f32.mrb[14].mxu1 }
 0x1d3   : > { %v13179_v60 = vpop.f32.mrb[15].mxu1 }
 0x1d8   : > { %v9872_v59 = vpop.f32.mrb[16].mxu1 }
 0x1d9   : > { %v1489_v11 = vpop.f32.mrb[17].mxu1 }
 0x1da   : > { %v9873_v31 = vpop.f32.mrb[18].mxu1  ;;  %v10008_v26 = vpop.f32.mrb[16].mxu0 }
 0x1db   : > { %v1492_v27 = vpop.f32.mrb[19].mxu1  ;;  %v10997_v50 = vadd.f32 %v10008_v26, %v9872_v59  ;;  %v2324_v32 = vpop.f32.mrb[17].mxu0 }
 0x1dc   : > { %v10999_v44 = vadd.f32 %v2324_v32, %v1489_v11  ;;  %v10009_v42 = vpop.f32.mrb[18].mxu0  ;;  %v13208_v11 = vld [vmem:[%s14918_s2] ss:$0 sm:$0xff] }
 0x1dd   : > { %v11001_v18 = vadd.f32 %v10009_v42, %v9873_v31  ;;  %v2327_v52 = vpop.f32.mrb[19].mxu0 }
 0x1de   : > { %v11003_v46 = vadd.f32 %v2327_v52, %v1492_v27 }
 0x1e0   : > { %v9876_v57 = vpop.f32.mrb[20].mxu1 }
 0x1e1   : > { %v1505_v33 = vpop.f32.mrb[21].mxu1 }
 0x1e2   : > { %v9877_v40 = vpop.f32.mrb[22].mxu1  ;;  %v10012_v23 = vpop.f32.mrb[20].mxu0 }
 0x1e3   : > { %v1508_v21 = vpop.f32.mrb[23].mxu1  ;;  %v13181_v54 = vadd.f32 %v10012_v23, %v9876_v57  ;;  %v2340_v53 = vpop.f32.mrb[21].mxu0 }
 0x1e4   : > { %v13183_v1 = vadd.f32 %v2340_v53, %v1505_v33  ;;  %v10013_v9 = vpop.f32.mrb[22].mxu0 }
 0x1e5   : > { %v13185_v41 = vadd.f32 %v10013_v9, %v9877_v40  ;;  %v2343_v25 = vpop.f32.mrb[23].mxu0 }
 0x1e6   : > { %v13187_v36 = vadd.f32 %v2343_v25, %v1508_v21 }
 0x1e8   : > { %v9880_v4 = vpop.f32.mrb[24].mxu1 }
 0x1e9   : > { %v1521_v51 = vpop.f32.mrb[25].mxu1 }
 0x1ea   : > { %v9881_v10 = vpop.f32.mrb[26].mxu1  ;;  %v10016_v6 = vpop.f32.mrb[24].mxu0 }
 0x1eb   : > { %v1524_v58 = vpop.f32.mrb[27].mxu1  ;;  %v13189_v8 = vadd.f32 %v10016_v6, %v9880_v4  ;;  %v2356_v13 = vpop.f32.mrb[25].mxu0 }
 0x1ec   : > { %v13191_v2 = vadd.f32 %v2356_v13, %v1521_v51  ;;  %v10017_v45 = vpop.f32.mrb[26].mxu0 }
 0x1ed   : > { %v13193_v48 = vadd.f32 %v10017_v45, %v9881_v10  ;;  %v2359_v12 = vpop.f32.mrb[27].mxu0 }
 0x1ee   : > { %v13195_v20 = vadd.f32 %v2359_v12, %v1524_v58 }
 0x1f0   : > { %v9884_v22 = vpop.f32.mrb[28].mxu1 }
 0x1f1   : > { %v1537_v37 = vpop.f32.mrb[29].mxu1 }
 0x1f2   : > { %v9885_v38 = vpop.f32.mrb[30].mxu1  ;;  %v10020_v0 = vpop.f32.mrb[28].mxu0 }
 0x1f3   : > { %v1540_v16 = vpop.f32.mrb[31].mxu1  ;;  %v13197_v17 = vadd.f32 %v10020_v0, %v9884_v22  ;;  %v2372_v56 = vpop.f32.mrb[29].mxu0 }
 0x1f4   : > { %v13199_v5 = vadd.f32 %v2372_v56, %v1537_v37  ;;  %v10021_v3 = vpop.f32.mrb[30].mxu0 }
 0x1f5   : > { %v13201_v35 = vadd.f32 %v10021_v3, %v9885_v38  ;;  %v2375_v47 = vpop.f32.mrb[31].mxu0 }
 0x1f6   : > { %v13203_v59 = vadd.f32 %v2375_v47, %v1540_v16 }
 0x1f8   : > { %v10042_v31 = vpop.f32.mrb[32].mxu1 }
 0x1f9   : > { %v10998_v26 = vadd.f32 %v10997_v50, %v10042_v31  ;;  %v2533_v27 = vpop.f32.mrb[33].mxu1 }
 0x1fa   : > { %v11000_v32 = vadd.f32 %v10999_v44, %v2533_v27  ;;  %v10043_v42 = vpop.f32.mrb[34].mxu1  ;;  %v10026_v52 = vpop.f32.mrb[0].mxu0 }
 0x1fb   : > { %v2653_v57 = vadd.f32 %v10998_v26, %v13208_v11  ;;  %v11002_v33 = vadd.f32 %v11001_v18, %v10043_v42  ;;  %v2536_v40 = vpop.f32.mrb[35].mxu1  ;;  %v10981_v23 = vadd.f32 %v10026_v52, %v13149_v30  ;;  %v2469_v21 = vpop.f32.mrb[1].mxu0 }
 0x1fc   : > { %v2651_v53 = vadd.f32 %v11000_v32, %v13208_v11  ;;  %v11004_v9 = vadd.f32 %v11003_v46, %v2536_v40  ;;  %v10982_v4 = vadd.f32 %v2469_v21, %v13151_v55  ;;  %v10027_v51 = vpop.f32.mrb[2].mxu0 }
 0x1fd   : > { %v2685_v25 = vmax.f32 %v2653_v57, 0.0  ;;  %v2654_v50 = vadd.f32 %v11002_v33, %v13208_v11  ;;  %v2637_v44 = vadd.f32 %v10981_v23, %v13208_v11  ;;  %v10983_v6 = vadd.f32 %v10027_v51, %v13153_v43  ;;  %v2472_v58 = vpop.f32.mrb[3].mxu0 }
 0x1fe   : > { %v2683_v10 = vmax.f32 %v2651_v53, 0.0  ;;  %v2652_v18 = vadd.f32 %v11004_v9, %v13208_v11  ;;  %v2635_v30 = vadd.f32 %v10982_v4, %v13208_v11  ;;  %v10984_v46 = vadd.f32 %v2472_v58, %v13155_v39 }
 0x1ff   : > { %2772 = vst [vmem:[#allocation2 + $0xf1] sm:$0xff] %v2685_v25  ;;  %v2686_v13 = vmax.f32 %v2654_v50, 0.0  ;;  %v2669_v45 = vmax.f32 %v2637_v44, 0.0  ;;  %v2638_v55 = vadd.f32 %v10983_v6, %v13208_v11 }
 0x200   : > { %2770 = vst [vmem:[#allocation2 + $0xd9] sm:$0xff] %v2683_v10  ;;  %v2684_v12 = vmax.f32 %v2652_v18, 0.0  ;;  %v10046_v22 = vpop.f32.mrb[36].mxu1  ;;  %v2667_v37 = vmax.f32 %v2635_v30, 0.0  ;;  %v2636_v38 = vadd.f32 %v10984_v46, %v13208_v11 }
 0x201   : > { %2773 = vst [vmem:[#allocation2 + $0xf9] sm:$0xff] %v2686_v13  ;;  %v11006_v43 = vadd.f32 %v13181_v54, %v10046_v22  ;;  %v2549_v0 = vpop.f32.mrb[37].mxu1  ;;  %2756 = vst [vmem:[#allocation2 + $0x31] sm:$0xff] %v2669_v45  ;;  %v2670_v16 = vmax.f32 %v2638_v55, 0.0 }
 0x202   : > { %2771 = vst [vmem:[#allocation2 + $0xe1] sm:$0xff] %v2684_v12  ;;  %v11008_v56 = vadd.f32 %v13183_v1, %v2549_v0  ;;  %v10047_v3 = vpop.f32.mrb[38].mxu1  ;;  %2754 = vst [vmem:[#allocation2 + $0x19] sm:$0xff] %v2667_v37  ;;  %v2668_v39 = vmax.f32 %v2636_v38, 0.0  ;;  %v10030_v47 = vpop.f32.mrb[4].mxu0 }
 0x203   : > { %v2657_v31 = vadd.f32 %v11006_v43, %v13208_v11  ;;  %v11010_v26 = vadd.f32 %v13185_v41, %v10047_v3  ;;  %v2552_v27 = vpop.f32.mrb[39].mxu1  ;;  %2757 = vst [vmem:[#allocation2 + $0x39] sm:$0xff] %v2670_v16  ;;  %v10985_v32 = vadd.f32 %v10030_v47, %v13157_v61  ;;  %v2485_v42 = vpop.f32.mrb[5].mxu0 }
 0x204   : > { %v2655_v54 = vadd.f32 %v11008_v56, %v13208_v11  ;;  %v11012_v52 = vadd.f32 %v13187_v36, %v2552_v27  ;;  %2755 = vst [vmem:[#allocation2 + $0x21] sm:$0xff] %v2668_v39  ;;  %v10986_v1 = vadd.f32 %v2485_v42, %v13159_v19  ;;  %v10031_v33 = vpop.f32.mrb[6].mxu0 }
 0x205   : > { %v2689_v57 = vmax.f32 %v2657_v31, 0.0  ;;  %v2658_v40 = vadd.f32 %v11010_v26, %v13208_v11  ;;  %v2641_v23 = vadd.f32 %v10985_v32, %v13208_v11  ;;  %v10987_v41 = vadd.f32 %v10031_v33, %v13161_v7  ;;  %v2488_v53 = vpop.f32.mrb[7].mxu0 }
 0x206   : > { %v2687_v21 = vmax.f32 %v2655_v54, 0.0  ;;  %v2656_v61 = vadd.f32 %v11012_v52, %v13208_v11  ;;  %v2639_v9 = vadd.f32 %v10986_v1, %v13208_v11  ;;  %v10988_v36 = vadd.f32 %v2488_v53, %v13163_v49  ;;  %v13237_v44 = vld [vmem:[#allocation2 + $0xf0] sm:$0xff] }
 0x207   : > { %2776 = vst [vmem:[#allocation2 + $0x121] sm:$0xff] %v2689_v57  ;;  %v2690_v25 = vmax.f32 %v2658_v40, 0.0  ;;  %v2673_v4 = vmax.f32 %v2641_v23, 0.0  ;;  %v2642_v19 = vadd.f32 %v10987_v41, %v13208_v11 }
 0x208   : > { %2774 = vst [vmem:[#allocation2 + $0x109] sm:$0xff] %v2687_v21  ;;  %v2688_v51 = vmax.f32 %v2656_v61, 0.0  ;;  %v10050_v50 = vpop.f32.mrb[40].mxu1  ;;  %v13239_v10 = vld [vmem:[#allocation2 + $0xf8] sm:$0xff]  ;;  %v2671_v7 = vmax.f32 %v2639_v9, 0.0  ;;  %v2640_v6 = vadd.f32 %v10988_v36, %v13208_v11  ;;  %v13243_v30 = vld [vmem:[#allocation2 + $0x30] sm:$0xff] }
 0x209   : > { %2777 = vst [vmem:[#allocation2 + $0x129] sm:$0xff] %v2690_v25  ;;  %v11014_v58 = vadd.f32 %v13189_v8, %v10050_v50  ;;  %v2565_v18 = vpop.f32.mrb[41].mxu1  ;;  %v13245_v49 = vld [vmem:[#allocation2 + $0xe0] sm:$0xff]  ;;  %v13249_v13 = vpack.c.bf16 %v13239_v10, %v13237_v44  ;;  %2760 = vst [vmem:[#allocation2 + $0x61] sm:$0xff] %v2673_v4  ;;  %v2674_v46 = vmax.f32 %v2642_v19, 0.0  ;;  %v13252_v12 = vld [vmem:[#allocation2 + $0x18] sm:$0xff] }
 0x20a   : > { %2775 = vst [vmem:[#allocation2 + $0x111] sm:$0xff] %v2688_v51  ;;  %v11016_v45 = vadd.f32 %v13191_v2, %v2565_v18  ;;  %v10051_v55 = vpop.f32.mrb[42].mxu1  ;;  %v2930_v22 = vrot.slane %v13243_v30, 1  ;;  %2758 = vst [vmem:[#allocation2 + $0x49] sm:$0xff] %v2671_v7  ;;  %v2672_v8 = vmax.f32 %v2640_v6, 0.0  ;;  %v10034_v37 = vpop.f32.mrb[8].mxu0 }
 0x20b   : > { %15051 = vst [vmem:[#allocation21_spill] sm:$0xff] %v13249_v13  ;;  %v2661_v38 = vadd.f32 %v11014_v58, %v13208_v11  ;;  %v11018_v43 = vadd.f32 %v13193_v48, %v10051_v55  ;;  %v2568_v0 = vpop.f32.mrb[43].mxu1  ;;  %v2966_v16 = vrot.slane %v13245_v49, 1  ;;  %2761 = vst [vmem:[#allocation2 + $0x69] sm:$0xff] %v2674_v46  ;;  %v10989_v56 = vadd.f32 %v10034_v37, %v13165_v63  ;;  %v2501_v3 = vpop.f32.mrb[9].mxu0  ;;  %v13261_v47 = vld [vmem:[#allocation2 + $0x20] sm:$0xff] }
 0x20c   : > { %v2659_v2 = vadd.f32 %v11016_v45, %v13208_v11  ;;  %v11020_v39 = vadd.f32 %v13195_v20, %v2568_v0  ;;  %v2925_v31 = vrot.slane %v13252_v12, 1  ;;  %2759 = vst [vmem:[#allocation2 + $0x51] sm:$0xff] %v2672_v8  ;;  %v10990_v27 = vadd.f32 %v2501_v3, %v13167_v15  ;;  %v10035_v48 = vpop.f32.mrb[10].mxu0  ;;  %v13266_v42 = vld [vmem:[#allocation2 + $0x28] sm:$0x3]  ;;  %v13272_v33 = vld [vmem:[#allocation2 + $0x38] sm:$0xff] }
 0x20d   : > { %v2693_v26 = vmax.f32 %v2661_v38, 0.0  ;;  %v2662_v32 = vadd.f32 %v11018_v43, %v13208_v11  ;;  %v2926_v63 = vrot.slane %v13261_v47, 1  ;;  %v2645_v54 = vadd.f32 %v10989_v56, %v13208_v11  ;;  %v2504_v57 = vpop.f32.mrb[11].mxu0  ;;  %v13277_v41 = vld [vmem:[#allocation2 + $0x40] sm:$0x3]  ;;  %v11811_v38 = vld [vmem:[%s14919_s3 + $0x8] sm:$0xff]  }
 0x20e   : > { %v2691_v52 = vmax.f32 %v2659_v2, 0.0  ;;  %v10991_v20 = vadd.f32 %v10035_v48, %v13169_v34  ;;  %v2660_v1 = vadd.f32 %v11020_v39, %v13208_v11  ;;  %v2643_v15 = vadd.f32 %v10990_v27, %v13208_v11 }
 0x20f   : > { %2780 = vst [vmem:[#allocation2 + $0x151] sm:$0xff] %v2693_v26  ;;  %v2694_v40 = vmax.f32 %v2662_v32, 0.0  ;;  %v10992_v23 = vadd.f32 %v2504_v57, %v13171_v28  ;;  %v2927_v21 = vsel %vm450_vm1, %v2925_v31, %v2926_v63  ;;  %v2677_v53 = vmax.f32 %v2645_v54, 0.0 }
 0x210   : > { %2778 = vst [vmem:[#allocation2 + $0x139] sm:$0xff] %v2691_v52  ;;  %v2646_v61 = vadd.f32 %v10991_v20, %v13208_v11  ;;  %v2692_v34 = vmax.f32 %v2660_v1, 0.0  ;;  %v2928_v9 = vrot.slane %v13266_v42, 1  ;;  %v10054_v25 = vpop.f32.mrb[44].mxu1  ;;  %v2675_v36 = vmax.f32 %v2643_v15, 0.0  ;;  %v13318_v57 = vld [vmem:[#allocation2 + $0x60] sm:$0xff] }
 0x211   : > { %2781 = vst [vmem:[#allocation2 + $0x159] sm:$0xff] %v2694_v40  ;;  %v2644_v4 = vadd.f32 %v10992_v23, %v13208_v11  ;;  %v11022_v19 = vadd.f32 %v13197_v17, %v10054_v25  ;;  %v2931_v28 = vrot.slane %v13272_v33, 1  ;;  %v2581_v51 = vpop.f32.mrb[45].mxu1  ;;  %2764 = vst [vmem:[#allocation2 + $0x91] sm:$0xff] %v2677_v53  ;;  %v2933_v6 = vrot.slane %v13277_v41, 1  ;;  %v13298_v2 = vld [vmem:[#allocation2 + $0x48] sm:$0xff] }
 0x212   : > { %v2678_v50 = vmax.f32 %v2646_v61, 0.0  ;;  %2779 = vst [vmem:[#allocation2 + $0x141] sm:$0xff] %v2692_v34  ;;  %v2929_v7 = vsel %vm450_vm1, %v2926_v63, %v2928_v9  ;;  %v11024_v58 = vadd.f32 %v13199_v5, %v2581_v51  ;;  %v10055_v18 = vpop.f32.mrb[46].mxu1  ;;  %2762 = vst [vmem:[#allocation2 + $0x79] sm:$0xff] %v2675_v36  ;;  %v10038_v55 = vpop.f32.mrb[12].mxu0  ;;  %v11812_v1 = vld [vmem:[%s14919_s3 + $0x10] sm:$0xff]  }
 0x213   : > { %v2676_v46 = vmax.f32 %v2644_v4, 0.0  ;;  %v13287_v45 = vpack.c.bf16 %v2929_v7, %v2927_v21  ;;  %v2665_v17 = vadd.f32 %v11022_v19, %v13208_v11  ;;  %v2932_v8 = vsel %vm450_vm1, %v2930_v22, %v2931_v28  ;;  %v2584_v37 = vpop.f32.mrb[47].mxu1  ;;  %v2517_v0 = vpop.f32.mrb[13].mxu0  ;;  %v13305_v27 = vld [vmem:[#allocation2 + $0x50] sm:$0xff]  ;;  %v13311_v52 = vld [vmem:[#allocation2 + $0x58] sm:$0x3] }
 0x214   : > { %2765 = vst [vmem:[#allocation2 + $0x99] sm:$0xff] %v2678_v50  ;;  %v10993_v43 = vadd.f32 %v10038_v55, %v13173_v24  ;;  %v2934_v5 = vsel %vm450_vm1, %v2931_v28, %v2933_v6  ;;  %v2663_v56 = vadd.f32 %v11024_v58, %v13208_v11  ;;  %v11026_v3 = vadd.f32 %v13201_v35, %v10055_v18  ;;  %v10039_v26 = vpop.f32.mrb[14].mxu0  ;;  %v13327_v21 = vld [vmem:[#allocation2 + $0x70] sm:$0x3]  ;;  %v13333_v36 = vld [vmem:[#allocation2 + $0xd8] sm:$0xff] }
 0x215   : > { %15052 = vst [vmem:[#allocation22_spill] sm:$0xff] %v13287_v45  ;;  %2763 = vst [vmem:[#allocation2 + $0x81] sm:$0xff] %v2676_v46  ;;  %10073 = vmatmul.mubr.bf16.vlgmr.msra.gmra.mrb[48].mxu1 %v13287_v45  ;;  %v2697_v22 = vmax.f32 %v2665_v17, 0.0  ;;  %v13301_v39 = vpack.c.bf16 %v2934_v5, %v2932_v8  ;;  %v10994_v31 = vadd.f32 %v2517_v0, %v13175_v62  ;;  %v2520_v54 = vpop.f32.mrb[15].mxu0  ;;  %v2938_v9 = vrot.slane %v13311_v52, 1  ;;  %v11813_v0 = vld [vmem:[%s14919_s3 + $0x18] sm:$0xff]  }
 0x216   : > { %v11028_v24 = vadd.f32 %v13203_v59, %v2584_v37  ;;  %10105 = vmatpush3.bf16.msra.mxu1 %v13146_v29  ;;  %v2649_v48 = vadd.f32 %v10993_v43, %v13208_v11  ;;  %v2695_v35 = vmax.f32 %v2663_v56, 0.0  ;;  %v10995_v32 = vadd.f32 %v10039_v26, %v13177_v14  ;;  %v13320_v14 = vld [vmem:[#allocation2 + $0x68] sm:$0xff] }
 0x217   : > { %15053 = vst [vmem:[#allocation23_spill] sm:$0xff] %v13301_v39  ;;  %v2666_v63 = vadd.f32 %v11026_v3, %v13208_v11  ;;  %2784 = vst [vmem:[#allocation2 + $0x181] sm:$0xff] %v2697_v22  ;;  %10076 = vmatprep.mubr.bf16.mxu1 %v13301_v39  ;;  %v2647_v62 = vadd.f32 %v10994_v31, %v13208_v11  ;;  %v10996_v59 = vadd.f32 %v2520_v54, %v13179_v60  ;;  %v13444_v45 = vld [vmem:[#allocation2 + $0x138] sm:$0xff] }
 0x218   : > { %v2664_v20 = vadd.f32 %v11028_v24, %v13208_v11  ;;  %10106 = vmatprep.subr.bf16.mxu1 %v11811_v38  ;;  %v2935_v29 = vrot.slane %v13298_v2, 1  ;;  %v2681_v15 = vmax.f32 %v2649_v48, 0.0  ;;  %2782 = vst [vmem:[#allocation2 + $0x169] sm:$0xff] %v2695_v35  ;;  %v2650_v40 = vadd.f32 %v10995_v32, %v13208_v11  ;;  %v13331_v25 = vld [vmem:[#allocation2 + $0x90] sm:$0xff]  ;;  %v13370_v35 = vld [vmem:[#allocation2 + $0x100] sm:$0x3] }
 0x219   : > { %v2698_v23 = vmax.f32 %v2666_v63, 0.0  ;;  %v2936_v60 = vrot.slane %v13305_v27, 1  ;;  %v2679_v53 = vmax.f32 %v2647_v62, 0.0  ;;  %v2648_v61 = vadd.f32 %v10996_v59, %v13208_v11  ;;  %v13338_v50 = vld [vmem:[#allocation2 + $0x78] sm:$0xff]  ;;  %v13340_v11 = vld [vmem:[#allocation2 + $0xe8] sm:$0x3] }
 0x21a   : > { %v2696_v34 = vmax.f32 %v2664_v20, 0.0  ;;  %2768 = vst [vmem:[#allocation2 + $0xc1] sm:$0xff] %v2681_v15  ;;  %v2682_v4 = vmax.f32 %v2650_v40, 0.0  ;;  %10107 = vmatpush3.bf16.msra.mxu1 %v11811_v38  ;;  %v2940_v28 = vrot.slane %v13318_v57, 1  ;;  %v2941_v51 = vrot.slane %v13320_v14, 1  ;;  %v11814_v59 = vld [vmem:[%s14919_s3 + $0x20] sm:$0xff]  }
 0x21b   : > { %2785 = vst [vmem:[#allocation2 + $0x189] sm:$0xff] %v2698_v23  ;;  %v2937_v19 = vsel %vm450_vm1, %v2935_v29, %v2936_v60  ;;  %2766 = vst [vmem:[#allocation2 + $0xa9] sm:$0xff] %v2679_v53  ;;  %v2680_v7 = vmax.f32 %v2648_v61, 0.0  ;;  %v2939_v6 = vsel %vm450_vm1, %v2936_v60, %v2938_v9  ;;  %v2943_v58 = vrot.slane %v13327_v21, 1  ;;  %10108 = vmatprep.subr.bf16.mxu1 %v11812_v1  ;;  %v13345_v46 = vld [vmem:[#allocation2 + $0x98] sm:$0xff]  ;;  %v13379_v20 = vld [vmem:[#allocation2 + $0x110] sm:$0xff] }
 0x21c   : > { %2783 = vst [vmem:[#allocation2 + $0x171] sm:$0xff] %v2696_v34  ;;  %v2945_v18 = vrot.slane %v13338_v50, 1  ;;  %v13347_v55 = vld [vmem:[#allocation2 + $0xa0] sm:$0x3]  ;;  %2769 = vst [vmem:[#allocation2 + $0xc9] sm:$0xff] %v2682_v4  ;;  %v13349_v17 = vpack.c.bf16 %v2939_v6, %v2937_v19  ;;  %v2942_v8 = vsel %vm450_vm1, %v2940_v28, %v2941_v51  ;;  %v2950_v43 = vrot.slane %v13331_v25, 1 }
 0x21d   : > { %v13352_v37 = vld [vmem:[#allocation2 + $0x80] sm:$0xff]  ;;  %v13354_v38 = vld [vmem:[#allocation2 + $0x88] sm:$0x3]  ;;  %v2951_v5 = vrot.slane %v13345_v46, 1  ;;  %2767 = vst [vmem:[#allocation2 + $0xb1] sm:$0xff] %v2680_v7  ;;  %v2944_v56 = vsel %vm450_vm1, %v2941_v51, %v2943_v58  ;;  %v2953_v31 = vrot.slane %v13347_v55, 1 }
 0x21e   : > { %15054 = vst [vmem:[#allocation24_spill] sm:$0xff] %v13349_v17  ;;  %v2946_v3 = vrot.slane %v13352_v37, 1  ;;  %v2948_v22 = vrot.slane %v13354_v38, 1  ;;  %10077 = vmatmul.mubr.bf16.gmra.mrb[52].mxu1 %v13349_v17  ;;  %v13366_v26 = vpack.c.bf16 %v2944_v56, %v2942_v8  ;;  %v2965_v24 = vrot.slane %v13333_v36, 1  ;;  %v13381_v29 = vld [vmem:[#allocation2 + $0x118] sm:$0x3] }
 0x21f   : > { %v2968_v48 = vrot.slane %v13340_v11, 1  ;;  %10109 = vmatpush3.bf16.msra.mxu1 %v11812_v1  ;;  %v2952_v54 = vsel %vm450_vm1, %v2950_v43, %v2951_v5  ;;  %v2954_v62 = vsel %vm450_vm1, %v2951_v5, %v2953_v31  ;;  %15056 = vst [vmem:[#allocation27_spill] sm:$0xff] %v13381_v29  ;;  %v2971_v40 = vrot.slane %v13239_v10, 1  ;;  %v13391_v23 = vld [vmem:[#allocation2 + $0x108] sm:$0xff]  ;;  %v13393_v60 = vld [vmem:[#allocation2 + $0x120] sm:$0xff]  ;;  %v13446_v13 = vld [vmem:[#allocation2 + $0x158] sm:$0xff] }
 0x220   : > { %15055 = vst [vmem:[#allocation25_spill] sm:$0xff] %v13366_v26  ;;  %v2947_v32 = vsel %vm450_vm1, %v2945_v18, %v2946_v3  ;;  %v2949_v63 = vsel %vm450_vm1, %v2946_v3, %v2948_v22  ;;  %10080 = vmatprep.mubr.bf16.mxu1 %v13366_v26  ;;  %10110 = vmatprep.subr.bf16.mxu1 %v11813_v0  ;;  %v13395_v53 = vld [vmem:[#allocation2 + $0x128] sm:$0xff]  ;;  %v2970_v61 = vrot.slane %v13237_v44, 1  ;;  %v2973_v34 = vrot.slane %v13370_v35, 1  ;;  %v13399_v9 = vld [vmem:[#allocation2 + $0x130] sm:$0x3] }
 0x221   : > { %v2967_v15 = vsel %vm450_vm1, %v2965_v24, %v2966_v16  ;;  %v2969_v1 = vsel %vm450_vm1, %v2966_v16, %v2968_v48  ;;  %15057 = vst [vmem:[#allocation28_spill] sm:$0xff] %v13399_v9  ;;  %v13401_v4 = vpack.c.bf16 %v2949_v63, %v2947_v32  ;;  %v13403_v19 = vpack.c.bf16 %v2954_v62, %v2952_v54  ;;  %v13407_v16 = vld [vmem:[#allocation2 + $0xc0] sm:$0xff]  ;;  %v11815_v51 = vld [vmem:[%s14919_s3 + $0x28] sm:$0xff]  }
 0x222   : > { %v13405_v28 = vld [vmem:[#allocation2 + $0xa8] sm:$0xff]  ;;  %v2976_v7 = vrot.slane %v13379_v20, 1  ;;  %v2978_v6 = vrot.slane %v13381_v29, 1  ;;  %v13418_v8 = vpack.c.bf16 %v2969_v1, %v2967_v15  ;;  %v2975_v43 = vrot.slane %v13391_v23, 1  ;;  %v13423_v3 = vld [vmem:[#allocation2 + $0x140] sm:$0xff] }
 0x223   : > { %15058 = vst [vmem:[#allocation8_spill] sm:$0xff] %v13401_v4  ;;  %15059 = vst [vmem:[#allocation7_spill] sm:$0xff] %v13403_v19  ;;  %10111 = vmatpush3.bf16.msra.mxu1 %v11813_v0  ;;  %v13414_v58 = vld [vmem:[#allocation2 + $0xc8] sm:$0xff]  ;;  %v13416_v18 = vld [vmem:[#allocation2 + $0xd0] sm:$0x3]  ;;  %v2980_v5 = vrot.slane %v13393_v60, 1  ;;  %v2972_v48 = vsel %vm450_vm1, %v2970_v61, %v2971_v40  ;;  %v2974_v26 = vsel %vm450_vm1, %v2971_v40, %v2973_v34 }
 0x224   : > { %v2981_v56 = vrot.slane %v13395_v53, 1  ;;  %v13425_v22 = vld [vmem:[#allocation2 + $0xb0] sm:$0xff]  ;;  %v13427_v31 = vld [vmem:[#allocation2 + $0xb8] sm:$0x3]  ;;  %v2961_v0 = vrot.slane %v13414_v58, 1  ;;  %v2963_v24 = vrot.slane %v13416_v18, 1  ;;  %10112 = vmatprep.subr.bf16.mxu1 %v11814_v59  ;;  %v2977_v17 = vsel %vm450_vm1, %v2975_v43, %v2976_v7 }
 0x225   : > { %v2983_v32 = vrot.slane %v13399_v9, 1  ;;  %v2955_v63 = vrot.slane %v13405_v28, 1  ;;  %v2956_v54 = vrot.slane %v13425_v22, 1  ;;  %v2958_v62 = vrot.slane %v13427_v31, 1  ;;  %v13437_v1 = vld [vmem:[#allocation2 + $0x148] sm:$0x3] }
 0x226   : > { %v2960_v15 = vrot.slane %v13407_v16, 1  ;;  %10081 = vmatmul.mubr.bf16.gmra.mrb[56].mxu1 %v13401_v4  ;;  %v2979_v61 = vsel %vm450_vm1, %v2976_v7, %v2978_v6  ;;  %v2982_v39 = vsel %vm450_vm1, %v2980_v5, %v2981_v56  ;;  %v13448_v9 = vld [vmem:[#allocation2 + $0x160] sm:$0x3]  ;;  %v13454_v34 = vld [vmem:[#allocation2 + $0x150] sm:$0xff]  ;;  %v2964_v7 = vsel %vm450_vm1, %v2961_v0, %v2963_v24 }
 0x227   : > { %10084 = vmatprep.mubr.bf16.mxu1 %v13403_v19  ;;  %v2957_v29 = vsel %vm450_vm1, %v2955_v63, %v2956_v54  ;;  %v2959_v4 = vsel %vm450_vm1, %v2956_v54, %v2958_v62  ;;  %10113 = vmatpush3.bf16.msra.mxu1 %v11814_v59  ;;  %v2984_v6 = vsel %vm450_vm1, %v2981_v56, %v2983_v32  ;;  %v11816_v43 = vld [vmem:[%s14919_s3 + $0x30] sm:$0xff]   ;;  %v2986_v5 = vrot.slane %v13423_v3, 1 }
 0x228   : > { %v2962_v40 = vsel %vm450_vm1, %v2960_v15, %v2961_v0  ;;  %10114 = vmatprep.subr.bf16.mxu1 %v11815_v51  ;;  %v2988_v63 = vrot.slane %v13437_v1, 1  ;;  %v13463_v19 = vpack.c.bf16 %v2974_v26, %v2972_v48  ;;  %v2985_v54 = vrot.slane %v13444_v45, 1 }
 0x229   : > { %v2991_v59 = vrot.slane %v13446_v13, 1  ;;  %v2993_v62 = vrot.slane %v13448_v9, 1  ;;  %v13468_v0 = vpack.c.bf16 %v2959_v4, %v2957_v29  ;;  %v13470_v24 = vpack.c.bf16 %v2979_v61, %v2977_v17 }
 0x22a   : > { %v2990_v56 = vrot.slane %v13454_v34, 1  ;;  %v13475_v32 = vpack.c.bf16 %v13261_v47, %v13252_v12  ;;  %v13477_v15 = vpack.c.bf16 %v2964_v7, %v2962_v40  ;;  %v13479_v26 = vpack.c.bf16 %v2984_v6, %v2982_v39  ;;  %v11817_v39 = vld [vmem:[%s14919_s3 + $0x38] sm:$0xff]  }
 0x22b   : > { %15060 = vst [vmem:[#allocation9_spill] sm:$0xff] %v13468_v0  ;;  %10115 = vmatpush3.bf16.msra.mxu1 %v11815_v51  ;;  %v13483_v48 = vpack.c.bf16 %v13272_v33, %v13243_v30  ;;  %v13487_v29 = vpack.c.bf16 %v13305_v27, %v13298_v2  ;;  %v2987_v17 = vsel %vm450_vm1, %v2985_v54, %v2986_v5  ;;  %v13495_v51 = vld [vmem:[#allocation2 + $0x170] sm:$0xff]  ;;  %v13515_v54 = vld [vmem:[#allocation2 + $0x168] sm:$0xff] }
 0x22c   : > { %15061 = vst [vmem:[#allocation11_spill] sm:$0xff] %v13477_v15  ;;  %10116 = vmatprep.subr.bf16.mxu1 %v11816_v43  ;;  %v2989_v4 = vsel %vm450_vm1, %v2986_v5, %v2988_v63  ;;  %v2992_v61 = vsel %vm450_vm1, %v2990_v56, %v2991_v59  ;;  %v13499_v40 = vpack.c.bf16 %v13320_v14, %v13318_v57 }
 0x22d   : > { %15062 = vst [vmem:[#allocation10_spill] sm:$0xff] %v13487_v29  ;;  %v2994_v7 = vsel %vm450_vm1, %v2991_v59, %v2993_v62  ;;  %v13504_v6 = vpack.c.bf16 %v13352_v37, %v13338_v50  ;;  %v13508_v5 = vpack.c.bf16 %v13345_v46, %v13331_v25  ;;  %v13512_v63 = vpack.c.bf16 %v13425_v22, %v13405_v28 }
 0x22e   : > { %15063 = vst [vmem:[#allocation12_spill] sm:$0xff] %v13499_v40  ;;  %10085 = vmatmul.mubr.bf16.gmra.mrb[60].mxu1 %v13468_v0  ;;  %v13519_v56 = vpack.c.bf16 %v13414_v58, %v13407_v16  ;;  %v13523_v59 = vpack.c.bf16 %v13245_v49, %v13333_v36  ;;  %v13527_v62 = vpack.c.bf16 %v13379_v20, %v13391_v23  ;;  %v13534_v0 = vld [vmem:[#allocation2 + $0x178] sm:$0x3] }
 0x22f   : > { %15064 = vst [vmem:[#allocation14_spill] sm:$0xff] %v13504_v6  ;;  %15065 = vst [vmem:[#allocation17_spill] sm:$0xff] %v13508_v5  ;;  %v13531_v5 = vpack.c.bf16 %v13395_v53, %v13393_v60  ;;  %10088 = vmatprep.mubr.bf16.mxu1 %v13477_v15  ;;  %10117 = vmatpush3.bf16.msra.mxu1 %v11816_v43  ;;  %v13553_v43 = vld [vmem:[%s14919_s3 + $0x80] sm:$0xff]   ;;  %v3488_v15 = vrot.slane %v13252_v12, 2  ;;  %v3493_v6 = vrot.slane %v13243_v30, 2  ;;  %v2998_v40 = vrot.slane %v13534_v0, 1 }
 0x230   : > { %15066 = vst [vmem:[#allocation15_spill] sm:$0xff] %v13512_v63  ;;  %15067 = vst [vmem:[#allocation13_spill] sm:$0xff] %v13519_v56  ;;  %v13538_v56 = vpack.c.bf16 %v13423_v3, %v13444_v45  ;;  %v13548_v63 = vpack.c.bf16 %v2989_v4, %v2987_v17  ;;  %10118 = vmatprep.subr.bf16.mxu1 %v11817_v39  ;;  %v3496_v17 = vrot.slane %v13277_v41, 2  ;;  %v3498_v30 = vrot.slane %v13298_v2, 2 }
 0x231   : > { %15068 = vst [vmem:[#allocation16_spill] sm:$0xff] %v13523_v59  ;;  %15069 = vst [vmem:[#allocation18_spill] sm:$0xff] %v13527_v62  ;;  %v13542_v59 = vpack.c.bf16 %v13446_v13, %v13454_v34  ;;  %v13546_v62 = vpack.c.bf16 %v13495_v51, %v13515_v54  ;;  %v13562_v4 = vpack.c.bf16 %v2994_v7, %v2992_v61  ;;  %v3499_v41 = vrot.slane %v13305_v27, 2 }
 0x232   : > { %15070 = vst [vmem:[#allocation19_spill] sm:$0xff] %v13531_v5  ;;  %15071 = vst [vmem:[#allocation20_spill] sm:$0xff] %v13538_v56  ;;  %v3489_v56 = vrot.slane %v13261_v47, 2  ;;  %v3491_v5 = vrot.slane %v13266_v42, 2  ;;  %v3501_v61 = vrot.slane %v13311_v52, 2  ;;  %v3508_v7 = vrot.slane %v13338_v50, 2 }
 0x233   : > { %15072 = vst [vmem:[#allocation26_spill] sm:$0xff] %v13542_v59  ;;  %15073 = vst [vmem:[#allocation29_spill] sm:$0xff] %v13546_v62  ;;  %v3494_v62 = vrot.slane %v13272_v33, 2  ;;  %10119 = vmatpush3.bf16.msra.mxu1 %v11817_v39  ;;  %v3504_v39 = vrot.slane %v13320_v14, 2  ;;  %v3500_v2 = vsel %vm1007_vm3, %v3498_v30, %v3499_v41  ;;  %v3511_v27 = vrot.slane %v13354_v38, 2 }
 0x234   : > { %v3490_v29 = vsel %vm1007_vm3, %v3488_v15, %v3489_v56  ;;  %v3492_v12 = vsel %vm1007_vm3, %v3489_v56, %v3491_v5  ;;  %10152 = vmatprep.subr.bf16.mxu1 %v13553_v43  ;;  %v3503_v15 = vrot.slane %v13318_v57, 2  ;;  %v3502_v5 = vsel %vm1007_vm3, %v3499_v41, %v3501_v61 }
 0x235   : > { %v13567_v47 = vpack.c.bf16 %v3492_v12, %v3490_v29  ;;  %v3495_v42 = vsel %vm1007_vm3, %v3493_v6, %v3494_v62  ;;  %v3497_v59 = vsel %vm1007_vm3, %v3494_v62, %v3496_v17  ;;  %v3506_v29 = vrot.slane %v13327_v21, 2 }
 0x236   : > { %v13573_v33 = vpack.c.bf16 %v3497_v59, %v3495_v42  ;;  %v3509_v6 = vrot.slane %v13352_v37, 2  ;;  %10089 = vmatmul.mubr.bf16.gmra.mrb[64].mxu1 %v13418_v8  ;;  %v3513_v52 = vrot.slane %v13331_v25, 2  ;;  %v13588_v57 = vpack.c.bf16 %v3502_v5, %v3500_v2 }
 0x237   : > { %10092 = vmatprep.mubr.bf16.mxu1 %v13463_v19  ;;  %v3505_v14 = vsel %vm1007_vm3, %v3503_v15, %v3504_v39  ;;  %v3507_v21 = vsel %vm1007_vm3, %v3504_v39, %v3506_v29  ;;  %v3514_v59 = vrot.slane %v13345_v46, 2  ;;  %v3516_v38 = vrot.slane %v13347_v55, 2 }
 0x238   : > { %v3510_v50 = vsel %vm1007_vm3, %v3508_v7, %v3509_v6  ;;  %v13593_v37 = vpack.c.bf16 %v3507_v21, %v3505_v14  ;;  %v3512_v56 = vsel %vm1007_vm3, %v3509_v6, %v3511_v27  ;;  %v3518_v25 = vrot.slane %v13405_v28, 2  ;;  %v15074_v27 = vld [vmem:[#allocation27_spill] sm:$0xff] }
 0x239   : > { %v13598_v62 = vpack.c.bf16 %v3512_v56, %v3510_v50  ;;  %v3519_v17 = vrot.slane %v13425_v22, 2  ;;  %v3521_v12 = vrot.slane %v13427_v31, 2  ;;  %v3515_v42 = vsel %vm1007_vm3, %v3513_v52, %v3514_v59 }
 0x23a   : > { %v3517_v30 = vsel %vm1007_vm3, %v3514_v59, %v3516_v38  ;;  %v3523_v41 = vrot.slane %v13407_v16, 2  ;;  %v3524_v61 = vrot.slane %v13414_v58, 2  ;;  %v3526_v28 = vrot.slane %v13416_v18, 2  ;;  %v15075_v59 = vld [vmem:[#allocation28_spill] sm:$0xff] }
 0x23b   : > { %v13607_v15 = vpack.c.bf16 %v3517_v30, %v3515_v42  ;;  %v3520_v46 = vsel %vm1007_vm3, %v3518_v25, %v3519_v17  ;;  %v3522_v55 = vsel %vm1007_vm3, %v3519_v17, %v3521_v12  ;;  %v3528_v31 = vrot.slane %v13333_v36, 2 }
 0x23c   : > { %v13612_v39 = vpack.c.bf16 %v3522_v55, %v3520_v46  ;;  %v3525_v22 = vsel %vm1007_vm3, %v3523_v41, %v3524_v61  ;;  %v3529_v29 = vrot.slane %v13245_v49, 2  ;;  %v3527_v16 = vsel %vm1007_vm3, %v3524_v61, %v3526_v28 }
 0x23d   : > { %v3531_v58 = vrot.slane %v13340_v11, 2  ;;  %v3533_v7 = vrot.slane %v13237_v44, 2  ;;  %v3534_v6 = vrot.slane %v13239_v10, 2  ;;  %v13622_v2 = vpack.c.bf16 %v3527_v16, %v3525_v22  ;;  %v13660_v22 = vld [vmem:[#allocation2 + $0x180] sm:$0xff] }
 0x23e   : > { %10093 = vmatmul.mubr.bf16.gmra.mrb[68].mxu1 %v13470_v24  ;;  %v3530_v18 = vsel %vm1007_vm3, %v3528_v31, %v3529_v29  ;;  %v3536_v5 = vrot.slane %v13370_v35, 2  ;;  %v3538_v36 = vrot.slane %v13391_v23, 2  ;;  %v3539_v44 = vrot.slane %v13379_v20, 2  ;;  %v13668_v31 = vld [vmem:[#allocation2 + $0x190] sm:$0x3] }
 0x23f   : > { %10096 = vmatprep.mubr.bf16.mxu1 %v13479_v26  ;;  %v3532_v49 = vsel %vm1007_vm3, %v3529_v29, %v3531_v58  ;;  %v3535_v11 = vsel %vm1007_vm3, %v3533_v7, %v3534_v6  ;;  %v3541_v10 = vrot.slane %v15074_v27, 2  ;;  %v3543_v21 = vrot.slane %v13393_v60, 2 }
 0x240   : > { %v13632_v52 = vpack.c.bf16 %v3532_v49, %v3530_v18  ;;  %v3537_v14 = vsel %vm1007_vm3, %v3534_v6, %v3536_v5  ;;  %v3544_v35 = vrot.slane %v13395_v53, 2  ;;  %v3540_v23 = vsel %vm1007_vm3, %v3538_v36, %v3539_v44 }
 0x241   : > { %v13637_v50 = vpack.c.bf16 %v3537_v14, %v3535_v11  ;;  %v3542_v56 = vsel %vm1007_vm3, %v3539_v44, %v3541_v10  ;;  %v3546_v38 = vrot.slane %v15075_v59, 2  ;;  %v3548_v17 = vrot.slane %v13444_v45, 2  ;;  %v13690_v10 = vld [vmem:[#allocation2] sm:$0xff]  ;;  %v15079_v59 = vld [vmem:[#allocation12_spill] sm:$0xff] }
 0x242   : > { %v13642_v25 = vpack.c.bf16 %v3542_v56, %v3540_v23  ;;  %v3545_v20 = vsel %vm1007_vm3, %v3543_v21, %v3544_v35  ;;  %v3549_v12 = vrot.slane %v13423_v3, 2  ;;  %v3551_v53 = vrot.slane %v13437_v1, 2  ;;  %v15078_v56 = vld [vmem:[#allocation10_spill] sm:$0xff] }
 0x243   : > { %v3547_v60 = vsel %vm1007_vm3, %v3544_v35, %v3546_v38  ;;  %v3553_v42 = vrot.slane %v13454_v34, 2  ;;  %v3554_v30 = vrot.slane %v13446_v13, 2  ;;  %v3556_v46 = vrot.slane %v13448_v9, 2  ;;  %v13662_v34 = vld [vmem:[#allocation2 + $0x188] sm:$0xff] }
 0x244   : > { %v13651_v41 = vpack.c.bf16 %v3547_v60, %v3545_v20  ;;  %v3550_v61 = vsel %vm1007_vm3, %v3548_v17, %v3549_v12  ;;  %v3558_v55 = vrot.slane %v13515_v54, 2  ;;  %v3552_v45 = vsel %vm1007_vm3, %v3549_v12, %v3551_v53  ;;  %v11823_v38 = vld [vmem:[%s14919_s3 + $0xa8] sm:$0xff]   ;;  %v15080_v20 = vld [vmem:[#allocation14_spill] sm:$0xff]  ;;  %v15081_v17 = vld [vmem:[#allocation17_spill] sm:$0xff] }
 0x245   : > { %v3555_v3 = vsel %vm1007_vm3, %v3553_v42, %v3554_v30  ;;  %v3559_v28 = vrot.slane %v13495_v51, 2  ;;  %v3561_v1 = vrot.slane %v13534_v0, 2  ;;  %v13665_v13 = vpack.c.bf16 %v3552_v45, %v3550_v61  ;;  %v11819_v0 = vld [vmem:[%s14919_s3 + $0x88] sm:$0xff]   ;;  %v11824_v12 = vld [vmem:[%s14919_s3 + $0xb0] sm:$0xff]   ;;  %v11825_v60 = vld [vmem:[%s14919_s3 + $0xb8] sm:$0xff]  }
 0x246   : > { %10097 = vmatmul.mubr.bf16.gmra.mrb[72].mxu1 %v13548_v63  ;;  %v3557_v9 = vsel %vm1007_vm3, %v3554_v30, %v3556_v46  ;;  %v2995_v29 = vrot.slane %v13515_v54, 1  ;;  %v4397_v18 = vrot.slane %v13660_v22, 2  ;;  %v4398_v5 = vrot.slane %v13662_v34, 2  ;;  %v15082_v53 = vld [vmem:[#allocation15_spill] sm:$0xff]  ;;  %v15083_v42 = vld [vmem:[#allocation13_spill] sm:$0xff]  ;;  %v15084_v61 = vld [vmem:[#allocation16_spill] sm:$0xff] }
 0x247   : > { %10100 = vmatprep.mubr.bf16.mxu1 %v13562_v4  ;;  %v13672_v16 = vpack.c.bf16 %v3557_v9, %v3555_v3  ;;  %v3560_v58 = vsel %vm1007_vm3, %v3558_v55, %v3559_v28  ;;  %v3562_v7 = vsel %vm1007_vm3, %v3559_v28, %v3561_v1  ;;  %v15076_v36 = vrot.slane %v13495_v51, 1  ;;  %v11820_v51 = vld [vmem:[%s14919_s3 + $0x90] sm:$0xff]   ;;  %v11826_v30 = vld [vmem:[%s14919_s3 + $0xc0] sm:$0xff]  }
 0x248   : > { %v13676_v6 = vpack.c.bf16 %v3562_v7, %v3560_v58  ;;  %v4400_v44 = vrot.slane %v13668_v31, 2  ;;  %v4399_v27 = vsel %vm1007_vm3, %v4397_v18, %v4398_v5  ;;  %v13694_v14 = vpack.c.bf16 %v13690_v10, %v13690_v10  ;;  %v15085_v46 = vld [vmem:[#allocation21_spill] sm:$0xff]  ;;  %v15086_v55 = vld [vmem:[#allocation18_spill] sm:$0xff]  ;;  %v15087_v45 = vld [vmem:[#allocation19_spill] sm:$0xff] }
 0x249   : > { %v2997_v49 = vsel %vm450_vm1, %v2995_v29, %v15076_v36  ;;  %v15077_v54 = vmov %v15076_v36  ;;  %v13741_v3 = vrot.slane %v13690_v10, 2  ;;  %v11947_v28 = vld [vmem:[#allocation2 + $0x10] sm:$0x3]  ;;  %v15089_v29 = vld [vmem:[#allocation26_spill] sm:$0xff]  ;;  %v15090_v18 = vld [vmem:[#allocation29_spill] sm:$0xff] }
 0x24a   : > { %v2999_v11 = vsel %vm450_vm1, %v15077_v54, %v2998_v40  ;;  %v4401_v21 = vsel %vm1007_vm3, %v4398_v5, %v4400_v44  ;;  %v11821_v40 = vld [vmem:[%s14919_s3 + $0x98] sm:$0xff]   ;;  %v3486_v1 = vrot.slane %v11947_v28, 2  ;;  %v15088_v9 = vld [vmem:[#allocation20_spill] sm:$0xff]  ;;  %v11830_v54 = vld [vmem:[%s14919_s3 + $0xe0] sm:$0xff]  }
 0x24b   : > { %v13697_v35 = vpack.c.bf16 %v2999_v11, %v2997_v49  ;;  %v13699_v23 = vpack.c.bf16 %v4401_v21, %v4399_v27  ;;  %v11827_v5 = vld [vmem:[%s14919_s3 + $0xc8] sm:$0xff]   ;;  %v11828_v36 = vld [vmem:[%s14919_s3 + $0xd0] sm:$0xff]   ;;  %v11829_v49 = vld [vmem:[%s14919_s3 + $0xd8] sm:$0xff]  }
 0x24c   : > { %v3487_v58 = vsel %vm1007_vm3, %v13741_v3, %v3486_v1  ;;  %v11831_v11 = vld [vmem:[%s14919_s3 + $0xe8] sm:$0xff]   ;;  %v11832_v44 = vld [vmem:[%s14919_s3 + $0xf0] sm:$0xff]   ;;  %v11833_v27 = vld [vmem:[%s14919_s3 + $0xf8] sm:$0xff]  }
 0x24d   : > { %v3595_v7 = vpack.c.bf16 %v3487_v58, %v13741_v3  ;;  %v11834_v21 = vld [vmem:[%s14919_s3 + $0x100] sm:$0xff]   ;;  %v11843_v1 = vld [vmem:[%s14919_s3 + $0x148] sm:$0xff]  }
 0x24e   : > { %10101 = vmatmul.mubr.bf16.gmra.mrb[76].mxu1 %v13697_v35  ;;  %v15091_v28 = vld [vmem:[#allocation22_spill] sm:$0xff]  ;;  %v15092_v58 = vld [vmem:[#allocation23_spill] sm:$0xff] }
 0x24f   : > { %10120 = vmatprep.mubr.bf16.mxu1 %v13694_v14 }
 0x256   : > { %10121 = vmatmul.mubr.bf16.vlgmr.msra.gmra.mrb[48].mxu1 %v13475_v32 }
 0x257   : > { %10153 = vmatpush3.bf16.msra.mxu1 %v13553_v43  ;;  %10124 = vmatprep.mubr.bf16.mxu1 %v13483_v48  ;;  %v11822_v43 = vld [vmem:[%s14919_s3 + $0xa0] sm:$0xff]  }
 0x258   : > { %10154 = vmatprep.subr.bf16.mxu1 %v11819_v0 }
 0x25b   : > { %10155 = vmatpush3.bf16.msra.mxu1 %v11819_v0  ;;  %v11835_v0 = vld [vmem:[%s14919_s3 + $0x108] sm:$0xff]  }
 0x25c   : > { %10156 = vmatprep.subr.bf16.mxu1 %v11820_v51 }
 0x25e   : > { %10125 = vmatmul.mubr.bf16.gmra.mrb[52].mxu1 %v15078_v56 }
 0x25f   : > { %10128 = vmatprep.mubr.bf16.mxu1 %v15079_v59  ;;  %10157 = vmatpush3.bf16.msra.mxu1 %v11820_v51  ;;  %v11836_v51 = vld [vmem:[%s14919_s3 + $0x110] sm:$0xff]  }
 0x260   : > { %10158 = vmatprep.subr.bf16.mxu1 %v11821_v40 }
 0x263   : > { %10159 = vmatpush3.bf16.msra.mxu1 %v11821_v40  ;;  %v11838_v40 = vld [vmem:[%s14919_s3 + $0x120] sm:$0xff]  }
 0x264   : > { %10160 = vmatprep.subr.bf16.mxu1 %v11822_v43 }
 0x266   : > { %10129 = vmatmul.mubr.bf16.gmra.mrb[56].mxu1 %v15080_v20 }
 0x267   : > { %10132 = vmatprep.mubr.bf16.mxu1 %v15081_v17  ;;  %10161 = vmatpush3.bf16.msra.mxu1 %v11822_v43  ;;  %v11839_v43 = vld [vmem:[%s14919_s3 + $0x128] sm:$0xff]  }
 0x268   : > { %10162 = vmatprep.subr.bf16.mxu1 %v11823_v38 }
 0x26b   : > { %10163 = vmatpush3.bf16.msra.mxu1 %v11823_v38  ;;  %v11840_v38 = vld [vmem:[%s14919_s3 + $0x130] sm:$0xff]  }
 0x26c   : > { %10164 = vmatprep.subr.bf16.mxu1 %v11824_v12 }
 0x26e   : > { %10133 = vmatmul.mubr.bf16.gmra.mrb[60].mxu1 %v15082_v53 }
 0x26f   : > { %10136 = vmatprep.mubr.bf16.mxu1 %v15083_v42  ;;  %10165 = vmatpush3.bf16.msra.mxu1 %v11824_v12  ;;  %v11841_v12 = vld [vmem:[%s14919_s3 + $0x138] sm:$0xff]  }
 0x270   : > { %10166 = vmatprep.subr.bf16.mxu1 %v11825_v60 }
 0x273   : > { %10167 = vmatpush3.bf16.msra.mxu1 %v11825_v60  ;;  %v11842_v60 = vld [vmem:[%s14919_s3 + $0x140] sm:$0xff]  }
 0x274   : > { %10200 = vmatprep.subr.bf16.mxu1 %v11826_v30 }
 0x276   : > { %10137 = vmatmul.mubr.bf16.gmra.mrb[64].mxu1 %v15084_v61 }
 0x277   : > { %10140 = vmatprep.mubr.bf16.mxu1 %v15085_v46 }
 0x27e   : > { %10141 = vmatmul.mubr.bf16.gmra.mrb[68].mxu1 %v15086_v55 }
 0x27f   : > { %10144 = vmatprep.mubr.bf16.mxu1 %v15087_v45 }
 0x286   : > { %10145 = vmatmul.mubr.bf16.gmra.mrb[72].mxu1 %v15088_v9 }
 0x287   : > { %10148 = vmatprep.mubr.bf16.mxu1 %v15089_v29 }
 0x28e   : > { %10149 = vmatmul.mubr.bf16.gmra.mrb[76].mxu1 %v15090_v18 }
 0x28f   : > { %10168 = vmatprep.mubr.bf16.mxu1 %v3595_v7  ;;  %v15093_v7 = vld [vmem:[#allocation24_spill] sm:$0xff] }
 0x296   : > { %10169 = vmatmul.mubr.bf16.vlgmr.msra.gmra.mrb[48].mxu1 %v13567_v47 }
 0x297   : > { %10201 = vmatpush3.bf16.msra.mxu1 %v11826_v30  ;;  %10172 = vmatprep.mubr.bf16.mxu1 %v13573_v33  ;;  %v13829_v30 = vpack.c.bf16 %v13662_v34, %v13660_v22 }
 0x298   : > { %10202 = vmatprep.subr.bf16.mxu1 %v11827_v5 }
 0x29b   : > { %10203 = vmatpush3.bf16.msra.mxu1 %v11827_v5  ;;  %v11844_v5 = vld [vmem:[%s14919_s3 + $0x150] sm:$0xff]  }
 0x29c   : > { %10204 = vmatprep.subr.bf16.mxu1 %v11828_v36 }
 0x29e   : > { %10173 = vmatmul.mubr.bf16.gmra.mrb[52].mxu1 %v13588_v57 }
 0x29f   : > { %10176 = vmatprep.mubr.bf16.mxu1 %v13593_v37  ;;  %10205 = vmatpush3.bf16.msra.mxu1 %v11828_v36  ;;  %v11845_v36 = vld [vmem:[%s14919_s3 + $0x158] sm:$0xff]  }
 0x2a0   : > { %10206 = vmatprep.subr.bf16.mxu1 %v11829_v49 }
 0x2a3   : > { %10207 = vmatpush3.bf16.msra.mxu1 %v11829_v49  ;;  %v15094_v49 = vld [vmem:[#allocation25_spill] sm:$0xff] }
 0x2a4   : > { %10208 = vmatprep.subr.bf16.mxu1 %v11830_v54 }
 0x2a6   : > { %10177 = vmatmul.mubr.bf16.gmra.mrb[56].mxu1 %v13598_v62 }
 0x2a7   : > { %10180 = vmatprep.mubr.bf16.mxu1 %v13607_v15  ;;  %10209 = vmatpush3.bf16.msra.mxu1 %v11830_v54  ;;  %v15095_v54 = vld [vmem:[#allocation8_spill] sm:$0xff] }
 0x2a8   : > { %10210 = vmatprep.subr.bf16.mxu1 %v11831_v11 }
 0x2ab   : > { %10211 = vmatpush3.bf16.msra.mxu1 %v11831_v11  ;;  %v11846_v11 = vld [vmem:[%s14919_s3 + $0x160] sm:$0xff]  }
 0x2ac   : > { %10212 = vmatprep.subr.bf16.mxu1 %v11832_v44 }
 0x2ae   : > { %10181 = vmatmul.mubr.bf16.gmra.mrb[60].mxu1 %v13612_v39 }
 0x2af   : > { %10184 = vmatprep.mubr.bf16.mxu1 %v13622_v2  ;;  %10213 = vmatpush3.bf16.msra.mxu1 %v11832_v44  ;;  %v11847_v44 = vld [vmem:[%s14919_s3 + $0x168] sm:$0xff]  }
 0x2b0   : > { %10214 = vmatprep.subr.bf16.mxu1 %v11833_v27 }
 0x2b3   : > { %10215 = vmatpush3.bf16.msra.mxu1 %v11833_v27  ;;  %v15096_v27 = vld [vmem:[#allocation7_spill] sm:$0xff] }
 0x2b4   : > { %10248 = vmatprep.subr.bf16.mxu1 %v11834_v21 }
 0x2b6   : > { %10185 = vmatmul.mubr.bf16.gmra.mrb[64].mxu1 %v13632_v52 }
 0x2b7   : > { %10188 = vmatprep.mubr.bf16.mxu1 %v13637_v50 }
 0x2be   : > { %10189 = vmatmul.mubr.bf16.gmra.mrb[68].mxu1 %v13642_v25 }
 0x2bf   : > { %10192 = vmatprep.mubr.bf16.mxu1 %v13651_v41 }
 0x2c6   : > { %10193 = vmatmul.mubr.bf16.gmra.mrb[72].mxu1 %v13665_v13 }
 0x2c7   : > { %10196 = vmatprep.mubr.bf16.mxu1 %v13672_v16 }
 0x2ce   : > { %10197 = vmatmul.mubr.bf16.gmra.mrb[76].mxu1 %v13676_v6 }
 0x2cf   : > { %10216 = vmatprep.mubr.bf16.mxu1 %v13475_v32  ;;  %v11837_v32 = vld [vmem:[%s14919_s3 + $0x118] sm:$0xff]  }
 0x2d6   : > { %10217 = vmatmul.mubr.bf16.vlgmr.msra.gmra.mrb[48].mxu1 %v13483_v48 }
 0x2d7   : > { %10249 = vmatpush3.bf16.msra.mxu1 %v11834_v21  ;;  %10220 = vmatprep.mubr.bf16.mxu1 %v15078_v56  ;;  %v15097_v21 = vld [vmem:[#allocation9_spill] sm:$0xff] }
 0x2d8   : > { %10250 = vmatprep.subr.bf16.mxu1 %v11835_v0 }
 0x2db   : > { %10251 = vmatpush3.bf16.msra.mxu1 %v11835_v0  ;;  %v11848_v0 = vld [vmem:[%s14919_s3 + $0x170] sm:$0xff]  }
 0x2dc   : > { %10252 = vmatprep.subr.bf16.mxu1 %v11836_v51 }
 0x2de   : > { %10221 = vmatmul.mubr.bf16.gmra.mrb[52].mxu1 %v15079_v59 }
 0x2df   : > { %10224 = vmatprep.mubr.bf16.mxu1 %v15080_v20  ;;  %10253 = vmatpush3.bf16.msra.mxu1 %v11836_v51  ;;  %v11849_v51 = vld [vmem:[%s14919_s3 + $0x178] sm:$0xff]  }
 0x2e0   : > { %10254 = vmatprep.subr.bf16.mxu1 %v11837_v32 }
 0x2e3   : > { %10255 = vmatpush3.bf16.msra.mxu1 %v11837_v32  ;;  %v15098_v32 = vld [vmem:[#allocation11_spill] sm:$0xff] }
 0x2e4   : > { %10256 = vmatprep.subr.bf16.mxu1 %v11838_v40 }
 0x2e6   : > { %10225 = vmatmul.mubr.bf16.gmra.mrb[56].mxu1 %v15081_v17 }
 0x2e7   : > { %10228 = vmatprep.mubr.bf16.mxu1 %v15082_v53  ;;  %10257 = vmatpush3.bf16.msra.mxu1 %v11838_v40  ;;  %v11850_v40 = vld [vmem:[%s14919_s3 + $0x180] sm:$0xff]  }
 0x2e8   : > { %10258 = vmatprep.subr.bf16.mxu1 %v11839_v43 }
 0x2eb   : > { %10259 = vmatpush3.bf16.msra.mxu1 %v11839_v43  ;;  %v4132_v43 = vrot.slane %v13662_v34, 1  ;;  %v11851_v34 = vld [vmem:[%s14919_s3 + $0x188] sm:$0xff]  }
 0x2ec   : > { %10260 = vmatprep.subr.bf16.mxu1 %v11840_v38 }
 0x2ee   : > { %10229 = vmatmul.mubr.bf16.gmra.mrb[60].mxu1 %v15083_v42 }
 0x2ef   : > { %10232 = vmatprep.mubr.bf16.mxu1 %v15084_v61  ;;  %10261 = vmatpush3.bf16.msra.mxu1 %v11840_v38  ;;  %v4134_v38 = vrot.slane %v13668_v31, 1  ;;  %v11854_v31 = vld [vmem:[%s14919_s3 + $0x1a0] sm:$0xff]  }
 0x2f0   : > { %10262 = vmatprep.subr.bf16.mxu1 %v11841_v12 }
 0x2f3   : > { %10263 = vmatpush3.bf16.msra.mxu1 %v11841_v12  ;;  %v4131_v12 = vrot.slane %v13660_v22, 1  ;;  %v11852_v22 = vld [vmem:[%s14919_s3 + $0x190] sm:$0xff]  }
 0x2f4   : > { %10296 = vmatprep.subr.bf16.mxu1 %v11842_v60 }
 0x2f6   : > { %10233 = vmatmul.mubr.bf16.gmra.mrb[64].mxu1 %v15085_v46 }
 0x2f7   : > { %10236 = vmatprep.mubr.bf16.mxu1 %v15086_v55 }
 0x2fe   : > { %10237 = vmatmul.mubr.bf16.gmra.mrb[68].mxu1 %v15087_v45 }
 0x2ff   : > { %10240 = vmatprep.mubr.bf16.mxu1 %v15088_v9 }
 0x306   : > { %10241 = vmatmul.mubr.bf16.gmra.mrb[72].mxu1 %v15089_v29 }
 0x307   : > { %10244 = vmatprep.mubr.bf16.mxu1 %v15090_v18 }
 0x30e   : > { %10245 = vmatmul.mubr.bf16.gmra.mrb[76].mxu1 %v13829_v30 }
 0x30f   : > { %10264 = vmatprep.mubr.bf16.mxu1 %v15091_v28  ;;  %v4135_v28 = vsel %vm450_vm1, %v4132_v43, %v4134_v38 }
 0x316   : > { %10265 = vmatmul.mubr.bf16.vlgmr.msra.gmra.mrb[48].mxu1 %v15092_v58 }
 0x317   : > { %10297 = vmatpush3.bf16.msra.mxu1 %v11842_v60  ;;  %10268 = vmatprep.mubr.bf16.mxu1 %v15093_v7  ;;  %v4133_v60 = vsel %vm450_vm1, %v4131_v12, %v4132_v43 }
 0x318   : > { %10298 = vmatprep.subr.bf16.mxu1 %v11843_v1 }
 0x31b   : > { %10299 = vmatpush3.bf16.msra.mxu1 %v11843_v1  ;;  %v13876_v1 = vpack.c.bf16 %v4135_v28, %v4133_v60 }
 0x31c   : > { %10300 = vmatprep.subr.bf16.mxu1 %v11844_v5 }
 0x31e   : > { %10269 = vmatmul.mubr.bf16.gmra.mrb[52].mxu1 %v15094_v49 }
 0x31f   : > { %10272 = vmatprep.mubr.bf16.mxu1 %v15095_v54  ;;  %10301 = vmatpush3.bf16.msra.mxu1 %v11844_v5  ;;  %v11855_v5 = vld [vmem:[%s14919_s3 + $0x1a8] sm:$0xff]  }
 0x320   : > { %10302 = vmatprep.subr.bf16.mxu1 %v11845_v36 }
 0x323   : > { %10303 = vmatpush3.bf16.msra.mxu1 %v11845_v36  ;;  %v11856_v36 = vld [vmem:[%s14919_s3 + $0x1b0] sm:$0xff]  }
 0x324   : > { %10304 = vmatprep.subr.bf16.mxu1 %v11846_v11 }
 0x326   : > { %10273 = vmatmul.mubr.bf16.gmra.mrb[56].mxu1 %v15096_v27 }
 0x327   : > { %10276 = vmatprep.mubr.bf16.mxu1 %v15097_v21  ;;  %10305 = vmatpush3.bf16.msra.mxu1 %v11846_v11  ;;  %v11857_v11 = vld [vmem:[%s14919_s3 + $0x1b8] sm:$0xff]  }
 0x328   : > { %10306 = vmatprep.subr.bf16.mxu1 %v11847_v44 }
 0x32b   : > { %10307 = vmatpush3.bf16.msra.mxu1 %v11847_v44  ;;  %v11858_v44 = vld [vmem:[%s14919_s3 + $0x1c0] sm:$0xff]  }
 0x32c   : > { %10308 = vmatprep.subr.bf16.mxu1 %v11848_v0 }
 0x32e   : > { %10277 = vmatmul.mubr.bf16.gmra.mrb[60].mxu1 %v15098_v32 }
 0x32f   : > { %10280 = vmatprep.mubr.bf16.mxu1 %v13418_v8  ;;  %10309 = vmatpush3.bf16.msra.mxu1 %v11848_v0  ;;  %v11859_v0 = vld [vmem:[%s14919_s3 + $0x1c8] sm:$0xff]  }
 0x330   : > { %10310 = vmatprep.subr.bf16.mxu1 %v11849_v51 }
 0x333   : > { %10311 = vmatpush3.bf16.msra.mxu1 %v11849_v51  ;;  %v11860_v51 = vld [vmem:[%s14919_s3 + $0x1d0] sm:$0xff]  }
 0x334   : > { %10344 = vmatprep.subr.bf16.mxu1 %v11850_v40 }
 0x336   : > { %10281 = vmatmul.mubr.bf16.gmra.mrb[64].mxu1 %v13463_v19 }
 0x337   : > { %10284 = vmatprep.mubr.bf16.mxu1 %v13470_v24 }
 0x33e   : > { %10285 = vmatmul.mubr.bf16.gmra.mrb[68].mxu1 %v13479_v26 }
 0x33f   : > { %10288 = vmatprep.mubr.bf16.mxu1 %v13548_v63 }
 0x346   : > { %10289 = vmatmul.mubr.bf16.gmra.mrb[72].mxu1 %v13562_v4 }
 0x347   : > { %10292 = vmatprep.mubr.bf16.mxu1 %v13697_v35 }
 0x34e   : > { %10293 = vmatmul.mubr.bf16.gmra.mrb[76].mxu1 %v13876_v1 }
 0x34f   : > { %10312 = vmatprep.mubr.bf16.mxu1 %v13567_v47  ;;  %v11853_v47 = vld [vmem:[%s14919_s3 + $0x198] sm:$0xff]  }
 0x356   : > { %10313 = vmatmul.mubr.bf16.vlgmr.msra.gmra.mrb[48].mxu1 %v13573_v33 }
 0x357   : > { %10345 = vmatpush3.bf16.msra.mxu1 %v11850_v40  ;;  %10316 = vmatprep.mubr.bf16.mxu1 %v13588_v57 }
 0x358   : > { %10346 = vmatprep.subr.bf16.mxu1 %v11851_v34 }
 0x35b   : > { %10347 = vmatpush3.bf16.msra.mxu1 %v11851_v34 }
 0x35c   : > { %10348 = vmatprep.subr.bf16.mxu1 %v11852_v22 }
 0x35e   : > { %10317 = vmatmul.mubr.bf16.gmra.mrb[52].mxu1 %v13593_v37 }
 0x35f   : > { %10320 = vmatprep.mubr.bf16.mxu1 %v13598_v62  ;;  %10349 = vmatpush3.bf16.msra.mxu1 %v11852_v22 }
 0x360   : > { %10350 = vmatprep.subr.bf16.mxu1 %v11853_v47 }
 0x363   : > { %10351 = vmatpush3.bf16.msra.mxu1 %v11853_v47 }
 0x364   : > { %10352 = vmatprep.subr.bf16.mxu1 %v11854_v31 }
 0x366   : > { %10321 = vmatmul.mubr.bf16.gmra.mrb[56].mxu1 %v13607_v15 }
 0x367   : > { %10324 = vmatprep.mubr.bf16.mxu1 %v13612_v39  ;;  %10353 = vmatpush3.bf16.msra.mxu1 %v11854_v31 }
 0x368   : > { %10354 = vmatprep.subr.bf16.mxu1 %v11855_v5 }
 0x36b   : > { %10355 = vmatpush3.bf16.msra.mxu1 %v11855_v5 }
 0x36c   : > { %10356 = vmatprep.subr.bf16.mxu1 %v11856_v36 }
 0x36e   : > { %10325 = vmatmul.mubr.bf16.gmra.mrb[60].mxu1 %v13622_v2 }
 0x36f   : > { %10328 = vmatprep.mubr.bf16.mxu1 %v13632_v52  ;;  %10357 = vmatpush3.bf16.msra.mxu1 %v11856_v36 }
 0x370   : > { %10358 = vmatprep.subr.bf16.mxu1 %v11857_v11 }
 0x373   : > { %10359 = vmatpush3.bf16.msra.mxu1 %v11857_v11 }
 0x374   : > { %10392 = vmatprep.subr.bf16.mxu1 %v11858_v44 }
 0x376   : > { %10329 = vmatmul.mubr.bf16.gmra.mrb[64].mxu1 %v13637_v50 }
 0x377   : > { %10332 = vmatprep.mubr.bf16.mxu1 %v13642_v25 }
 0x37e   : > { %10333 = vmatmul.mubr.bf16.gmra.mrb[68].mxu1 %v13651_v41 }
 0x37f   : > { %10336 = vmatprep.mubr.bf16.mxu1 %v13665_v13 }
 0x386   : > { %10337 = vmatmul.mubr.bf16.gmra.mrb[72].mxu1 %v13672_v16 }
 0x387   : > { %10340 = vmatprep.mubr.bf16.mxu1 %v13676_v6 }
 0x38e   : > { %10341 = vmatmul.mubr.bf16.gmra.mrb[76].mxu1 %v13699_v23 }
 0x38f   : > { %10360 = vmatprep.mubr.bf16.mxu1 %v13483_v48  ;;  %v11861_v48 = vld [vmem:[%s14919_s3 + $0x1d8] sm:$0xff]  }
 0x396   : > { %10361 = vmatmul.mubr.bf16.vlgmr.msra.gmra.mrb[48].mxu1 %v15078_v56  ;;  %v11862_v56 = vld [vmem:[%s14919_s3 + $0x1e0] sm:$0xff]  }
 0x397   : > { %10393 = vmatpush3.bf16.msra.mxu1 %v11858_v44  ;;  %10364 = vmatprep.mubr.bf16.mxu1 %v15079_v59  ;;  %v11863_v59 = vld [vmem:[%s14919_s3 + $0x1e8] sm:$0xff]  }
 0x398   : > { %10394 = vmatprep.subr.bf16.mxu1 %v11859_v0 }
 0x39b   : > { %10395 = vmatpush3.bf16.msra.mxu1 %v11859_v0 }
 0x39c   : > { %10396 = vmatprep.subr.bf16.mxu1 %v11860_v51 }
 0x39e   : > { %10365 = vmatmul.mubr.bf16.gmra.mrb[52].mxu1 %v15080_v20  ;;  %v11864_v20 = vld [vmem:[%s14919_s3 + $0x1f0] sm:$0xff]  }
 0x39f   : > { %10368 = vmatprep.mubr.bf16.mxu1 %v15081_v17  ;;  %10397 = vmatpush3.bf16.msra.mxu1 %v11860_v51  ;;  %v11865_v17 = vld [vmem:[%s14919_s3 + $0x1f8] sm:$0xff]  }
 0x3a0   : > { %10398 = vmatprep.subr.bf16.mxu1 %v11861_v48 }
 0x3a3   : > { %10399 = vmatpush3.bf16.msra.mxu1 %v11861_v48 }
 0x3a4   : > { %10400 = vmatprep.subr.bf16.mxu1 %v11862_v56 }
 0x3a6   : > { %10369 = vmatmul.mubr.bf16.gmra.mrb[56].mxu1 %v15082_v53  ;;  %v11866_v53 = vld [vmem:[%s14919_s3 + $0x200] sm:$0xff]  }
 0x3a7   : > { %10372 = vmatprep.mubr.bf16.mxu1 %v15083_v42  ;;  %10401 = vmatpush3.bf16.msra.mxu1 %v11862_v56  ;;  %v11874_v42 = vld [vmem:[%s14921_s5 + $0x40] sm:$0xff]  }
 0x3a8   : > { %10402 = vmatprep.subr.bf16.mxu1 %v11863_v59  ;;  %10488 = vmatprep.subr.bf16.mxu0 %v11874_v42 }
 0x3a9   : > { %10489 = vmatpush3.bf16.msra.mxu0 %v11874_v42 }
 0x3ab   : > { %10403 = vmatpush3.bf16.msra.mxu1 %v11863_v59 }
 0x3ac   : > { %10404 = vmatprep.subr.bf16.mxu1 %v11864_v20 }
 0x3ae   : > { %10373 = vmatmul.mubr.bf16.gmra.mrb[60].mxu1 %v15084_v61  ;;  %v11875_v61 = vld [vmem:[%s14921_s5 + $0x48] sm:$0xff]  }
 0x3af   : > { %10376 = vmatprep.mubr.bf16.mxu1 %v15085_v46  ;;  %10405 = vmatpush3.bf16.msra.mxu1 %v11864_v20  ;;  %v11876_v46 = vld [vmem:[%s14921_s5 + $0x50] sm:$0xff]  }
 0x3b0   : > { %10406 = vmatprep.subr.bf16.mxu1 %v11865_v17  ;;  %10490 = vmatprep.subr.bf16.mxu0 %v11875_v61 }
 0x3b1   : > { %10491 = vmatpush3.bf16.msra.mxu0 %v11875_v61 }
 0x3b2   : > { %10492 = vmatprep.subr.bf16.mxu0 %v11876_v46 }
 0x3b3   : > { %10407 = vmatpush3.bf16.msra.mxu1 %v11865_v17 }
 0x3b4   : > { %10440 = vmatprep.subr.bf16.mxu1 %v11866_v53 }
 0x3b5   : > { %10493 = vmatpush3.bf16.msra.mxu0 %v11876_v46 }
 0x3b6   : > { %10377 = vmatmul.mubr.bf16.gmra.mrb[64].mxu1 %v15086_v55  ;;  %v11868_v55 = vld [vmem:[%s14919_s3 + $0x210] sm:$0xff]  }
 0x3b7   : > { %10380 = vmatprep.mubr.bf16.mxu1 %v15087_v45  ;;  %v11869_v45 = vld [vmem:[%s14919_s3 + $0x218] sm:$0xff]  }
 0x3be   : > { %10381 = vmatmul.mubr.bf16.gmra.mrb[68].mxu1 %v15088_v9  ;;  %v11870_v9 = vld [vmem:[%s14919_s3 + $0x220] sm:$0xff]  }
 0x3bf   : > { %10384 = vmatprep.mubr.bf16.mxu1 %v15089_v29  ;;  %v11871_v29 = vld [vmem:[%s14919_s3 + $0x228] sm:$0xff]  }
 0x3c6   : > { %10385 = vmatmul.mubr.bf16.gmra.mrb[72].mxu1 %v15090_v18  ;;  %v11872_v18 = vld [vmem:[%s14919_s3 + $0x230] sm:$0xff]  }
 0x3c7   : > { %10388 = vmatprep.mubr.bf16.mxu1 %v13829_v30  ;;  %v11873_v30 = vld [vmem:[%s14919_s3 + $0x238] sm:$0xff]  }
 0x3ce   : > { %10389 = vmatmul.mubr.bf16.gmra.mrb[76].mxu1 %v13694_v14  ;;  %v11867_v14 = vld [vmem:[%s14919_s3 + $0x208] sm:$0xff]  }
 0x3cf   : > { %10408 = vmatprep.mubr.bf16.mxu1 %v15092_v58  ;;  %v2839_v58 = vld [vmem:[#allocation2 + $0x1a8] sm:$0x3] }
 0x3d6   : > { %10409 = vmatmul.mubr.bf16.vlgmr.msra.gmra.mrb[48].mxu1 %v15093_v7  ;;  %v4925_v7 = vrot.slane %v13690_v10, 1 }
 0x3d7   : > { %10441 = vmatpush3.bf16.msra.mxu1 %v11866_v53  ;;  %10412 = vmatprep.mubr.bf16.mxu1 %v15094_v49  ;;  %v4928_v49 = vrot.slane %v2839_v58, 1 }
 0x3d8   : > { %10442 = vmatprep.subr.bf16.mxu1 %v11867_v14 }
 0x3db   : > { %10443 = vmatpush3.bf16.msra.mxu1 %v11867_v14 }
 0x3dc   : > { %10444 = vmatprep.subr.bf16.mxu1 %v11868_v55 }
 0x3de   : > { %10413 = vmatmul.mubr.bf16.gmra.mrb[52].mxu1 %v15095_v54 }
 0x3df   : > { %10416 = vmatprep.mubr.bf16.mxu1 %v15096_v27  ;;  %10445 = vmatpush3.bf16.msra.mxu1 %v11868_v55 }
 0x3e0   : > { %10446 = vmatprep.subr.bf16.mxu1 %v11869_v45 }
 0x3e3   : > { %10447 = vmatpush3.bf16.msra.mxu1 %v11869_v45 }
 0x3e4   : > { %10448 = vmatprep.subr.bf16.mxu1 %v11870_v9 }
 0x3e6   : > { %10417 = vmatmul.mubr.bf16.gmra.mrb[56].mxu1 %v15097_v21 }
 0x3e7   : > { %10420 = vmatprep.mubr.bf16.mxu1 %v15098_v32  ;;  %10449 = vmatpush3.bf16.msra.mxu1 %v11870_v9 }
 0x3e8   : > { %10450 = vmatprep.subr.bf16.mxu1 %v11871_v29 }
 0x3eb   : > { %10451 = vmatpush3.bf16.msra.mxu1 %v11871_v29 }
 0x3ec   : > { %10452 = vmatprep.subr.bf16.mxu1 %v11872_v18 }
 0x3ee   : > { %10421 = vmatmul.mubr.bf16.gmra.mrb[60].mxu1 %v13418_v8 }
 0x3ef   : > { %10424 = vmatprep.mubr.bf16.mxu1 %v13463_v19  ;;  %10453 = vmatpush3.bf16.msra.mxu1 %v11872_v18  ;;  %v4929_v19 = vsel %vm450_vm1, %v4925_v7, %v4928_v49 }
 0x3f0   : > { %10454 = vmatprep.subr.bf16.mxu1 %v11873_v30  ;;  %v4932_v8 = vpack.c.bf16 %v4929_v19, %v4925_v7 }
 0x3f3   : > { %10455 = vmatpush3.bf16.msra.mxu1 %v11873_v30 }
 0x3f6   : > { %10425 = vmatmul.mubr.bf16.gmra.mrb[64].mxu1 %v13470_v24  ;;  %v5194_v24 = vrot.slane %v2839_v58, 2 }
 0x3f7   : > { %10428 = vmatprep.mubr.bf16.mxu1 %v13479_v26 }
 0x3f8   : > { %v5195_v26 = vsel %vm1007_vm3, %v13741_v3, %v5194_v24 }
 0x3fe   : > { %10429 = vmatmul.mubr.bf16.gmra.mrb[68].mxu1 %v13548_v63  ;;  %v5198_v63 = vpack.c.bf16 %v5195_v26, %v13741_v3 }
 0x3ff   : > { %10432 = vmatprep.mubr.bf16.mxu1 %v13562_v4  ;;  %v11877_v4 = vld [vmem:[%s14921_s5 + $0x58] sm:$0xff]  }
 0x400   : > { %10494 = vmatprep.subr.bf16.mxu0 %v11877_v4 }
 0x401   : > { %10495 = vmatpush3.bf16.msra.mxu0 %v11877_v4 }
 0x406   : > { %10433 = vmatmul.mubr.bf16.gmra.mrb[72].mxu1 %v13697_v35 }
 0x407   : > { %10436 = vmatprep.mubr.bf16.mxu1 %v13876_v1 }
 0x40e   : > { %10437 = vmatmul.mubr.bf16.gmra.mrb[76].mxu1 %v4932_v8 }
 0x40f   : > { %10456 = vmatprep.mubr.bf16.mxu1 %v13573_v33  ;;  %v11878_v33 = vld [vmem:[%s14921_s5 + $0x60] sm:$0xff]  }
 0x410   : > { %10496 = vmatprep.subr.bf16.mxu0 %v11878_v33 }
 0x411   : > { %10497 = vmatpush3.bf16.msra.mxu0 %v11878_v33 }
 0x416   : > { %10457 = vmatmul.mubr.bf16.vlgmr.msra.gmra.mrb[48].mxu1 %v13588_v57  ;;  %v11879_v57 = vld [vmem:[%s14921_s5 + $0x68] sm:$0xff]  }
 0x417   : > { %10460 = vmatprep.mubr.bf16.mxu1 %v13593_v37  ;;  %10498 = vmatprep.subr.bf16.mxu0 %v11879_v57  ;;  %v11880_v37 = vld [vmem:[%s14921_s5 + $0x70] sm:$0xff]  }
 0x418   : > { %10499 = vmatpush3.bf16.msra.mxu0 %v11879_v57 }
 0x419   : > { %10500 = vmatprep.subr.bf16.mxu0 %v11880_v37 }
 0x41c   : > { %10501 = vmatpush3.bf16.msra.mxu0 %v11880_v37 }
 0x41e   : > { %10461 = vmatmul.mubr.bf16.gmra.mrb[52].mxu1 %v13598_v62  ;;  %v11881_v62 = vld [vmem:[%s14921_s5 + $0x78] sm:$0xff]  }
 0x41f   : > { %10464 = vmatprep.mubr.bf16.mxu1 %v13607_v15  ;;  %10502 = vmatprep.subr.bf16.mxu0 %v11881_v62  ;;  %v14039_v15 = vld [vmem:[#allocation3 + $0x10] sm:$0x3] }
 0x420   : > { %10503 = vmatpush3.bf16.msra.mxu0 %v11881_v62 }
 0x426   : > { %10465 = vmatmul.mubr.bf16.gmra.mrb[56].mxu1 %v13612_v39  ;;  %v14044_v39 = vld [vmem:[%s14921_s5] sm:$0xff]  }
 0x427   : > { %10468 = vmatprep.mubr.bf16.mxu1 %v13622_v2  ;;  %v5752_v2 = vrot.slane %v14039_v15, 1  ;;  %10536 = vmatprep.subr.bf16.mxu0 %v14044_v39 }
 0x42e   : > { %10469 = vmatmul.mubr.bf16.gmra.mrb[60].mxu1 %v13632_v52  ;;  %v5753_v52 = vsel %vm450_vm1, %v4925_v7, %v5752_v2 }
 0x42f   : > { %10472 = vmatprep.mubr.bf16.mxu1 %v13637_v50  ;;  %v5861_v50 = vpack.c.bf16 %v5753_v52, %v4925_v7 }
 0x431   : > { %10504 = vmatprep.mubr.bf16.mxu0 %v5861_v50 }
 0x436   : > { %10473 = vmatmul.mubr.bf16.gmra.mrb[64].mxu1 %v13642_v25  ;;  %v14052_v25 = vld [vmem:[%s14920_s4] ss:$0 sm:$0xff] }
 0x437   : > { %10476 = vmatprep.mubr.bf16.mxu1 %v13651_v41 }
 0x43e   : > { %10477 = vmatmul.mubr.bf16.gmra.mrb[68].mxu1 %v13665_v13 }
 0x43f   : > { %10480 = vmatprep.mubr.bf16.mxu1 %v13672_v16 }
 0x446   : > { %10481 = vmatmul.mubr.bf16.gmra.mrb[72].mxu1 %v13676_v6 }
 0x447   : > { %10484 = vmatprep.mubr.bf16.mxu1 %v13699_v23 }
 0x44e   : > { %10485 = vmatmul.mubr.bf16.gmra.mrb[76].mxu1 %v5198_v63  ;;  %v11883_v63 = vld [vmem:[%s14921_s5 + $0x8] sm:$0xff]  }
 0x4e9   : > { %v10458_v41 = vpop.f32.mrb[48].mxu1 }
 0x4ea   : > { %v5466_v13 = vadd.f32 %v10458_v41, %v14052_v25  ;;  %v5298_v16 = vpop.f32.mrb[49].mxu1 }
 0x4eb   : > { %v5464_v6 = vadd.f32 %v14052_v25, %v5298_v16  ;;  %v10459_v10 = vpop.f32.mrb[50].mxu1 }
 0x4ec   : > { %v5498_v35 = vmax.f32 %v5466_v13, 0.0  ;;  %v5467_v23 = vadd.f32 %v10459_v10, %v14052_v25  ;;  %v5301_v3 = vpop.f32.mrb[51].mxu1 }
 0x4ed   : > { %v5496_v54 = vmax.f32 %v5464_v6, 0.0  ;;  %v5465_v27 = vadd.f32 %v14052_v25, %v5301_v3 }
 0x4ee   : > { %5585 = vst [vmem:[#allocation3 + $0x31] sm:$0xff] %v5498_v35  ;;  %v5499_v21 = vmax.f32 %v5467_v23, 0.0 }
 0x4ef   : > { %5583 = vst [vmem:[#allocation3 + $0x19] sm:$0xff] %v5496_v54  ;;  %v5497_v32 = vmax.f32 %v5465_v27, 0.0 }
 0x4f0   : > { %5586 = vst [vmem:[#allocation3 + $0x39] sm:$0xff] %v5499_v21 }
 0x4f1   : > { %5584 = vst [vmem:[#allocation3 + $0x21] sm:$0xff] %v5497_v32  ;;  %v10462_v40 = vpop.f32.mrb[52].mxu1 }
 0x4f2   : > { %v5470_v43 = vadd.f32 %v10462_v40, %v14052_v25  ;;  %v5314_v38 = vpop.f32.mrb[53].mxu1  ;;  %v11884_v40 = vld [vmem:[%s14921_s5 + $0x10] sm:$0xff]  }
 0x4f3   : > { %v5468_v12 = vadd.f32 %v14052_v25, %v5314_v38  ;;  %v10463_v60 = vpop.f32.mrb[54].mxu1 }
 0x4f4   : > { %v5502_v28 = vmax.f32 %v5470_v43, 0.0  ;;  %v5471_v1 = vadd.f32 %v10463_v60, %v14052_v25  ;;  %v5317_v34 = vpop.f32.mrb[55].mxu1 }
 0x4f5   : > { %v5500_v22 = vmax.f32 %v5468_v12, 0.0  ;;  %v5469_v47 = vadd.f32 %v14052_v25, %v5317_v34  ;;  %v14062_v31 = vld [vmem:[#allocation3 + $0x30] sm:$0xff] }
 0x4f6   : > { %5589 = vst [vmem:[#allocation3 + $0x61] sm:$0xff] %v5502_v28  ;;  %v5503_v5 = vmax.f32 %v5471_v1, 0.0  ;;  %v5618_v36 = vld [vmem:[#allocation3 + $0x18] sm:$0xff]  ;;  %v5759_v56 = vrot.slane %v14062_v31, 1  ;;  %v6322_v13 = vrot.slane %v14062_v31, 2 }
 0x4f7   : > { %5587 = vst [vmem:[#allocation3 + $0x49] sm:$0xff] %v5500_v22  ;;  %v5501_v11 = vmax.f32 %v5469_v47, 0.0  ;;  %v14064_v44 = vld [vmem:[#allocation3 + $0x38] sm:$0xff]  ;;  %v14066_v0 = vld [vmem:[#allocation3 + $0x40] sm:$0x3]  ;;  %v5754_v42 = vrot.slane %v5618_v36, 1 }
 0x4f8   : > { %5590 = vst [vmem:[#allocation3 + $0x69] sm:$0xff] %v5503_v5  ;;  %v5619_v51 = vld [vmem:[#allocation3 + $0x20] sm:$0xff]  ;;  %v5620_v48 = vld [vmem:[#allocation3 + $0x28] sm:$0x3]  ;;  %v5760_v59 = vrot.slane %v14064_v44, 1  ;;  %v5762_v20 = vrot.slane %v14066_v0, 1  ;;  %v14073_v17 = vpack.c.bf16 %v14064_v44, %v14062_v31 }
 0x4f9   : > { %5588 = vst [vmem:[#allocation3 + $0x51] sm:$0xff] %v5501_v11  ;;  %v10466_v53 = vpop.f32.mrb[56].mxu1  ;;  %v5755_v61 = vrot.slane %v5619_v51, 1  ;;  %v5757_v46 = vrot.slane %v5620_v48, 1  ;;  %v14075_v14 = vpack.c.bf16 %v5619_v51, %v5618_v36  ;;  %v6317_v4 = vrot.slane %v5618_v36, 2 }
 0x4fa   : > { %v5474_v55 = vadd.f32 %v10466_v53, %v14052_v25  ;;  %v5330_v45 = vpop.f32.mrb[57].mxu1  ;;  %v5761_v9 = vsel %vm450_vm1, %v5759_v56, %v5760_v59  ;;  %v5763_v29 = vsel %vm450_vm1, %v5760_v59, %v5762_v20  ;;  %v6318_v62 = vrot.slane %v5619_v51, 2 }
 0x4fb   : > { %v5472_v18 = vadd.f32 %v14052_v25, %v5330_v45  ;;  %v10467_v30 = vpop.f32.mrb[58].mxu1  ;;  %v5756_v58 = vsel %vm450_vm1, %v5754_v42, %v5755_v61  ;;  %v5758_v7 = vsel %vm450_vm1, %v5755_v61, %v5757_v46  ;;  %v14083_v49 = vpack.c.bf16 %v5763_v29, %v5761_v9 }
 0x4fc   : > { %v5506_v19 = vmax.f32 %v5474_v55, 0.0  ;;  %v5475_v8 = vadd.f32 %v10467_v30, %v14052_v25  ;;  %v5333_v24 = vpop.f32.mrb[59].mxu1  ;;  %v14086_v26 = vpack.c.bf16 %v5758_v7, %v5756_v58  ;;  %v6320_v2 = vrot.slane %v5620_v48, 2 }
 0x4fd   : > { %v5504_v33 = vmax.f32 %v5472_v18, 0.0  ;;  %v5473_v57 = vadd.f32 %v14052_v25, %v5333_v24  ;;  %v14092_v37 = vld [vmem:[#allocation3 + $0x60] sm:$0xff]  ;;  %v6323_v16 = vrot.slane %v14064_v44, 2  ;;  %v6319_v3 = vsel %vm1007_vm3, %v6317_v4, %v6318_v62 }
 0x4fe   : > { %5593 = vst [vmem:[#allocation3 + $0x91] sm:$0xff] %v5506_v19  ;;  %v5507_v52 = vmax.f32 %v5475_v8, 0.0  ;;  %10505 = vmatmul.mubr.bf16.vlgmr.msra.gmra.mrb[32].mxu0 %v14086_v26  ;;  %v14095_v50 = vld [vmem:[#allocation3 + $0x48] sm:$0xff]  ;;  %v5769_v41 = vrot.slane %v14092_v37, 1  ;;  %v6321_v54 = vsel %vm1007_vm3, %v6318_v62, %v6320_v2  ;;  %v6325_v36 = vrot.slane %v14066_v0, 2 }
 0x4ff   : > { %5591 = vst [vmem:[#allocation3 + $0x79] sm:$0xff] %v5504_v33  ;;  %v5505_v6 = vmax.f32 %v5473_v57, 0.0  ;;  %10537 = vmatpush3.bf16.msra.mxu0 %v14044_v39  ;;  %10508 = vmatprep.mubr.bf16.mxu0 %v14083_v49  ;;  %v5764_v10 = vrot.slane %v14095_v50, 1  ;;  %v14103_v35 = vld [vmem:[#allocation3 + $0x68] sm:$0xff]  ;;  %v14105_v23 = vld [vmem:[#allocation3 + $0x70] sm:$0x3]  ;;  %v14122_v38 = vpack.c.bf16 %v6321_v54, %v6319_v3  ;;  %v6324_v34 = vsel %vm1007_vm3, %v6322_v13, %v6323_v16 }
 0x500   : > { %5594 = vst [vmem:[#allocation3 + $0x99] sm:$0xff] %v5507_v52  ;;  %10538 = vmatprep.subr.bf16.mxu0 %v11883_v63  ;;  %v14109_v27 = vld [vmem:[#allocation3 + $0x50] sm:$0xff]  ;;  %v14111_v21 = vld [vmem:[#allocation3 + $0x58] sm:$0x3]  ;;  %v5770_v39 = vrot.slane %v14103_v35, 1  ;;  %v5772_v32 = vrot.slane %v14105_v23, 1  ;;  %v14120_v43 = vpack.c.bf16 %v14103_v35, %v14092_v37  ;;  %v6326_v61 = vsel %vm1007_vm3, %v6323_v16, %v6325_v36 }
 0x501   : > { %5592 = vst [vmem:[#allocation3 + $0x81] sm:$0xff] %v5505_v6  ;;  %v10470_v12 = vpop.f32.mrb[60].mxu1  ;;  %v5765_v60 = vrot.slane %v14109_v27, 1  ;;  %v5767_v28 = vrot.slane %v14111_v21, 1  ;;  %v14128_v1 = vpack.c.bf16 %v14109_v27, %v14095_v50  ;;  %v11885_v0 = vld [vmem:[%s14921_s5 + $0x18] sm:$0xff]   ;;  %v14150_v9 = vpack.c.bf16 %v6326_v61, %v6324_v34  ;;  %v11887_v36 = vld [vmem:[%s14921_s5 + $0x28] sm:$0xff]  }
 0x502   : > { %v5478_v22 = vadd.f32 %v10470_v12, %v14052_v25  ;;  %v5346_v47 = vpop.f32.mrb[61].mxu1  ;;  %v5771_v31 = vsel %vm450_vm1, %v5769_v41, %v5770_v39  ;;  %v5773_v5 = vsel %vm450_vm1, %v5770_v39, %v5772_v32  ;;  %v6327_v29 = vrot.slane %v14095_v50, 2  ;;  %v11886_v50 = vld [vmem:[%s14921_s5 + $0x20] sm:$0xff]  }
 0x503   : > { %v5476_v11 = vadd.f32 %v14052_v25, %v5346_v47  ;;  %v10471_v44 = vpop.f32.mrb[62].mxu1  ;;  %v5766_v51 = vsel %vm450_vm1, %v5764_v10, %v5765_v60  ;;  %v5768_v48 = vsel %vm450_vm1, %v5765_v60, %v5767_v28  ;;  %10539 = vmatpush3.bf16.msra.mxu0 %v11883_v63  ;;  %v14138_v56 = vpack.c.bf16 %v5773_v5, %v5771_v31 }
 0x504   : > { %v5510_v59 = vmax.f32 %v5478_v22, 0.0  ;;  %v5479_v20 = vadd.f32 %v10471_v44, %v14052_v25  ;;  %v5349_v53 = vpop.f32.mrb[63].mxu1  ;;  %v14141_v42 = vpack.c.bf16 %v5768_v48, %v5766_v51  ;;  %10540 = vmatprep.subr.bf16.mxu0 %v11884_v40  ;;  %v6328_v7 = vrot.slane %v14109_v27, 2 }
 0x505   : > { %v5508_v46 = vmax.f32 %v5476_v11, 0.0  ;;  %v5477_v55 = vadd.f32 %v14052_v25, %v5349_v53  ;;  %v14148_v45 = vld [vmem:[#allocation3 + $0x90] sm:$0xff]  ;;  %v6330_v19 = vrot.slane %v14111_v21, 2  ;;  %v6332_v33 = vrot.slane %v14092_v37, 2 }
 0x506   : > { %5597 = vst [vmem:[#allocation3 + $0xc1] sm:$0xff] %v5510_v59  ;;  %v5511_v18 = vmax.f32 %v5479_v20, 0.0  ;;  %10509 = vmatmul.mubr.bf16.gmra.mrb[36].mxu0 %v14141_v42  ;;  %v14154_v30 = vld [vmem:[#allocation3 + $0x78] sm:$0xff]  ;;  %v5779_v58 = vrot.slane %v14148_v45, 1  ;;  %v6329_v37 = vsel %vm1007_vm3, %v6327_v29, %v6328_v7  ;;  %v6333_v11 = vrot.slane %v14103_v35, 2 }
 0x507   : > { %5595 = vst [vmem:[#allocation3 + $0xa9] sm:$0xff] %v5508_v46  ;;  %v5509_v8 = vmax.f32 %v5477_v55, 0.0  ;;  %10512 = vmatprep.mubr.bf16.mxu0 %v14138_v56  ;;  %v5774_v24 = vrot.slane %v14154_v30, 1  ;;  %10541 = vmatpush3.bf16.msra.mxu0 %v11884_v40  ;;  %v14161_v63 = vld [vmem:[#allocation3 + $0x98] sm:$0xff]  ;;  %v14163_v4 = vld [vmem:[#allocation3 + $0xa0] sm:$0x3]  ;;  %v6331_v3 = vsel %vm1007_vm3, %v6328_v7, %v6330_v19 }
 0x508   : > { %5598 = vst [vmem:[#allocation3 + $0xc9] sm:$0xff] %v5511_v18  ;;  %v14166_v57 = vld [vmem:[#allocation3 + $0x80] sm:$0xff]  ;;  %v14168_v62 = vld [vmem:[#allocation3 + $0x88] sm:$0x3]  ;;  %v5780_v2 = vrot.slane %v14161_v63, 1  ;;  %v5782_v52 = vrot.slane %v14163_v4, 1  ;;  %10542 = vmatprep.subr.bf16.mxu0 %v11885_v0  ;;  %v14177_v41 = vpack.c.bf16 %v14161_v63, %v14148_v45  ;;  %v14190_v32 = vpack.c.bf16 %v6331_v3, %v6329_v37 }
 0x509   : > { %5596 = vst [vmem:[#allocation3 + $0xb1] sm:$0xff] %v5509_v8  ;;  %v10474_v13 = vpop.f32.mrb[64].mxu1  ;;  %v5775_v16 = vrot.slane %v14166_v57, 1  ;;  %v5777_v6 = vrot.slane %v14168_v62, 1  ;;  %v14184_v10 = vpack.c.bf16 %v14166_v57, %v14154_v30  ;;  %v6335_v59 = vrot.slane %v14105_v23, 2 }
 0x50a   : > { %v5482_v54 = vadd.f32 %v10474_v13, %v14052_v25  ;;  %v5362_v27 = vpop.f32.mrb[65].mxu1  ;;  %v5781_v21 = vsel %vm450_vm1, %v5779_v58, %v5780_v2  ;;  %v5783_v39 = vsel %vm450_vm1, %v5780_v2, %v5782_v52  ;;  %v6337_v20 = vrot.slane %v14154_v30, 2 }
 0x50b   : > { %v5480_v40 = vadd.f32 %v14052_v25, %v5362_v27  ;;  %v10475_v12 = vpop.f32.mrb[66].mxu1  ;;  %v5776_v60 = vsel %vm450_vm1, %v5774_v24, %v5775_v16  ;;  %v5778_v28 = vsel %vm450_vm1, %v5775_v16, %v5777_v6  ;;  %v14195_v34 = vpack.c.bf16 %v5783_v39, %v5781_v21  ;;  %10543 = vmatpush3.bf16.msra.mxu0 %v11885_v0 }
 0x50c   : > { %v5514_v22 = vmax.f32 %v5482_v54, 0.0  ;;  %v5483_v47 = vadd.f32 %v10475_v12, %v14052_v25  ;;  %v5365_v31 = vpop.f32.mrb[67].mxu1  ;;  %v14198_v5 = vpack.c.bf16 %v5778_v28, %v5776_v60  ;;  %10544 = vmatprep.subr.bf16.mxu0 %v11886_v50  ;;  %v6334_v46 = vsel %vm1007_vm3, %v6332_v33, %v6333_v11  ;;  %v11888_v33 = vld [vmem:[%s14921_s5 + $0x30] sm:$0xff]  }
 0x50d   : > { %v5512_v44 = vmax.f32 %v5480_v40, 0.0  ;;  %v5481_v51 = vadd.f32 %v14052_v25, %v5365_v31  ;;  %v14205_v48 = vld [vmem:[#allocation3 + $0xc0] sm:$0xff]  ;;  %v6338_v35 = vrot.slane %v14166_v57, 2  ;;  %v6336_v30 = vsel %vm1007_vm3, %v6333_v11, %v6335_v59  ;;  %v11889_v11 = vld [vmem:[%s14921_s5 + $0x38] sm:$0xff]  }
 0x50e   : > { %5601 = vst [vmem:[#allocation3 + $0xf1] sm:$0xff] %v5514_v22  ;;  %v5515_v53 = vmax.f32 %v5483_v47, 0.0  ;;  %10513 = vmatmul.mubr.bf16.gmra.mrb[40].mxu0 %v14198_v5  ;;  %v14210_v0 = vld [vmem:[#allocation3 + $0xa8] sm:$0xff]  ;;  %v5789_v61 = vrot.slane %v14205_v48, 1  ;;  %v6340_v58 = vrot.slane %v14168_v62, 2  ;;  %v14236_v2 = vpack.c.bf16 %v6336_v30, %v6334_v46 }
 0x50f   : > { %5599 = vst [vmem:[#allocation3 + $0xd9] sm:$0xff] %v5512_v44  ;;  %v5513_v55 = vmax.f32 %v5481_v51, 0.0  ;;  %10516 = vmatprep.mubr.bf16.mxu0 %v14195_v34  ;;  %v5784_v23 = vrot.slane %v14210_v0, 1  ;;  %v14217_v29 = vld [vmem:[#allocation3 + $0xc8] sm:$0xff]  ;;  %v14219_v18 = vld [vmem:[#allocation3 + $0xd0] sm:$0x3]  ;;  %10545 = vmatpush3.bf16.msra.mxu0 %v11886_v50  ;;  %v6339_v13 = vsel %vm1007_vm3, %v6337_v20, %v6338_v35 }
 0x510   : > { %5602 = vst [vmem:[#allocation3 + $0xf9] sm:$0xff] %v5515_v53  ;;  %v14223_v7 = vld [vmem:[#allocation3 + $0xb0] sm:$0xff]  ;;  %v14225_v19 = vld [vmem:[#allocation3 + $0xb8] sm:$0x3]  ;;  %v5790_v8 = vrot.slane %v14217_v29, 1  ;;  %v5792_v24 = vrot.slane %v14219_v18, 1  ;;  %10546 = vmatprep.subr.bf16.mxu0 %v11887_v36  ;;  %v14234_v57 = vpack.c.bf16 %v14217_v29, %v14205_v48  ;;  %v6341_v27 = vsel %vm1007_vm3, %v6338_v35, %v6340_v58 }
 0x511   : > { %5600 = vst [vmem:[#allocation3 + $0xe1] sm:$0xff] %v5513_v55  ;;  %v10478_v62 = vpop.f32.mrb[68].mxu1  ;;  %v5785_v52 = vrot.slane %v14223_v7, 1  ;;  %v5787_v50 = vrot.slane %v14225_v19, 1  ;;  %v14242_v37 = vpack.c.bf16 %v14223_v7, %v14210_v0  ;;  %v14260_v44 = vpack.c.bf16 %v6341_v27, %v6339_v13 }
 0x512   : > { %v5486_v16 = vadd.f32 %v10478_v62, %v14052_v25  ;;  %v5378_v6 = vpop.f32.mrb[69].mxu1  ;;  %v5791_v3 = vsel %vm450_vm1, %v5789_v61, %v5790_v8  ;;  %v5793_v54 = vsel %vm450_vm1, %v5790_v8, %v5792_v24  ;;  %v6343_v53 = vrot.slane %v14161_v63, 2 }
 0x513   : > { %v5484_v21 = vadd.f32 %v14052_v25, %v5378_v6  ;;  %v10479_v39 = vpop.f32.mrb[70].mxu1  ;;  %v5786_v40 = vsel %vm450_vm1, %v5784_v23, %v5785_v52  ;;  %v5788_v12 = vsel %vm450_vm1, %v5785_v52, %v5787_v50  ;;  %v14252_v60 = vpack.c.bf16 %v5793_v54, %v5791_v3  ;;  %10547 = vmatpush3.bf16.msra.mxu0 %v11887_v36  ;;  %v14290_v50 = vld [vmem:[%s14921_s5 + $0x80] sm:$0xff]  }
 0x514   : > { %v5518_v28 = vmax.f32 %v5486_v16, 0.0  ;;  %v5487_v22 = vadd.f32 %v10479_v39, %v14052_v25  ;;  %v5381_v47 = vpop.f32.mrb[71].mxu1  ;;  %v14255_v31 = vpack.c.bf16 %v5788_v12, %v5786_v40  ;;  %10548 = vmatprep.subr.bf16.mxu0 %v11888_v33  ;;  %v6342_v36 = vrot.slane %v14148_v45, 2 }
 0x515   : > { %v5516_v51 = vmax.f32 %v5484_v21, 0.0  ;;  %v5485_v59 = vadd.f32 %v14052_v25, %v5381_v47  ;;  %v14263_v20 = vld [vmem:[#allocation3 + $0xf0] sm:$0xff]  ;;  %v6345_v55 = vrot.slane %v14163_v4, 2  ;;  %v6347_v23 = vrot.slane %v14210_v0, 2 }
 0x516   : > { %5605 = vst [vmem:[#allocation3 + $0x121] sm:$0xff] %v5518_v28  ;;  %v5519_v61 = vmax.f32 %v5487_v22, 0.0  ;;  %10517 = vmatmul.mubr.bf16.gmra.mrb[44].mxu0 %v14255_v31  ;;  %v14268_v46 = vld [vmem:[#allocation3 + $0xd8] sm:$0xff]  ;;  %v5799_v35 = vrot.slane %v14263_v20, 1  ;;  %v6344_v8 = vsel %vm1007_vm3, %v6342_v36, %v6343_v53  ;;  %v6348_v24 = vrot.slane %v14223_v7, 2 }
 0x517   : > { %5603 = vst [vmem:[#allocation3 + $0x109] sm:$0xff] %v5516_v51  ;;  %v5517_v30 = vmax.f32 %v5485_v59, 0.0  ;;  %10520 = vmatprep.mubr.bf16.mxu0 %v14252_v60  ;;  %v5794_v45 = vrot.slane %v14268_v46, 1  ;;  %v14275_v58 = vld [vmem:[#allocation3 + $0xf8] sm:$0xff]  ;;  %v14277_v63 = vld [vmem:[#allocation3 + $0x100] sm:$0x3]  ;;  %10549 = vmatpush3.bf16.msra.mxu0 %v11888_v33  ;;  %v6346_v7 = vsel %vm1007_vm3, %v6343_v53, %v6345_v55 }
 0x518   : > { %5606 = vst [vmem:[#allocation3 + $0x129] sm:$0xff] %v5519_v61  ;;  %v14281_v62 = vld [vmem:[#allocation3 + $0xe0] sm:$0xff]  ;;  %v14283_v4 = vld [vmem:[#allocation3 + $0xe8] sm:$0x3]  ;;  %v5800_v0 = vrot.slane %v14275_v58, 1  ;;  %v5802_v52 = vrot.slane %v14277_v63, 1  ;;  %10550 = vmatprep.subr.bf16.mxu0 %v11889_v11  ;;  %v14294_v33 = vpack.c.bf16 %v14275_v58, %v14263_v20  ;;  %v14303_v54 = vpack.c.bf16 %v6346_v7, %v6344_v8 }
 0x519   : > { %5604 = vst [vmem:[#allocation3 + $0x111] sm:$0xff] %v5517_v30  ;;  %v10482_v13 = vpop.f32.mrb[72].mxu1  ;;  %v5795_v16 = vrot.slane %v14281_v62, 1  ;;  %v5797_v6 = vrot.slane %v14283_v4, 1  ;;  %v14301_v3 = vpack.c.bf16 %v14281_v62, %v14268_v46  ;;  %v6349_v12 = vsel %vm1007_vm3, %v6347_v23, %v6348_v24 }
 0x51a   : > { %v5490_v27 = vadd.f32 %v10482_v13, %v14052_v25  ;;  %v5394_v21 = vpop.f32.mrb[73].mxu1  ;;  %v5801_v39 = vsel %vm450_vm1, %v5799_v35, %v5800_v0  ;;  %v5803_v40 = vsel %vm450_vm1, %v5800_v0, %v5802_v52  ;;  %v6350_v35 = vrot.slane %v14225_v19, 2 }
 0x51b   : > { %v5488_v28 = vadd.f32 %v14052_v25, %v5394_v21  ;;  %v10483_v22 = vpop.f32.mrb[74].mxu1  ;;  %v5796_v47 = vsel %vm450_vm1, %v5794_v45, %v5795_v16  ;;  %v5798_v51 = vsel %vm450_vm1, %v5795_v16, %v5797_v6  ;;  %v14312_v59 = vpack.c.bf16 %v5803_v40, %v5801_v39  ;;  %10551 = vmatpush3.bf16.msra.mxu0 %v11889_v11 }
 0x51c   : > { %v5522_v36 = vmax.f32 %v5490_v27, 0.0  ;;  %v5491_v53 = vadd.f32 %v10483_v22, %v14052_v25  ;;  %v5397_v61 = vpop.f32.mrb[75].mxu1  ;;  %v14315_v55 = vpack.c.bf16 %v5798_v51, %v5796_v47  ;;  %10584 = vmatprep.subr.bf16.mxu0 %v14290_v50  ;;  %v6352_v45 = vrot.slane %v14205_v48, 2 }
 0x51d   : > { %15099 = vst [vmem:[#allocation27_spill] sm:$0xff] %v14312_v59  ;;  %v5520_v23 = vmax.f32 %v5488_v28, 0.0  ;;  %v5489_v30 = vadd.f32 %v14052_v25, %v5397_v61  ;;  %v14320_v8 = vld [vmem:[#allocation3 + $0x120] sm:$0xff]  ;;  %v6353_v0 = vrot.slane %v14217_v29, 2  ;;  %v6351_v13 = vsel %vm1007_vm3, %v6348_v24, %v6350_v35 }
 0x51e   : > { %15100 = vst [vmem:[#allocation28_spill] sm:$0xff] %v14315_v55  ;;  %5609 = vst [vmem:[#allocation3 + $0x151] sm:$0xff] %v5522_v36  ;;  %v5523_v11 = vmax.f32 %v5491_v53, 0.0  ;;  %10521 = vmatmul.mubr.bf16.gmra.mrb[48].mxu0 %v14315_v55  ;;  %v14325_v52 = vld [vmem:[#allocation3 + $0x108] sm:$0xff]  ;;  %v5809_v7 = vrot.slane %v14320_v8, 1  ;;  %v6355_v19 = vrot.slane %v14219_v18, 2  ;;  %v14336_v27 = vpack.c.bf16 %v6351_v13, %v6349_v12 }
 0x51f   : > { %5607 = vst [vmem:[#allocation3 + $0x139] sm:$0xff] %v5520_v23  ;;  %v5521_v16 = vmax.f32 %v5489_v30, 0.0  ;;  %10524 = vmatprep.mubr.bf16.mxu0 %v14312_v59  ;;  %v5804_v48 = vrot.slane %v14325_v52, 1  ;;  %v14332_v6 = vld [vmem:[#allocation3 + $0x128] sm:$0xff]  ;;  %v14334_v29 = vld [vmem:[#allocation3 + $0x130] sm:$0x3]  ;;  %v6354_v21 = vsel %vm1007_vm3, %v6352_v45, %v6353_v0 }
 0x520   : > { %5610 = vst [vmem:[#allocation3 + $0x159] sm:$0xff] %v5523_v11  ;;  %v14339_v39 = vld [vmem:[#allocation3 + $0x110] sm:$0xff]  ;;  %v14341_v24 = vld [vmem:[#allocation3 + $0x118] sm:$0x3]  ;;  %v5810_v18 = vrot.slane %v14332_v6, 1  ;;  %v5812_v40 = vrot.slane %v14334_v29, 1  ;;  %v14347_v28 = vpack.c.bf16 %v14332_v6, %v14320_v8  ;;  %v6356_v22 = vsel %vm1007_vm3, %v6353_v0, %v6355_v19 }
 0x521   : > { %5608 = vst [vmem:[#allocation3 + $0x141] sm:$0xff] %v5521_v16  ;;  %v10486_v12 = vpop.f32.mrb[76].mxu1  ;;  %v5805_v47 = vrot.slane %v14339_v39, 1  ;;  %v5807_v51 = vrot.slane %v14341_v24, 1  ;;  %v14354_v36 = vpack.c.bf16 %v14339_v39, %v14325_v52  ;;  %v14356_v53 = vpack.c.bf16 %v6356_v22, %v6354_v21 }
 0x522   : > { %v5494_v61 = vadd.f32 %v10486_v12, %v14052_v25  ;;  %v5410_v35 = vpop.f32.mrb[77].mxu1  ;;  %v5811_v23 = vsel %vm450_vm1, %v5809_v7, %v5810_v18  ;;  %v5813_v30 = vsel %vm450_vm1, %v5810_v18, %v5812_v40  ;;  %v6357_v45 = vrot.slane %v14268_v46, 2 }
 0x523   : > { %v5492_v0 = vadd.f32 %v14052_v25, %v5410_v35  ;;  %v10487_v11 = vpop.f32.mrb[78].mxu1  ;;  %v5806_v13 = vsel %vm450_vm1, %v5804_v48, %v5805_v47  ;;  %v5808_v19 = vsel %vm450_vm1, %v5805_v47, %v5807_v51  ;;  %v14365_v16 = vpack.c.bf16 %v5813_v30, %v5811_v23 }
 0x524   : > { %v5526_v21 = vmax.f32 %v5494_v61, 0.0  ;;  %v5495_v22 = vadd.f32 %v10487_v11, %v14052_v25  ;;  %v5413_v12 = vpop.f32.mrb[79].mxu1  ;;  %v14368_v59 = vpack.c.bf16 %v5808_v19, %v5806_v13  ;;  %v6358_v7 = vrot.slane %v14281_v62, 2 }
 0x525   : > { %15101 = vst [vmem:[#allocation10_spill] sm:$0xff] %v14365_v16  ;;  %v5524_v18 = vmax.f32 %v5492_v0, 0.0  ;;  %v5493_v46 = vadd.f32 %v14052_v25, %v5413_v12  ;;  %v14372_v40 = vld [vmem:[#allocation3 + $0x150] sm:$0xff]  ;;  %v6360_v35 = vrot.slane %v14283_v4, 2  ;;  %v6362_v48 = vrot.slane %v14263_v20, 2 }
 0x526   : > { %15102 = vst [vmem:[#allocation12_spill] sm:$0xff] %v14368_v59  ;;  %5613 = vst [vmem:[#allocation3 + $0x181] sm:$0xff] %v5526_v21  ;;  %v5527_v47 = vmax.f32 %v5495_v22, 0.0  ;;  %10525 = vmatmul.mubr.bf16.gmra.mrb[52].mxu0 %v14368_v59  ;;  %v5654_v51 = vld [vmem:[#allocation3 + $0x138] sm:$0xff]  ;;  %v5819_v61 = vrot.slane %v14372_v40, 1  ;;  %v6359_v23 = vsel %vm1007_vm3, %v6357_v45, %v6358_v7  ;;  %v6363_v62 = vrot.slane %v14275_v58, 2 }
 0x527   : > { %5611 = vst [vmem:[#allocation3 + $0x169] sm:$0xff] %v5524_v18  ;;  %v5525_v30 = vmax.f32 %v5493_v46, 0.0  ;;  %10528 = vmatprep.mubr.bf16.mxu0 %v14365_v16  ;;  %v5814_v25 = vrot.slane %v5654_v51, 1  ;;  %v14381_v0 = vld [vmem:[#allocation3 + $0x158] sm:$0xff]  ;;  %v14383_v4 = vld [vmem:[#allocation3 + $0x160] sm:$0x3]  ;;  %v6361_v20 = vsel %vm1007_vm3, %v6358_v7, %v6360_v35 }
 0x528   : > { %v6365_v11 = vrot.slane %v14277_v63, 2  ;;  %5614 = vst [vmem:[#allocation3 + $0x189] sm:$0xff] %v5527_v47  ;;  %v5655_v13 = vld [vmem:[#allocation3 + $0x140] sm:$0xff]  ;;  %v5656_v19 = vld [vmem:[#allocation3 + $0x148] sm:$0x3]  ;;  %v5820_v45 = vrot.slane %v14381_v0, 1  ;;  %v14391_v21 = vpack.c.bf16 %v14381_v0, %v14372_v40  ;;  %v14393_v22 = vpack.c.bf16 %v6361_v20, %v6359_v23 }
 0x529   : > { %v5822_v58 = vrot.slane %v14383_v4, 1  ;;  %5612 = vst [vmem:[#allocation3 + $0x171] sm:$0xff] %v5525_v30  ;;  %v5815_v12 = vrot.slane %v5655_v13, 1  ;;  %v5817_v18 = vrot.slane %v5656_v19, 1  ;;  %v14395_v46 = vpack.c.bf16 %v5655_v13, %v5654_v51 }
 0x52a   : > { %v6364_v63 = vsel %vm1007_vm3, %v6362_v48, %v6363_v62  ;;  %v5821_v7 = vsel %vm450_vm1, %v5819_v61, %v5820_v45  ;;  %v6366_v47 = vsel %vm1007_vm3, %v6363_v62, %v6365_v11  ;;  %v6367_v16 = vrot.slane %v14325_v52, 2 }
 0x52b   : > { %v5823_v35 = vsel %vm450_vm1, %v5820_v45, %v5822_v58  ;;  %v5816_v59 = vsel %vm450_vm1, %v5814_v25, %v5815_v12  ;;  %v5818_v23 = vsel %vm450_vm1, %v5815_v12, %v5817_v18  ;;  %v14406_v30 = vpack.c.bf16 %v6366_v47, %v6364_v63 }
 0x52c   : > { %v14404_v20 = vpack.c.bf16 %v5823_v35, %v5821_v7  ;;  %v14408_v55 = vpack.c.bf16 %v5818_v23, %v5816_v59  ;;  %v6368_v48 = vrot.slane %v14339_v39, 2  ;;  %v6370_v61 = vrot.slane %v14341_v24, 2 }
 0x52d   : > { %v6372_v45 = vrot.slane %v14320_v8, 2  ;;  %v6373_v62 = vrot.slane %v14332_v6, 2  ;;  %v6375_v52 = vrot.slane %v14334_v29, 2  ;;  %v6377_v11 = vrot.slane %v5654_v51, 2 }
 0x52e   : > { %v6378_v25 = vrot.slane %v5655_v13, 2  ;;  %10529 = vmatmul.mubr.bf16.gmra.mrb[56].mxu0 %v14408_v55  ;;  %v5660_v58 = vld [vmem:[#allocation3 + $0x168] sm:$0xff]  ;;  %v6369_v12 = vsel %vm1007_vm3, %v6367_v16, %v6368_v48  ;;  %v6371_v59 = vsel %vm1007_vm3, %v6368_v48, %v6370_v61  ;;  %v6380_v18 = vrot.slane %v5656_v19, 2 }
 0x52f   : > { %v6382_v39 = vrot.slane %v14372_v40, 2  ;;  %10532 = vmatprep.mubr.bf16.mxu0 %v14404_v20  ;;  %v5824_v24 = vrot.slane %v5660_v58, 1  ;;  %v14420_v8 = vpack.c.bf16 %v6371_v59, %v6369_v12  ;;  %v6374_v6 = vsel %vm1007_vm3, %v6372_v45, %v6373_v62  ;;  %v14437_v12 = vld [vmem:[#allocation2] sm:$0xff]  ;;  %v14443_v59 = vld [vmem:[#allocation3 + $0x180] sm:$0xff] }
 0x530   : > { %v6376_v29 = vsel %vm1007_vm3, %v6373_v62, %v6375_v52  ;;  %v5661_v51 = vld [vmem:[#allocation3 + $0x170] sm:$0xff]  ;;  %v5662_v13 = vld [vmem:[#allocation3 + $0x178] sm:$0x3]  ;;  %v6379_v16 = vsel %vm1007_vm3, %v6377_v11, %v6378_v25  ;;  %v6381_v7 = vsel %vm1007_vm3, %v6378_v25, %v6380_v18  ;;  %v6383_v19 = vrot.slane %v14381_v0, 2  ;;  %v14445_v18 = vld [vmem:[#allocation3 + $0x188] sm:$0xff]  ;;  %10952 = vmatprep.mubr.msk.f32.mxu1 %vm12047_vm4, %v14437_v12 }
 0x531   : > { %v14424_v63 = vpack.c.bf16 %v6376_v29, %v6374_v6  ;;  %v5825_v40 = vrot.slane %v5661_v51, 1  ;;  %v5827_v35 = vrot.slane %v5662_v13, 1  ;;  %v14429_v47 = vpack.c.bf16 %v5661_v51, %v5660_v58 }
 0x532   : > { %v14431_v23 = vpack.c.bf16 %v6381_v7, %v6379_v16  ;;  %v6384_v48 = vsel %vm1007_vm3, %v6382_v39, %v6383_v19  ;;  %v6385_v61 = vrot.slane %v14383_v4, 2  ;;  %v6387_v45 = vrot.slane %v5660_v58, 2  ;;  %v14447_v39 = vld [vmem:[#allocation3 + $0x190] sm:$0x3] }
 0x533   : > { %v6388_v62 = vrot.slane %v5661_v51, 2  ;;  %v5826_v52 = vsel %vm450_vm1, %v5824_v24, %v5825_v40  ;;  %v5828_v11 = vsel %vm450_vm1, %v5825_v40, %v5827_v35  ;;  %v14441_v0 = vpack.c.bf16 %v14437_v12, %v14437_v12 }
 0x534   : > { %v6390_v25 = vrot.slane %v5662_v13, 2  ;;  %v14449_v4 = vpack.c.bf16 %v5828_v11, %v5826_v52  ;;  %v6386_v58 = vsel %vm1007_vm3, %v6383_v19, %v6385_v61  ;;  %v7226_v13 = vrot.slane %v14443_v59, 2  ;;  %v11892_v61 = vld [vmem:[%s14921_s5 + $0x90] sm:$0xff]   ;;  %v11897_v11 = vld [vmem:[%s14921_s5 + $0xb8] sm:$0xff]  }
 0x535   : > { %v6389_v24 = vsel %vm1007_vm3, %v6387_v45, %v6388_v62  ;;  %v14453_v6 = vpack.c.bf16 %v6386_v58, %v6384_v48  ;;  %v7227_v16 = vrot.slane %v14445_v18, 2  ;;  %v7229_v7 = vrot.slane %v14447_v39, 2  ;;  %v11891_v48 = vld [vmem:[%s14921_s5 + $0x88] sm:$0xff]   ;;  %v11893_v45 = vld [vmem:[%s14921_s5 + $0x98] sm:$0xff]   ;;  %v11896_v52 = vld [vmem:[%s14921_s5 + $0xb0] sm:$0xff]  }
 0x536   : > { %v6391_v29 = vsel %vm1007_vm3, %v6388_v62, %v6390_v25  ;;  %10533 = vmatmul.mubr.bf16.gmra.mrb[60].mxu0 %v14449_v4  ;;  %v11895_v62 = vld [vmem:[%s14921_s5 + $0xa8] sm:$0xff]   ;;  %v11898_v25 = vld [vmem:[%s14921_s5 + $0xc0] sm:$0xff]   ;;  %v14505_v58 = vrot.slane %v14437_v12, 2 }
 0x537   : > { %v14457_v51 = vpack.c.bf16 %v6391_v29, %v6389_v24  ;;  %10552 = vmatprep.mubr.bf16.mxu0 %v14441_v0  ;;  %v7228_v19 = vsel %vm1007_vm3, %v7226_v13, %v7227_v16  ;;  %v7230_v40 = vsel %vm1007_vm3, %v7227_v16, %v7229_v7  ;;  %v6315_v24 = vrot.slane %v14039_v15, 2  ;;  %v11899_v16 = vld [vmem:[%s14921_s5 + $0xc8] sm:$0xff]   ;;  %v11900_v15 = vld [vmem:[%s14921_s5 + $0xd0] sm:$0xff]   ;;  %v11901_v7 = vld [vmem:[%s14921_s5 + $0xd8] sm:$0xff]  }
 0x538   : > { %v14465_v35 = vpack.c.bf16 %v7230_v40, %v7228_v19  ;;  %v11902_v19 = vld [vmem:[%s14921_s5 + $0xe0] sm:$0xff]   ;;  %v11903_v40 = vld [vmem:[%s14921_s5 + $0xe8] sm:$0xff]  }
 0x539   : > { %v6316_v29 = vsel %vm1007_vm3, %v14505_v58, %v6315_v24  ;;  %v11913_v24 = vld [vmem:[%s14921_s5 + $0x138] sm:$0xff]  }
 0x53a   : > { %v6424_v13 = vpack.c.bf16 %v6316_v29, %v14505_v58  ;;  %v11914_v29 = vld [vmem:[%s14921_s5 + $0x140] sm:$0xff]  }
 0x53e   : > { %10553 = vmatmul.mubr.bf16.vlgmr.msra.gmra.mrb[32].mxu0 %v14075_v14 }
 0x53f   : > { %10585 = vmatpush3.bf16.msra.mxu0 %v14290_v50  ;;  %10556 = vmatprep.mubr.bf16.mxu0 %v14073_v17  ;;  %v11894_v50 = vld [vmem:[%s14921_s5 + $0xa0] sm:$0xff]  }
 0x540   : > { %10586 = vmatprep.subr.bf16.mxu0 %v11891_v48 }
 0x543   : > { %10587 = vmatpush3.bf16.msra.mxu0 %v11891_v48  ;;  %v11904_v48 = vld [vmem:[%s14921_s5 + $0xf0] sm:$0xff]  }
 0x544   : > { %10588 = vmatprep.subr.bf16.mxu0 %v11892_v61 }
 0x546   : > { %10557 = vmatmul.mubr.bf16.gmra.mrb[36].mxu0 %v14128_v1 }
 0x547   : > { %10560 = vmatprep.mubr.bf16.mxu0 %v14120_v43  ;;  %10589 = vmatpush3.bf16.msra.mxu0 %v11892_v61  ;;  %v11905_v61 = vld [vmem:[%s14921_s5 + $0xf8] sm:$0xff]  }
 0x548   : > { %10590 = vmatprep.subr.bf16.mxu0 %v11893_v45 }
 0x54b   : > { %10591 = vmatpush3.bf16.msra.mxu0 %v11893_v45  ;;  %v11906_v45 = vld [vmem:[%s14921_s5 + $0x100] sm:$0xff]  }
 0x54c   : > { %10592 = vmatprep.subr.bf16.mxu0 %v11894_v50 }
 0x54e   : > { %10561 = vmatmul.mubr.bf16.gmra.mrb[40].mxu0 %v14184_v10 }
 0x54f   : > { %10564 = vmatprep.mubr.bf16.mxu0 %v14177_v41  ;;  %10593 = vmatpush3.bf16.msra.mxu0 %v11894_v50  ;;  %v11907_v50 = vld [vmem:[%s14921_s5 + $0x108] sm:$0xff]  }
 0x550   : > { %10594 = vmatprep.subr.bf16.mxu0 %v11895_v62 }
 0x553   : > { %10595 = vmatpush3.bf16.msra.mxu0 %v11895_v62  ;;  %v11908_v62 = vld [vmem:[%s14921_s5 + $0x110] sm:$0xff]  }
 0x554   : > { %10596 = vmatprep.subr.bf16.mxu0 %v11896_v52 }
 0x556   : > { %10565 = vmatmul.mubr.bf16.gmra.mrb[44].mxu0 %v14242_v37 }
 0x557   : > { %10568 = vmatprep.mubr.bf16.mxu0 %v14234_v57  ;;  %10597 = vmatpush3.bf16.msra.mxu0 %v11896_v52  ;;  %v11910_v52 = vld [vmem:[%s14921_s5 + $0x120] sm:$0xff]  }
 0x558   : > { %10598 = vmatprep.subr.bf16.mxu0 %v11897_v11 }
 0x55b   : > { %10599 = vmatpush3.bf16.msra.mxu0 %v11897_v11  ;;  %v11911_v11 = vld [vmem:[%s14921_s5 + $0x128] sm:$0xff]  }
 0x55c   : > { %10632 = vmatprep.subr.bf16.mxu0 %v11898_v25 }
 0x55e   : > { %10569 = vmatmul.mubr.bf16.gmra.mrb[48].mxu0 %v14301_v3 }
 0x55f   : > { %10572 = vmatprep.mubr.bf16.mxu0 %v14294_v33 }
 0x566   : > { %10573 = vmatmul.mubr.bf16.gmra.mrb[52].mxu0 %v14354_v36 }
 0x567   : > { %10576 = vmatprep.mubr.bf16.mxu0 %v14347_v28 }
 0x56e   : > { %10577 = vmatmul.mubr.bf16.gmra.mrb[56].mxu0 %v14395_v46 }
 0x56f   : > { %10580 = vmatprep.mubr.bf16.mxu0 %v14391_v21 }
 0x576   : > { %10581 = vmatmul.mubr.bf16.gmra.mrb[60].mxu0 %v14429_v47 }
 0x577   : > { %10600 = vmatprep.mubr.bf16.mxu0 %v6424_v13  ;;  %v14594_v13 = vpack.c.bf16 %v14445_v18, %v14443_v59 }
 0x57e   : > { %10601 = vmatmul.mubr.bf16.vlgmr.msra.gmra.mrb[32].mxu0 %v14122_v38 }
 0x57f   : > { %10633 = vmatpush3.bf16.msra.mxu0 %v11898_v25  ;;  %10604 = vmatprep.mubr.bf16.mxu0 %v14150_v9  ;;  %v11912_v25 = vld [vmem:[%s14921_s5 + $0x130] sm:$0xff]  }
 0x580   : > { %10634 = vmatprep.subr.bf16.mxu0 %v11899_v16 }
 0x583   : > { %10635 = vmatpush3.bf16.msra.mxu0 %v11899_v16  ;;  %v11915_v16 = vld [vmem:[%s14921_s5 + $0x148] sm:$0xff]  }
 0x584   : > { %10636 = vmatprep.subr.bf16.mxu0 %v11900_v15 }
 0x586   : > { %10605 = vmatmul.mubr.bf16.gmra.mrb[36].mxu0 %v14190_v32 }
 0x587   : > { %10608 = vmatprep.mubr.bf16.mxu0 %v14236_v2  ;;  %10637 = vmatpush3.bf16.msra.mxu0 %v11900_v15  ;;  %v11916_v15 = vld [vmem:[%s14921_s5 + $0x150] sm:$0xff]  }
 0x588   : > { %10638 = vmatprep.subr.bf16.mxu0 %v11901_v7 }
 0x58b   : > { %10639 = vmatpush3.bf16.msra.mxu0 %v11901_v7  ;;  %v11918_v7 = vld [vmem:[%s14921_s5 + $0x160] sm:$0xff]  }
 0x58c   : > { %10640 = vmatprep.subr.bf16.mxu0 %v11902_v19 }
 0x58e   : > { %10609 = vmatmul.mubr.bf16.gmra.mrb[40].mxu0 %v14260_v44 }
 0x58f   : > { %10612 = vmatprep.mubr.bf16.mxu0 %v14303_v54  ;;  %10641 = vmatpush3.bf16.msra.mxu0 %v11902_v19  ;;  %v11919_v19 = vld [vmem:[%s14921_s5 + $0x168] sm:$0xff]  }
 0x590   : > { %10642 = vmatprep.subr.bf16.mxu0 %v11903_v40 }
 0x593   : > { %10643 = vmatpush3.bf16.msra.mxu0 %v11903_v40  ;;  %v11920_v40 = vld [vmem:[%s14921_s5 + $0x170] sm:$0xff]  }
 0x594   : > { %10644 = vmatprep.subr.bf16.mxu0 %v11904_v48 }
 0x596   : > { %10613 = vmatmul.mubr.bf16.gmra.mrb[44].mxu0 %v14336_v27 }
 0x597   : > { %10616 = vmatprep.mubr.bf16.mxu0 %v14356_v53  ;;  %10645 = vmatpush3.bf16.msra.mxu0 %v11904_v48  ;;  %v11921_v48 = vld [vmem:[%s14921_s5 + $0x178] sm:$0xff]  }
 0x598   : > { %10646 = vmatprep.subr.bf16.mxu0 %v11905_v61 }
 0x59b   : > { %10647 = vmatpush3.bf16.msra.mxu0 %v11905_v61  ;;  %v15103_v61 = vld [vmem:[#allocation28_spill] sm:$0xff] }
 0x59c   : > { %10680 = vmatprep.subr.bf16.mxu0 %v11906_v45 }
 0x59e   : > { %10617 = vmatmul.mubr.bf16.gmra.mrb[48].mxu0 %v14393_v22 }
 0x59f   : > { %10620 = vmatprep.mubr.bf16.mxu0 %v14406_v30 }
 0x5a6   : > { %10621 = vmatmul.mubr.bf16.gmra.mrb[52].mxu0 %v14420_v8 }
 0x5a7   : > { %10624 = vmatprep.mubr.bf16.mxu0 %v14424_v63 }
 0x5ae   : > { %10625 = vmatmul.mubr.bf16.gmra.mrb[56].mxu0 %v14431_v23 }
 0x5af   : > { %10628 = vmatprep.mubr.bf16.mxu0 %v14453_v6 }
 0x5b6   : > { %10629 = vmatmul.mubr.bf16.gmra.mrb[60].mxu0 %v14457_v51 }
 0x5b7   : > { %10648 = vmatprep.mubr.bf16.mxu0 %v14075_v14  ;;  %v11909_v14 = vld [vmem:[%s14921_s5 + $0x118] sm:$0xff]  }
 0x5be   : > { %10649 = vmatmul.mubr.bf16.vlgmr.msra.gmra.mrb[32].mxu0 %v14073_v17 }
 0x5bf   : > { %10681 = vmatpush3.bf16.msra.mxu0 %v11906_v45  ;;  %10652 = vmatprep.mubr.bf16.mxu0 %v14128_v1  ;;  %v11922_v45 = vld [vmem:[%s14921_s5 + $0x180] sm:$0xff]  }
 0x5c0   : > { %10682 = vmatprep.subr.bf16.mxu0 %v11907_v50 }
 0x5c3   : > { %10683 = vmatpush3.bf16.msra.mxu0 %v11907_v50  ;;  %v15104_v50 = vld [vmem:[#allocation27_spill] sm:$0xff] }
 0x5c4   : > { %10684 = vmatprep.subr.bf16.mxu0 %v11908_v62 }
 0x5c6   : > { %10653 = vmatmul.mubr.bf16.gmra.mrb[36].mxu0 %v14120_v43 }
 0x5c7   : > { %10656 = vmatprep.mubr.bf16.mxu0 %v14184_v10  ;;  %10685 = vmatpush3.bf16.msra.mxu0 %v11908_v62  ;;  %v15105_v62 = vld [vmem:[#allocation12_spill] sm:$0xff] }
 0x5c8   : > { %10686 = vmatprep.subr.bf16.mxu0 %v11909_v14 }
 0x5cb   : > { %10687 = vmatpush3.bf16.msra.mxu0 %v11909_v14  ;;  %v15106_v14 = vld [vmem:[#allocation10_spill] sm:$0xff] }
 0x5cc   : > { %10688 = vmatprep.subr.bf16.mxu0 %v11910_v52 }
 0x5ce   : > { %10657 = vmatmul.mubr.bf16.gmra.mrb[40].mxu0 %v14177_v41 }
 0x5cf   : > { %10660 = vmatprep.mubr.bf16.mxu0 %v14242_v37  ;;  %10689 = vmatpush3.bf16.msra.mxu0 %v11910_v52  ;;  %v6961_v52 = vrot.slane %v14445_v18, 1  ;;  %v11923_v18 = vld [vmem:[%s14921_s5 + $0x188] sm:$0xff]  }
 0x5d0   : > { %10690 = vmatprep.subr.bf16.mxu0 %v11911_v11 }
 0x5d3   : > { %10691 = vmatpush3.bf16.msra.mxu0 %v11911_v11  ;;  %v6963_v11 = vrot.slane %v14447_v39, 1  ;;  %v11926_v39 = vld [vmem:[%s14921_s5 + $0x1a0] sm:$0xff]  }
 0x5d4   : > { %10692 = vmatprep.subr.bf16.mxu0 %v11912_v25 }
 0x5d6   : > { %10661 = vmatmul.mubr.bf16.gmra.mrb[44].mxu0 %v14234_v57 }
 0x5d7   : > { %10664 = vmatprep.mubr.bf16.mxu0 %v14301_v3  ;;  %10693 = vmatpush3.bf16.msra.mxu0 %v11912_v25  ;;  %v6960_v25 = vrot.slane %v14443_v59, 1  ;;  %v11924_v59 = vld [vmem:[%s14921_s5 + $0x190] sm:$0xff]  }
 0x5d8   : > { %10694 = vmatprep.subr.bf16.mxu0 %v11913_v24 }
 0x5db   : > { %10695 = vmatpush3.bf16.msra.mxu0 %v11913_v24  ;;  %v6962_v24 = vsel %vm450_vm1, %v6960_v25, %v6961_v52 }
 0x5dc   : > { %10728 = vmatprep.subr.bf16.mxu0 %v11914_v29 }
 0x5de   : > { %10665 = vmatmul.mubr.bf16.gmra.mrb[48].mxu0 %v14294_v33 }
 0x5df   : > { %10668 = vmatprep.mubr.bf16.mxu0 %v14354_v36 }
 0x5e6   : > { %10669 = vmatmul.mubr.bf16.gmra.mrb[52].mxu0 %v14347_v28 }
 0x5e7   : > { %10672 = vmatprep.mubr.bf16.mxu0 %v14395_v46 }
 0x5ee   : > { %10673 = vmatmul.mubr.bf16.gmra.mrb[56].mxu0 %v14391_v21 }
 0x5ef   : > { %10676 = vmatprep.mubr.bf16.mxu0 %v14429_v47 }
 0x5f6   : > { %10677 = vmatmul.mubr.bf16.gmra.mrb[60].mxu0 %v14594_v13 }
 0x5f7   : > { %10696 = vmatprep.mubr.bf16.mxu0 %v14086_v26  ;;  %v11917_v26 = vld [vmem:[%s14921_s5 + $0x158] sm:$0xff]  }
 0x5fe   : > { %10697 = vmatmul.mubr.bf16.vlgmr.msra.gmra.mrb[32].mxu0 %v14083_v49 }
 0x5ff   : > { %10729 = vmatpush3.bf16.msra.mxu0 %v11914_v29  ;;  %10700 = vmatprep.mubr.bf16.mxu0 %v14141_v42  ;;  %v6964_v29 = vsel %vm450_vm1, %v6961_v52, %v6963_v11 }
 0x600   : > { %10730 = vmatprep.subr.bf16.mxu0 %v11915_v16 }
 0x603   : > { %10731 = vmatpush3.bf16.msra.mxu0 %v11915_v16  ;;  %v14641_v16 = vpack.c.bf16 %v6964_v29, %v6962_v24 }
 0x604   : > { %10732 = vmatprep.subr.bf16.mxu0 %v11916_v15 }
 0x606   : > { %10701 = vmatmul.mubr.bf16.gmra.mrb[36].mxu0 %v14138_v56 }
 0x607   : > { %10704 = vmatprep.mubr.bf16.mxu0 %v14198_v5  ;;  %10733 = vmatpush3.bf16.msra.mxu0 %v11916_v15  ;;  %v11927_v15 = vld [vmem:[%s14921_s5 + $0x1a8] sm:$0xff]  }
 0x608   : > { %10734 = vmatprep.subr.bf16.mxu0 %v11917_v26 }
 0x60b   : > { %10735 = vmatpush3.bf16.msra.mxu0 %v11917_v26  ;;  %v11928_v26 = vld [vmem:[%s14921_s5 + $0x1b0] sm:$0xff]  }
 0x60c   : > { %10736 = vmatprep.subr.bf16.mxu0 %v11918_v7 }
 0x60e   : > { %10705 = vmatmul.mubr.bf16.gmra.mrb[40].mxu0 %v14195_v34 }
 0x60f   : > { %10708 = vmatprep.mubr.bf16.mxu0 %v14255_v31  ;;  %10737 = vmatpush3.bf16.msra.mxu0 %v11918_v7  ;;  %v11929_v7 = vld [vmem:[%s14921_s5 + $0x1b8] sm:$0xff]  }
 0x610   : > { %10738 = vmatprep.subr.bf16.mxu0 %v11919_v19 }
 0x613   : > { %10739 = vmatpush3.bf16.msra.mxu0 %v11919_v19  ;;  %v11930_v19 = vld [vmem:[%s14921_s5 + $0x1c0] sm:$0xff]  }
 0x614   : > { %10740 = vmatprep.subr.bf16.mxu0 %v11920_v40 }
 0x616   : > { %10709 = vmatmul.mubr.bf16.gmra.mrb[44].mxu0 %v14252_v60 }
 0x617   : > { %10712 = vmatprep.mubr.bf16.mxu0 %v15103_v61  ;;  %10741 = vmatpush3.bf16.msra.mxu0 %v11920_v40  ;;  %v11931_v40 = vld [vmem:[%s14921_s5 + $0x1c8] sm:$0xff]  }
 0x618   : > { %10742 = vmatprep.subr.bf16.mxu0 %v11921_v48 }
 0x61b   : > { %10743 = vmatpush3.bf16.msra.mxu0 %v11921_v48  ;;  %v11932_v48 = vld [vmem:[%s14921_s5 + $0x1d0] sm:$0xff]  }
 0x61c   : > { %10776 = vmatprep.subr.bf16.mxu0 %v11922_v45 }
 0x61e   : > { %10713 = vmatmul.mubr.bf16.gmra.mrb[48].mxu0 %v15104_v50 }
 0x61f   : > { %10716 = vmatprep.mubr.bf16.mxu0 %v15105_v62 }
 0x626   : > { %10717 = vmatmul.mubr.bf16.gmra.mrb[52].mxu0 %v15106_v14 }
 0x627   : > { %10720 = vmatprep.mubr.bf16.mxu0 %v14408_v55 }
 0x62e   : > { %10721 = vmatmul.mubr.bf16.gmra.mrb[56].mxu0 %v14404_v20 }
 0x62f   : > { %10724 = vmatprep.mubr.bf16.mxu0 %v14449_v4 }
 0x636   : > { %10725 = vmatmul.mubr.bf16.gmra.mrb[60].mxu0 %v14641_v16 }
 0x637   : > { %10744 = vmatprep.mubr.bf16.mxu0 %v14122_v38  ;;  %v11925_v38 = vld [vmem:[%s14921_s5 + $0x198] sm:$0xff]  }
 0x63e   : > { %10745 = vmatmul.mubr.bf16.vlgmr.msra.gmra.mrb[32].mxu0 %v14150_v9 }
 0x63f   : > { %10777 = vmatpush3.bf16.msra.mxu0 %v11922_v45  ;;  %10748 = vmatprep.mubr.bf16.mxu0 %v14190_v32  ;;  %v8442_v45 = vld [vmem:[%s14923_s7 + $0x70] sm:$0xff] }
 0x640   : > { %10778 = vmatprep.subr.bf16.mxu0 %v11923_v18 }
 0x643   : > { %10779 = vmatpush3.bf16.msra.mxu0 %v11923_v18  ;;  %v11949_v18 = vld [vmem:[#allocation2 + $0x19] sm:$0xff] }
 0x644   : > { %10780 = vmatprep.subr.bf16.mxu0 %v11924_v59 }
 0x646   : > { %10749 = vmatmul.mubr.bf16.gmra.mrb[36].mxu0 %v14236_v2 }
 0x647   : > { %10752 = vmatprep.mubr.bf16.mxu0 %v14260_v44  ;;  %10781 = vmatpush3.bf16.msra.mxu0 %v11924_v59 }
 0x648   : > { %10782 = vmatprep.subr.bf16.mxu0 %v11925_v38 }
 0x64b   : > { %10783 = vmatpush3.bf16.msra.mxu0 %v11925_v38 }
 0x64c   : > { %10784 = vmatprep.subr.bf16.mxu0 %v11926_v39 }
 0x64e   : > { %10753 = vmatmul.mubr.bf16.gmra.mrb[40].mxu0 %v14303_v54 }
 0x64f   : > { %10756 = vmatprep.mubr.bf16.mxu0 %v14336_v27  ;;  %10785 = vmatpush3.bf16.msra.mxu0 %v11926_v39  ;;  %v11950_v39 = vld [vmem:[#allocation2 + $0x31] sm:$0xff] }
 0x650   : > { %10786 = vmatprep.subr.bf16.mxu0 %v11927_v15 }
 0x653   : > { %10787 = vmatpush3.bf16.msra.mxu0 %v11927_v15 }
 0x654   : > { %10788 = vmatprep.subr.bf16.mxu0 %v11928_v26 }
 0x656   : > { %10757 = vmatmul.mubr.bf16.gmra.mrb[44].mxu0 %v14356_v53 }
 0x657   : > { %10760 = vmatprep.mubr.bf16.mxu0 %v14393_v22  ;;  %10789 = vmatpush3.bf16.msra.mxu0 %v11928_v26  ;;  %v11951_v26 = vld [vmem:[#allocation2 + $0x21] sm:$0xff] }
 0x658   : > { %10790 = vmatprep.subr.bf16.mxu0 %v11929_v7 }
 0x65b   : > { %10791 = vmatpush3.bf16.msra.mxu0 %v11929_v7 }
 0x65c   : > { %10824 = vmatprep.subr.bf16.mxu0 %v11930_v19 }
 0x65e   : > { %10761 = vmatmul.mubr.bf16.gmra.mrb[48].mxu0 %v14406_v30 }
 0x65f   : > { %10764 = vmatprep.mubr.bf16.mxu0 %v14420_v8 }
 0x666   : > { %10765 = vmatmul.mubr.bf16.gmra.mrb[52].mxu0 %v14424_v63 }
 0x667   : > { %10768 = vmatprep.mubr.bf16.mxu0 %v14431_v23 }
 0x66e   : > { %10769 = vmatmul.mubr.bf16.gmra.mrb[56].mxu0 %v14453_v6 }
 0x66f   : > { %10772 = vmatprep.mubr.bf16.mxu0 %v14457_v51 }
 0x676   : > { %10773 = vmatmul.mubr.bf16.gmra.mrb[60].mxu0 %v14465_v35 }
 0x677   : > { %10792 = vmatprep.mubr.bf16.mxu0 %v14073_v17  ;;  %v11933_v17 = vld [vmem:[%s14921_s5 + $0x1d8] sm:$0xff]  }
 0x67e   : > { %10793 = vmatmul.mubr.bf16.vlgmr.msra.gmra.mrb[32].mxu0 %v14128_v1  ;;  %v11935_v1 = vld [vmem:[%s14921_s5 + $0x1e8] sm:$0xff]  }
 0x67f   : > { %10825 = vmatpush3.bf16.msra.mxu0 %v11930_v19  ;;  %10796 = vmatprep.mubr.bf16.mxu0 %v14120_v43  ;;  %v11934_v43 = vld [vmem:[%s14921_s5 + $0x1e0] sm:$0xff]  }
 0x680   : > { %10826 = vmatprep.subr.bf16.mxu0 %v11931_v40  ;;  %v11952_v19 = vld [vmem:[#allocation2 + $0x39] sm:$0xff] }
 0x683   : > { %10827 = vmatpush3.bf16.msra.mxu0 %v11931_v40 }
 0x684   : > { %10828 = vmatprep.subr.bf16.mxu0 %v11932_v48 }
 0x686   : > { %10797 = vmatmul.mubr.bf16.gmra.mrb[36].mxu0 %v14184_v10  ;;  %v11937_v10 = vld [vmem:[%s14921_s5 + $0x1f8] sm:$0xff]  }
 0x687   : > { %10800 = vmatprep.mubr.bf16.mxu0 %v14177_v41  ;;  %10829 = vmatpush3.bf16.msra.mxu0 %v11932_v48  ;;  %v11936_v41 = vld [vmem:[%s14921_s5 + $0x1f0] sm:$0xff]  }
 0x688   : > { %10830 = vmatprep.subr.bf16.mxu0 %v11933_v17 }
 0x68b   : > { %10831 = vmatpush3.bf16.msra.mxu0 %v11933_v17 }
 0x68c   : > { %10832 = vmatprep.subr.bf16.mxu0 %v11934_v43 }
 0x68e   : > { %10801 = vmatmul.mubr.bf16.gmra.mrb[40].mxu0 %v14242_v37  ;;  %v11939_v37 = vld [vmem:[%s14921_s5 + $0x208] sm:$0xff]  }
 0x68f   : > { %10804 = vmatprep.mubr.bf16.mxu0 %v14234_v57  ;;  %10833 = vmatpush3.bf16.msra.mxu0 %v11934_v43  ;;  %v11938_v57 = vld [vmem:[%s14921_s5 + $0x200] sm:$0xff]  }
 0x690   : > { %10834 = vmatprep.subr.bf16.mxu0 %v11935_v1 }
 0x693   : > { %10835 = vmatpush3.bf16.msra.mxu0 %v11935_v1 }
 0x694   : > { %10836 = vmatprep.subr.bf16.mxu0 %v11936_v41 }
 0x696   : > { %10805 = vmatmul.mubr.bf16.gmra.mrb[44].mxu0 %v14301_v3 }
 0x697   : > { %10808 = vmatprep.mubr.bf16.mxu0 %v14294_v33  ;;  %10837 = vmatpush3.bf16.msra.mxu0 %v11936_v41  ;;  %v11940_v33 = vld [vmem:[%s14921_s5 + $0x210] sm:$0xff]  }
 0x698   : > { %10838 = vmatprep.subr.bf16.mxu0 %v11937_v10 }
 0x69b   : > { %10839 = vmatpush3.bf16.msra.mxu0 %v11937_v10 }
 0x69c   : > { %10872 = vmatprep.subr.bf16.mxu0 %v11938_v57 }
 0x69e   : > { %10809 = vmatmul.mubr.bf16.gmra.mrb[48].mxu0 %v14354_v36 }
 0x69f   : > { %10812 = vmatprep.mubr.bf16.mxu0 %v14347_v28 }
 0x6a6   : > { %10813 = vmatmul.mubr.bf16.gmra.mrb[52].mxu0 %v14395_v46  ;;  %v8432_v46 = vld [vmem:[%s14923_s7 + $0x20] sm:$0xff] }
 0x6a7   : > { %10816 = vmatprep.mubr.bf16.mxu0 %v14391_v21  ;;  %v8431_v21 = vld [vmem:[%s14923_s7 + $0x18] sm:$0xff] }
 0x6ae   : > { %10817 = vmatmul.mubr.bf16.gmra.mrb[56].mxu0 %v14429_v47 }
 0x6af   : > { %10820 = vmatprep.mubr.bf16.mxu0 %v14594_v13  ;;  %v8441_v13 = vld [vmem:[%s14923_s7 + $0x68] sm:$0xff] }
 0x6b6   : > { %10821 = vmatmul.mubr.bf16.gmra.mrb[60].mxu0 %v14441_v0  ;;  %v8437_v0 = vld [vmem:[%s14923_s7 + $0x48] sm:$0xff] }
 0x6b7   : > { %10840 = vmatprep.mubr.bf16.mxu0 %v14083_v49  ;;  %v11941_v49 = vld [vmem:[%s14921_s5 + $0x218] sm:$0xff]  }
 0x6be   : > { %10841 = vmatmul.mubr.bf16.vlgmr.msra.gmra.mrb[32].mxu0 %v14141_v42  ;;  %v11943_v42 = vld [vmem:[%s14921_s5 + $0x228] sm:$0xff]  }
 0x6bf   : > { %10873 = vmatpush3.bf16.msra.mxu0 %v11938_v57  ;;  %10844 = vmatprep.mubr.bf16.mxu0 %v14138_v56  ;;  %v11942_v56 = vld [vmem:[%s14921_s5 + $0x220] sm:$0xff]  }
 0x6c0   : > { %10874 = vmatprep.subr.bf16.mxu0 %v11939_v37 }
 0x6c3   : > { %10875 = vmatpush3.bf16.msra.mxu0 %v11939_v37 }
 0x6c4   : > { %10876 = vmatprep.subr.bf16.mxu0 %v11940_v33 }
 0x6c6   : > { %10845 = vmatmul.mubr.bf16.gmra.mrb[36].mxu0 %v14198_v5  ;;  %v11945_v5 = vld [vmem:[%s14921_s5 + $0x238] sm:$0xff]  }
 0x6c7   : > { %10848 = vmatprep.mubr.bf16.mxu0 %v14195_v34  ;;  %10877 = vmatpush3.bf16.msra.mxu0 %v11940_v33  ;;  %v11944_v34 = vld [vmem:[%s14921_s5 + $0x230] sm:$0xff]  }
 0x6c8   : > { %10878 = vmatprep.subr.bf16.mxu0 %v11941_v49 }
 0x6cb   : > { %10879 = vmatpush3.bf16.msra.mxu0 %v11941_v49 }
 0x6cc   : > { %10880 = vmatprep.subr.bf16.mxu0 %v11942_v56 }
 0x6ce   : > { %10849 = vmatmul.mubr.bf16.gmra.mrb[40].mxu0 %v14255_v31  ;;  %v7754_v31 = vrot.slane %v14437_v12, 1 }
 0x6cf   : > { %10852 = vmatprep.mubr.bf16.mxu0 %v14252_v60  ;;  %10881 = vmatpush3.bf16.msra.mxu0 %v11942_v56  ;;  %v5668_v60 = vld [vmem:[#allocation3 + $0x1a8] sm:$0x3] }
 0x6d0   : > { %10882 = vmatprep.subr.bf16.mxu0 %v11943_v42  ;;  %v7757_v3 = vrot.slane %v5668_v60, 1 }
 0x6d2   : > { %v7758_v28 = vsel %vm450_vm1, %v7754_v31, %v7757_v3  ;;  %v11954_v3 = vld [vmem:[#allocation2 + $0x61] sm:$0xff] }
 0x6d3   : > { %10883 = vmatpush3.bf16.msra.mxu0 %v11943_v42  ;;  %v7761_v36 = vpack.c.bf16 %v7758_v28, %v7754_v31 }
 0x6d4   : > { %10884 = vmatprep.subr.bf16.mxu0 %v11944_v34 }
 0x6d6   : > { %10853 = vmatmul.mubr.bf16.gmra.mrb[44].mxu0 %v15103_v61 }
 0x6d7   : > { %10856 = vmatprep.mubr.bf16.mxu0 %v15104_v50  ;;  %10885 = vmatpush3.bf16.msra.mxu0 %v11944_v34  ;;  %v8443_v50 = vld [vmem:[%s14923_s7 + $0x78] sm:$0xff]  ;;  %v11953_v34 = vld [vmem:[#allocation2 + $0x49] sm:$0xff] }
 0x6d8   : > { %10886 = vmatprep.subr.bf16.mxu0 %v11945_v5 }
 0x6db   : > { %10887 = vmatpush3.bf16.msra.mxu0 %v11945_v5 }
 0x6de   : > { %10857 = vmatmul.mubr.bf16.gmra.mrb[48].mxu0 %v15105_v62  ;;  %v10977_v62 = vpack.c.bf16 %v8443_v50, %v8442_v45  ;;  %v11959_v45 = vld [vmem:[#allocation2 + $0x81] sm:$0xff] }
 0x6df   : > { %10860 = vmatprep.mubr.bf16.mxu0 %v15106_v14  ;;  %v14832_v14 = vld [vmem:[%s14922_s6] ss:$0 sm:$0xff] }
 0x6e6   : > { %10861 = vmatmul.mubr.bf16.gmra.mrb[52].mxu0 %v14408_v55  ;;  %v12046_v55 = vmov 0.0|0.0  }
 0x6e7   : > { %10864 = vmatprep.mubr.bf16.mxu0 %v14404_v20  ;;  %10955 = vmatprep.subr.bf16.mxu1 %v12046_v55  ;;  %v8433_v20 = vld [vmem:[%s14923_s7 + $0x28] sm:$0xff] }
 0x6ee   : > { %10865 = vmatmul.mubr.bf16.gmra.mrb[56].mxu0 %v14449_v4 }
 0x6ef   : > { %10868 = vmatprep.mubr.bf16.mxu0 %v14641_v16 }
 0x6f6   : > { %10869 = vmatmul.mubr.bf16.gmra.mrb[60].mxu0 %v7761_v36 }
 0x6f7   : > { %10888 = vmatprep.mubr.bf16.mxu0 %v14150_v9  ;;  %v8023_v9 = vrot.slane %v5668_v60, 2 }
 0x6fe   : > { %10889 = vmatmul.mubr.bf16.vlgmr.msra.gmra.mrb[32].mxu0 %v14190_v32  ;;  %v8024_v32 = vsel %vm1007_vm3, %v14505_v58, %v8023_v9 }
 0x6ff   : > { %10892 = vmatprep.mubr.bf16.mxu0 %v14236_v2  ;;  %v8027_v2 = vpack.c.bf16 %v8024_v32, %v14505_v58  ;;  %v11955_v32 = vld [vmem:[#allocation2 + $0x51] sm:$0xff] }
 0x706   : > { %10893 = vmatmul.mubr.bf16.gmra.mrb[36].mxu0 %v14260_v44  ;;  %v8428_v44 = vld [vmem:[%s14923_s7] sm:$0xff] }
 0x707   : > { %10896 = vmatprep.mubr.bf16.mxu0 %v14303_v54  ;;  %v8429_v54 = vld [vmem:[%s14923_s7 + $0x8] sm:$0xff] }
 0x70e   : > { %10897 = vmatmul.mubr.bf16.gmra.mrb[40].mxu0 %v14336_v27  ;;  %v10956_v27 = vpack.c.bf16 %v8429_v54, %v8428_v44  ;;  %v11956_v54 = vld [vmem:[#allocation2 + $0x69] sm:$0xff] }
 0x70f   : > { %10900 = vmatprep.mubr.bf16.mxu0 %v14356_v53  ;;  %v8430_v53 = vld [vmem:[%s14923_s7 + $0x10] sm:$0xff] }
 0x710   : > { %10957 = vmatpush3.bf16.msra.mxu1 %v10956_v27 }
 0x711   : > { %10958 = vmatprep.subr.bf16.mxu1 %v12046_v55 }
 0x716   : > { %10901 = vmatmul.mubr.bf16.gmra.mrb[44].mxu0 %v14393_v22  ;;  %v10959_v22 = vpack.c.bf16 %v8431_v21, %v8430_v53 }
 0x717   : > { %10904 = vmatprep.mubr.bf16.mxu0 %v14406_v30  ;;  %v10962_v30 = vpack.c.bf16 %v8433_v20, %v8432_v46 }
 0x718   : > { %10960 = vmatpush3.bf16.msra.mxu1 %v10959_v22 }
 0x719   : > { %10961 = vmatprep.subr.bf16.mxu1 %v12046_v55 }
 0x71c   : > { %10963 = vmatpush3.bf16.msra.mxu1 %v10962_v30 }
 0x71d   : > { %10964 = vmatprep.subr.bf16.mxu1 %v12046_v55 }
 0x71e   : > { %10905 = vmatmul.mubr.bf16.gmra.mrb[48].mxu0 %v14420_v8  ;;  %v8434_v8 = vld [vmem:[%s14923_s7 + $0x30] sm:$0xff] }
 0x71f   : > { %10908 = vmatprep.mubr.bf16.mxu0 %v14424_v63  ;;  %v8435_v63 = vld [vmem:[%s14923_s7 + $0x38] sm:$0xff] }
 0x720   : > { %v10965_v47 = vpack.c.bf16 %v8435_v63, %v8434_v8 }
 0x722   : > { %10966 = vmatpush3.bf16.msra.mxu1 %v10965_v47 }
 0x723   : > { %10967 = vmatprep.subr.bf16.mxu1 %v12046_v55 }
 0x726   : > { %10909 = vmatmul.mubr.bf16.gmra.mrb[52].mxu0 %v14431_v23  ;;  %v8436_v23 = vld [vmem:[%s14923_s7 + $0x40] sm:$0xff] }
 0x727   : > { %10912 = vmatprep.mubr.bf16.mxu0 %v14453_v6  ;;  %v10968_v4 = vpack.c.bf16 %v8437_v0, %v8436_v23  ;;  %v8438_v6 = vld [vmem:[%s14923_s7 + $0x50] sm:$0xff] }
 0x729   : > { %10969 = vmatpush3.bf16.msra.mxu1 %v10968_v4  ;;  %v11957_v4 = vld [vmem:[#allocation2 + $0x79] sm:$0xff] }
 0x72a   : > { %10970 = vmatprep.subr.bf16.mxu1 %v12046_v55 }
 0x72e   : > { %10913 = vmatmul.mubr.bf16.gmra.mrb[56].mxu0 %v14457_v51  ;;  %v8439_v51 = vld [vmem:[%s14923_s7 + $0x58] sm:$0xff] }
 0x72f   : > { %10916 = vmatprep.mubr.bf16.mxu0 %v14465_v35  ;;  %v8440_v35 = vld [vmem:[%s14923_s7 + $0x60] sm:$0xff]  ;;  %v10971_v58 = vpack.c.bf16 %v8439_v51, %v8438_v6 }
 0x730   : > { %v10974_v61 = vpack.c.bf16 %v8441_v13, %v8440_v35  ;;  %v11958_v35 = vld [vmem:[#allocation2 + $0x91] sm:$0xff] }
 0x731   : > { %10972 = vmatpush3.bf16.msra.mxu1 %v10971_v58 }
 0x732   : > { %10973 = vmatprep.subr.bf16.mxu1 %v12046_v55 }
 0x735   : > { %10975 = vmatpush3.bf16.msra.mxu1 %v10974_v61 }
 0x736   : > { %10917 = vmatmul.mubr.bf16.gmra.mrb[60].mxu0 %v8027_v2  ;;  %10976 = vmatprep.subr.bf16.mxu1 %v12046_v55 }
 0x739   : > { %10978 = vmatpush3.bf16.msra.mxu1 %v10977_v62  ;;  %v11960_v62 = vld [vmem:[#allocation2 + $0x99] sm:$0xff] }
 0x7d1   : > { %v10890_v12 = vpop.f32.mrb[32].mxu0 }
 0x7d2   : > { %v8127_v52 = vpop.f32.mrb[33].mxu0  ;;  %v8295_v11 = vadd.f32 %v10890_v12, %v14832_v14 }
 0x7d3   : > { %v8293_v25 = vadd.f32 %v14832_v14, %v8127_v52  ;;  %v10891_v24 = vpop.f32.mrb[34].mxu0 }
 0x7d4   : > { %v8296_v29 = vadd.f32 %v10891_v24, %v14832_v14  ;;  %v8130_v16 = vpop.f32.mrb[35].mxu0  ;;  %v8327_v15 = vadd.f32 %v11950_v39, %v8295_v11 }
 0x7d5   : > { %v8325_v59 = vadd.f32 %v11949_v18, %v8293_v25  ;;  %v8294_v38 = vadd.f32 %v14832_v14, %v8130_v16 }
 0x7d6   : > { %v8328_v40 = vadd.f32 %v11952_v19, %v8296_v29  ;;  %v8359_v41 = vmax.f32 %v8327_v15, 0.0 }
 0x7d7   : > { %v8326_v7 = vadd.f32 %v11951_v26, %v8294_v38  ;;  %v8357_v48 = vmax.f32 %v8325_v59, 0.0 }
 0x7d8   : > { %v8360_v49 = vmax.f32 %v8328_v40, 0.0 }
 0x7d9   : > { %v8358_v17 = vmax.f32 %v8326_v7, 0.0  ;;  %v10894_v43 = vpop.f32.mrb[36].mxu0  ;;  %v11961_v7 = vld [vmem:[#allocation2 + $0xa9] sm:$0xff] }
 0x7da   : > { %v8143_v1 = vpop.f32.mrb[37].mxu0  ;;  %v8299_v57 = vadd.f32 %v10894_v43, %v14832_v14 }
 0x7db   : > { %v8389_v10 = vadd.f32 %v8358_v17, %v8357_v48  ;;  %v8297_v37 = vadd.f32 %v14832_v14, %v8143_v1  ;;  %v10895_v33 = vpop.f32.mrb[38].mxu0  ;;  %v11962_v17 = vld [vmem:[#allocation2 + $0xc1] sm:$0xff] }
 0x7dc   : > { %v8146_v56 = vpop.f32.mrb[39].mxu0  ;;  %v8300_v60 = vadd.f32 %v10895_v33, %v14832_v14  ;;  %v8331_v28 = vadd.f32 %v11954_v3, %v8299_v57  ;;  %v11964_v33 = vld [vmem:[#allocation2 + $0xc9] sm:$0xff] }
 0x7dd   : > { %v8390_v42 = vadd.f32 %v8389_v10, %v8359_v41  ;;  %v8329_v5 = vadd.f32 %v11953_v34, %v8297_v37  ;;  %v8298_v31 = vadd.f32 %v14832_v14, %v8146_v56  ;;  %v11963_v10 = vld [vmem:[#allocation2 + $0xb1] sm:$0xff] }
 0x7de   : > { %v8332_v55 = vadd.f32 %v11956_v54, %v8300_v60  ;;  %v8363_v22 = vmax.f32 %v8331_v28, 0.0 }
 0x7df   : > { %v8361_v36 = vmax.f32 %v8329_v5, 0.0  ;;  %v8391_v9 = vadd.f32 %v8390_v42, %v8360_v49  ;;  %v8330_v2 = vadd.f32 %v11955_v32, %v8298_v31 }
 0x7e0   : > { %v8364_v23 = vmax.f32 %v8332_v55, 0.0 }
 0x7e1   : > { %v8392_v44 = vadd.f32 %v8391_v9, %v8361_v36  ;;  %v8362_v27 = vmax.f32 %v8330_v2, 0.0  ;;  %v10898_v53 = vpop.f32.mrb[40].mxu0 }
 0x7e2   : > { %v8159_v21 = vpop.f32.mrb[41].mxu0  ;;  %v8303_v20 = vadd.f32 %v10898_v53, %v14832_v14 }
 0x7e3   : > { %v8393_v46 = vadd.f32 %v8392_v44, %v8362_v27  ;;  %v8301_v30 = vadd.f32 %v14832_v14, %v8159_v21  ;;  %v10899_v8 = vpop.f32.mrb[42].mxu0  ;;  %v11965_v44 = vld [vmem:[#allocation2 + $0xd9] sm:$0xff]  ;;  %v11966_v27 = vld [vmem:[#allocation2 + $0xf1] sm:$0xff] }
 0x7e4   : > { %v8304_v63 = vadd.f32 %v10899_v8, %v14832_v14  ;;  %v8162_v47 = vpop.f32.mrb[43].mxu0  ;;  %v8335_v58 = vadd.f32 %v11958_v35, %v8303_v20 }
 0x7e5   : > { %v8394_v0 = vadd.f32 %v8393_v46, %v8363_v22  ;;  %v8333_v6 = vadd.f32 %v11957_v4, %v8301_v30  ;;  %v8302_v51 = vadd.f32 %v14832_v14, %v8162_v47  ;;  %v11967_v46 = vld [vmem:[#allocation2 + $0xe1] sm:$0xff]  ;;  %v11968_v30 = vld [vmem:[#allocation2 + $0xf9] sm:$0xff] }
 0x7e6   : > { %v8336_v12 = vadd.f32 %v11960_v62, %v8304_v63  ;;  %v8367_v29 = vmax.f32 %v8335_v58, 0.0 }
 0x7e7   : > { %v8365_v13 = vmax.f32 %v8333_v6, 0.0  ;;  %v8395_v61 = vadd.f32 %v8394_v0, %v8364_v23  ;;  %v8334_v50 = vadd.f32 %v11959_v45, %v8302_v51 }
 0x7e8   : > { %v8368_v39 = vmax.f32 %v8336_v12, 0.0 }
 0x7e9   : > { %v8396_v52 = vadd.f32 %v8395_v61, %v8365_v13  ;;  %v8366_v11 = vmax.f32 %v8334_v50, 0.0  ;;  %v10902_v25 = vpop.f32.mrb[44].mxu0  ;;  %v11969_v50 = vld [vmem:[#allocation2 + $0x109] sm:$0xff] }
 0x7ea   : > { %v8175_v24 = vpop.f32.mrb[45].mxu0  ;;  %v8307_v18 = vadd.f32 %v10902_v25, %v14832_v14 }
 0x7eb   : > { %v8397_v16 = vadd.f32 %v8396_v52, %v8366_v11  ;;  %v8305_v59 = vadd.f32 %v14832_v14, %v8175_v24  ;;  %v10903_v38 = vpop.f32.mrb[46].mxu0  ;;  %v11970_v11 = vld [vmem:[#allocation2 + $0x121] sm:$0xff] }
 0x7ec   : > { %v8178_v15 = vpop.f32.mrb[47].mxu0  ;;  %v8308_v40 = vadd.f32 %v10903_v38, %v14832_v14  ;;  %v8339_v43 = vadd.f32 %v11962_v17, %v8307_v18  ;;  %v11972_v38 = vld [vmem:[#allocation2 + $0x129] sm:$0xff] }
 0x7ed   : > { %v8398_v26 = vadd.f32 %v8397_v16, %v8367_v29  ;;  %v8337_v19 = vadd.f32 %v11961_v7, %v8305_v59  ;;  %v8306_v48 = vadd.f32 %v14832_v14, %v8178_v15  ;;  %v11971_v16 = vld [vmem:[#allocation2 + $0x111] sm:$0xff] }
 0x7ee   : > { %v8340_v49 = vadd.f32 %v11964_v33, %v8308_v40  ;;  %v8371_v5 = vmax.f32 %v8339_v43, 0.0 }
 0x7ef   : > { %v8369_v1 = vmax.f32 %v8337_v19, 0.0  ;;  %v8399_v41 = vadd.f32 %v8398_v26, %v8368_v39  ;;  %v8338_v57 = vadd.f32 %v11963_v10, %v8306_v48 }
 0x7f0   : > { %v8372_v32 = vmax.f32 %v8340_v49, 0.0 }
 0x7f1   : > { %v8400_v37 = vadd.f32 %v8399_v41, %v8369_v1  ;;  %v8370_v56 = vmax.f32 %v8338_v57, 0.0  ;;  %v10906_v42 = vpop.f32.mrb[48].mxu0 }
 0x7f2   : > { %v8191_v34 = vpop.f32.mrb[49].mxu0  ;;  %v8311_v31 = vadd.f32 %v10906_v42, %v14832_v14 }
 0x7f3   : > { %v8401_v60 = vadd.f32 %v8400_v37, %v8370_v56  ;;  %v8309_v3 = vadd.f32 %v14832_v14, %v8191_v34  ;;  %v10907_v28 = vpop.f32.mrb[50].mxu0  ;;  %v11973_v37 = vld [vmem:[#allocation2 + $0x139] sm:$0xff]  ;;  %v11974_v56 = vld [vmem:[#allocation2 + $0x151] sm:$0xff] }
 0x7f4   : > { %v8312_v36 = vadd.f32 %v10907_v28, %v14832_v14  ;;  %v8194_v9 = vpop.f32.mrb[51].mxu0  ;;  %v8343_v53 = vadd.f32 %v11966_v27, %v8311_v31 }
 0x7f5   : > { %v8402_v2 = vadd.f32 %v8401_v60, %v8371_v5  ;;  %v8341_v54 = vadd.f32 %v11965_v44, %v8309_v3  ;;  %v8310_v55 = vadd.f32 %v14832_v14, %v8194_v9  ;;  %v11975_v60 = vld [vmem:[#allocation2 + $0x141] sm:$0xff]  ;;  %v11976_v3 = vld [vmem:[#allocation2 + $0x159] sm:$0xff] }
 0x7f6   : > { %v8344_v8 = vadd.f32 %v11968_v30, %v8312_v36  ;;  %v8375_v4 = vmax.f32 %v8343_v53, 0.0 }
 0x7f7   : > { %v8373_v21 = vmax.f32 %v8341_v54, 0.0  ;;  %v8403_v22 = vadd.f32 %v8402_v2, %v8372_v32  ;;  %v8342_v20 = vadd.f32 %v11967_v46, %v8310_v55 }
 0x7f8   : > { %v8376_v13 = vmax.f32 %v8344_v8, 0.0 }
 0x7f9   : > { %v8404_v63 = vadd.f32 %v8403_v22, %v8373_v21  ;;  %v8374_v47 = vmax.f32 %v8342_v20, 0.0  ;;  %v10910_v23 = vpop.f32.mrb[52].mxu0  ;;  %v11977_v20 = vld [vmem:[#allocation2 + $0x169] sm:$0xff] }
 0x7fa   : > { %v8207_v0 = vpop.f32.mrb[53].mxu0  ;;  %v8315_v51 = vadd.f32 %v10910_v23, %v14832_v14 }
 0x7fb   : > { %v8405_v6 = vadd.f32 %v8404_v63, %v8374_v47  ;;  %v8313_v35 = vadd.f32 %v14832_v14, %v8207_v0  ;;  %v10911_v58 = vpop.f32.mrb[54].mxu0  ;;  %v11978_v47 = vld [vmem:[#allocation2 + $0x181] sm:$0xff] }
 0x7fc   : > { %v8210_v61 = vpop.f32.mrb[55].mxu0  ;;  %v8316_v12 = vadd.f32 %v10911_v58, %v14832_v14  ;;  %v8347_v25 = vadd.f32 %v11970_v11, %v8315_v51  ;;  %v11980_v58 = vld [vmem:[#allocation2 + $0x189] sm:$0xff] }
 0x7fd   : > { %v8406_v45 = vadd.f32 %v8405_v6, %v8375_v4  ;;  %v8345_v62 = vadd.f32 %v11969_v50, %v8313_v35  ;;  %v8314_v52 = vadd.f32 %v14832_v14, %v8210_v61  ;;  %v11979_v6 = vld [vmem:[#allocation2 + $0x171] sm:$0xff] }
 0x7fe   : > { %v8348_v39 = vadd.f32 %v11972_v38, %v8316_v12  ;;  %v8379_v19 = vmax.f32 %v8347_v25, 0.0 }
 0x7ff   : > { %v8377_v24 = vmax.f32 %v8345_v62, 0.0  ;;  %v8407_v29 = vadd.f32 %v8406_v45, %v8376_v13  ;;  %v8346_v18 = vadd.f32 %v11971_v16, %v8314_v52 }
 0x800   : > { %v8380_v10 = vmax.f32 %v8348_v39, 0.0 }
 0x801   : > { %v8408_v59 = vadd.f32 %v8407_v29, %v8377_v24  ;;  %v8378_v15 = vmax.f32 %v8346_v18, 0.0  ;;  %v10914_v26 = vpop.f32.mrb[56].mxu0 }
 0x802   : > { %v8223_v7 = vpop.f32.mrb[57].mxu0  ;;  %v8319_v48 = vadd.f32 %v10914_v26, %v14832_v14 }
 0x803   : > { %v8409_v40 = vadd.f32 %v8408_v59, %v8378_v15  ;;  %v8317_v17 = vadd.f32 %v14832_v14, %v8223_v7  ;;  %v10915_v43 = vpop.f32.mrb[58].mxu0  ;;  %v8444_v59 = vld [vmem:[%s14924_s8] sm:$0x1] }
 0x804   : > { %v8320_v1 = vadd.f32 %v10915_v43, %v14832_v14  ;;  %v8226_v41 = vpop.f32.mrb[59].mxu0  ;;  %v8351_v42 = vadd.f32 %v11974_v56, %v8319_v48 }
 0x805   : > { %v8410_v57 = vadd.f32 %v8409_v40, %v8379_v19  ;;  %v8349_v33 = vadd.f32 %v11973_v37, %v8317_v17  ;;  %v8318_v49 = vadd.f32 %v14832_v14, %v8226_v41 }
 0x806   : > { %v8352_v28 = vadd.f32 %v11976_v3, %v8320_v1  ;;  %v8383_v44 = vmax.f32 %v8351_v42, 0.0 }
 0x807   : > { %v8381_v34 = vmax.f32 %v8349_v33, 0.0  ;;  %v8411_v5 = vadd.f32 %v8410_v57, %v8380_v10  ;;  %v8350_v31 = vadd.f32 %v11975_v60, %v8318_v49 }
 0x808   : > { %v8384_v21 = vmax.f32 %v8352_v28, 0.0 }
 0x809   : > { %v8412_v36 = vadd.f32 %v8411_v5, %v8381_v34  ;;  %v8382_v9 = vmax.f32 %v8350_v31, 0.0  ;;  %v10918_v32 = vpop.f32.mrb[60].mxu0 }
 0x80a   : > { %v8239_v2 = vpop.f32.mrb[61].mxu0  ;;  %v8323_v55 = vadd.f32 %v10918_v32, %v14832_v14 }
 0x80b   : > { %v8413_v54 = vadd.f32 %v8412_v36, %v8382_v9  ;;  %v8321_v27 = vadd.f32 %v14832_v14, %v8239_v2  ;;  %v10919_v53 = vpop.f32.mrb[62].mxu0 }
 0x80c   : > { %v8242_v22 = vpop.f32.mrb[63].mxu0  ;;  %v8324_v8 = vadd.f32 %v10919_v53, %v14832_v14  ;;  %v8355_v23 = vadd.f32 %v11978_v47, %v8323_v55 }
 0x80d   : > { %v8414_v46 = vadd.f32 %v8413_v54, %v8383_v44  ;;  %v8353_v30 = vadd.f32 %v11977_v20, %v8321_v27  ;;  %v8322_v63 = vadd.f32 %v14832_v14, %v8242_v22 }
 0x80e   : > { %v8356_v13 = vadd.f32 %v11980_v58, %v8324_v8  ;;  %v8387_v45 = vmax.f32 %v8355_v23, 0.0 }
 0x80f   : > { %v8385_v0 = vmax.f32 %v8353_v30, 0.0  ;;  %v8415_v4 = vadd.f32 %v8414_v46, %v8384_v21  ;;  %v8354_v51 = vadd.f32 %v11979_v6, %v8322_v63 }
 0x810   : > { %v8388_v62 = vmax.f32 %v8356_v13, 0.0 }
 0x811   : > { %v8416_v35 = vadd.f32 %v8415_v4, %v8385_v0  ;;  %v8386_v61 = vmax.f32 %v8354_v51, 0.0 }
 0x813   : > { %v8417_v50 = vadd.f32 %v8416_v35, %v8386_v61 }
 0x815   : > { %v8418_v12 = vadd.f32 %v8417_v50, %v8387_v45 }
 0x817   : > { %v8419_v52 = vadd.f32 %v8418_v12, %v8388_v62 }
 0x819   : > { %v8420_v11 = vrot.slane %v8419_v52, 4 }
 0x81b   : > { %v8421_v25 = vadd.f32 %v8420_v11, %v8419_v52 }
 0x81d   : > { %v8422_v14 = vrot.slane %v8421_v25, 2 }
 0x81f   : > { %v8423_v24 = vadd.f32 %v8422_v14, %v8421_v25 }
 0x821   : > { %v8424_v29 = vrot.slane %v8423_v24, 1 }
 0x823   : > { %v8425_v16 = vadd.f32 %v8424_v29, %v8423_v24 }
 0x825   : > { %v8427_v18 = vmul.f32 0.00390625, %v8425_v16 }
 0x827   : > { %10953 = vmatmul.mubr.f32.vlgmr.msra.gmra.mrb[80].mxu1 %v8427_v18 }
 0x8fa   : > { %v8511_v38 = vpop.f32.mrb[80].mxu1 }
 0x8fb   : > { %v8512_v39 = vadd.f32 %v8511_v38, %v8444_v59  ;;  %v10954_v15 = vpop.f32.mrb[81].mxu1 }
 0x8fd   : > { %8516 = vst.msk [vmem:[%s324_s26] sm:$0x1] %vm8515_vm5, %v8512_v39 }
 0x8fe   : > { %11994 = shalt.err (!%p11991_p3)
}
 0x8ff   : > { %s11995_s22 = scalar_lea.hbm %s14874_s14, 16  ;;  %s11999_s26 = scalar_lea.hbm %s14925_s9, 32 }
 0x900   : > { %p11996_p4 = scmp.ne.s32.totalorder %s14874_s14, %s11995_s22  ;;  %p12000_p9 = scmp.lt.u32.totalorder %s14874_s14, %s14925_s9 }
 0x901   : > { %p12001_p10 = scmp.lt.u32.totalorder %s11999_s26, %s11995_s22  ;;  %p12003_p12 = scmp.lt.u32.totalorder %s11995_s22, %s14874_s14 }
 0x902   : > { %p11997_p7 = pnand %p11996_p4, %p12137_p5 }
 0x903   : > { %p12002_p11 = por %p12001_p10, %p12000_p9 }
 0x904   : > { %p11998_p8 = pneg %p11997_p7 }
 0x905   : > { %p12004_p13 = por %p12003_p12, %p12002_p11 }
 0x907   : > { %p12005_p0 = pnand %p12004_p13, %p11998_p8 }
 0x909   : > { %12008 = shalt.err (!%p12005_p0)
}
 0x90a   : > { %11760 = dma.vmem_to_hbm [thread:$0]  (%p12137_p5), %s14876_s27, 16, %s14874_s14, %s8518_s16  }
 0x90b PF: > { %p11766_p1 = scmp.ge.s32.totalorder %s12043_s12, 2  ;;  %s8542_s17 = sand.u32 1, %s12031_s30  }
 0x90c   : > { %s8543_s13 = scalar_lea.sflag [#allocation5], %s8542_s17 }
 0x90d   : > { %p11763_p2 = pnand %p11766_p1, %p12141_p6 }
 0x90f   : > { %12026 = dma.done.wait (!%p11763_p2), %s8543_s13, 16  }
 0x910   : > { %12028 = vsyncadd (!%p11763_p2), %s8543_s13, 4294967280  ;;  %p19_p3 = scmp.ge.s32.totalorder %s12124_s15, 4   ;;  %s15107_s30 = smov %s12035_s10 }
 0x911   : > { %s15108_s10 = smov %s12039_s11  ;;  %s15109_s11 = smov %s12135_s18 }
 0x912   : > { %s15110_s12 = smov %s12124_s15  ;;  %21 = sbr.rel (!%p19_p3) target bundleno = 3 (0x3), region = 117 }
 0x919   :  { %8547 = vsyncpa [#allocation5], 1 }
 0x91a   :  { %8549 = vsyncpa [#allocation5 + $0x1], 1 }

</bundles_post_ra>
